<compile_context>
chip_gen: v7x
topology: tpu7x:2x2x1
jax: 0.10.0
libtpu: 0.0.40
codegen_flags: <defaults>
</compile_context>

<pallas_src>
import jax
import jax.numpy as jnp
import numpy as np
from jax.experimental import pallas as pl
from jax.experimental.pallas import tpu as pltpu

# ---------------- network configuration (small, deterministic) ----------------
C_LIST = [8, 16, 16, 16, 32]      # C_list[0..cnt_layers]
STRIDES = [2, 1, 1, 1]            # strides_list
NUM_CLASSES = 10
CNT_LAYERS = 4                    # len(SEARCH_SPACE['input_shape'])
N_MIXED = CNT_LAYERS - 2          # 2 MixedOp layers

N_BATCH = 2
IN_HW = 16
OUT_HW = (IN_HW - 3) // STRIDES[0] + 1     # 7 (first conv: 3x3, stride 2, pad 0)

# Padded spatial layout: each image is an 8x8 grid (row 7 / col 7 are zero guard
# positions), 64 rows per image -> M = 128 total activation rows.
GRID = 8
ROWS_PER_IMG = GRID * GRID                  # 64
M_PAD = N_BATCH * ROWS_PER_IMG              # 128
HALO = 16                                   # zero rows above the activation in scratch
XH_ROWS = HALO + M_PAD + 16                 # 160 (16 top halo + 128 + 16 bottom halo)
CPAD = 128                                  # lane-dense channel padding
K_FIRST = 3 * 3 * 3                         # 27
K_FIRST_PAD = 32
NB_PAD = 8                                  # padded batch rows for pool/logits slab

# Row offsets of the 9 taps of a 3x3 / stride-1 / pad-1 conv in the 8x8-grid layout.
_TAP_OFFS = [(kh - 1) * GRID + (kw - 1) for kh in range(3) for kw in range(3)]


# ---------------- the single fused forward kernel ----------------
def _forward_kernel(patches_ref, w_first_ref, stem_b_ref,
                    w_dw_ref, dw_b_ref, w_pw_ref, pw_b_ref,
                    w_mx_ref, mx_b_ref, gate_ref,
                    w_post_ref, po_b_ref,
                    pool_ref, w_cls_ref, b_cls_ref, mask_ref,
                    out_ref, xh_ref, mxk_ref):
    f32, bf16 = jnp.float32, jnp.bfloat16

    # Zero the halo/guard buffer once; interior rows are overwritten below, halos and
    # guard rows stay zero for the whole kernel (they ARE the conv zero padding).
    xh_ref[...] = jnp.zeros_like(xh_ref)

    # ---- first_conv (stem BN scale pre-folded into weights) + bias + ReLU6 ----
    acc = jnp.dot(patches_ref[...], w_first_ref[...], preferred_element_type=f32)
    x = jnp.clip(acc + stem_b_ref[...], 0.0, 6.0) * mask_ref[...]     # (128, 128) f32
    xh_ref[pl.ds(HALO, M_PAD), :] = x

    # ---- mbconv3: depthwise 3x3 (pad 1) — pure VPU shift / FMA, no MXU ----
    acc = jnp.zeros((M_PAD, CPAD), f32)
    for t, d in enumerate(_TAP_OFFS):
        acc = acc + xh_ref[pl.ds(HALO + d, M_PAD), :] * w_dw_ref[t]
    x = jnp.clip(acc + dw_b_ref[...], 0.0, 6.0)                       # ReLU6

    # ---- mbconv3: pointwise 1x1 + BN bias (linear) ----
    acc = jnp.dot(x.astype(bf16), w_pw_ref[...], preferred_element_type=f32)
    x = (acc + pw_b_ref[...]) * mask_ref[...]
    xh_ref[pl.ds(HALO, M_PAD), :] = x

    # ---- MixedOp layers: x = Identity(x) + path_gate * ReLU6(BN(conv3x3(x))) ----
    # 9 shifted copies -> one (128, 1152) bf16 slab -> single K=1152 GEMM per layer.
    for l in range(N_MIXED):
        for t, d in enumerate(_TAP_OFFS):
            mxk_ref[:, pl.ds(t * CPAD, CPAD)] = (
                xh_ref[pl.ds(HALO + d, M_PAD), :].astype(bf16))
        acc = jnp.dot(mxk_ref[...], w_mx_ref[l], preferred_element_type=f32)
        conv = jnp.clip(acc + mx_b_ref[l], 0.0, 6.0) * mask_ref[...]
        x = x + gate_ref[l] * conv                                    # fused gate+residual
        if l + 1 < N_MIXED:                   # next layer's 3x3 needs the halo buffer
            xh_ref[pl.ds(HALO, M_PAD), :] = x

    # ---- post ConvBNReLU (1x1) ----
    acc = jnp.dot(x.astype(bf16), w_post_ref[...], preferred_element_type=f32)
    x = jnp.clip(acc + po_b_ref[...], 0.0, 6.0)

    # ---- global average pool (1/49 folded into pool matrix) + classifier ----
    pooled = jnp.dot(pool_ref[...], x.astype(bf16), preferred_element_type=f32)  # (8,128)
    logits = jnp.dot(pooled.astype(bf16), w_cls_ref[...],
                     preferred_element_type=f32) + b_cls_ref[...]
    out_ref[...] = logits                                             # lane-dense (8, 128)


# ---------------- parameter / constant construction ----------------
def _pad_np(a, shape):
    out = np.zeros(shape, np.float32)
    out[tuple(slice(0, d) for d in a.shape)] = a
    return out


def _row128(v):
    out = np.zeros((1, CPAD), np.float32)
    out[0, :v.shape[0]] = v
    return jnp.asarray(out)


def _bn_fold(key, c):
    kg, kb = jax.random.split(key)
    gamma = 1.0 + 0.1 * jax.random.normal(kg, (c,), jnp.float32)
    beta = 0.05 * jax.random.normal(kb, (c,), jnp.float32)
    mean = jnp.zeros((c,), jnp.float32)
    var = jnp.ones((c,), jnp.float32)
    scale = gamma / jnp.sqrt(var + 1e-5)
    bias = beta - mean * scale
    return np.asarray(scale), np.asarray(bias)


def init_params(key):
    keys = jax.random.split(key, 24)
    p = {}

    def randn(k, shape, s=0.1):
        return np.asarray(s * jax.random.normal(k, shape, jnp.float32))

    # first_conv: Conv2d(3, C0, 3, stride 2, pad 0, bias=False); stem BN scale folded in.
    w = randn(keys[0], (K_FIRST, C_LIST[0]))          # K order = (kh, kw, c_in)
    s, b = _bn_fold(keys[1], C_LIST[0])
    p['w_first'] = jnp.asarray(_pad_np(w * s[None, :], (K_FIRST_PAD, CPAD)), jnp.bfloat16)
    p['stem_b'] = _row128(b)

    # mbconv3 (expand 1): depthwise 3x3 + BN + ReLU6 (BN scale folded per tap, f32 / VPU)
    wdw = randn(keys[2], (9, C_LIST[0]))
    s, b = _bn_fold(keys[3], C_LIST[0])
    p['w_dw'] = jnp.asarray(_pad_np((wdw * s[None, :])[:, None, :], (9, 1, CPAD)))
    p['dw_b'] = _row128(b)

    # mbconv3: pointwise 1x1 + BN (linear), scale folded
    wpw = randn(keys[4], (C_LIST[0], C_LIST[1]))
    s, b = _bn_fold(keys[5], C_LIST[1])
    p['w_pw'] = jnp.asarray(_pad_np(wpw * s[None, :], (CPAD, CPAD)), jnp.bfloat16)
    p['pw_b'] = _row128(b)

    # MixedOp layers i = 1 .. cnt_layers-2 (active op: Conv3x3+BN+ReLU6, Identity shortcut)
    # Weights reshaped to a single (9*128, 128) K-merged slab per layer, scale folded.
    w_mx, mx_b = [], []
    for li, i in enumerate(range(1, CNT_LAYERS - 1)):
        cin, cout = C_LIST[i], C_LIST[i + 1]
        assert STRIDES[i] == 1 and cin == cout, "Identity residual needs stride 1, C_in==C_out"
        w = randn(keys[6 + 2 * li], (9, cin, cout))
        s, b = _bn_fold(keys[7 + 2 * li], cout)
        wp = np.zeros((9, CPAD, CPAD), np.float32)
        wp[:, :cin, :cout] = w * s[None, None, :]
        w_mx.append(wp.reshape(9 * CPAD, CPAD))
        bb = np.zeros((1, CPAD), np.float32)
        bb[0, :cout] = b
        mx_b.append(bb)
    p['w_mx'] = jnp.asarray(np.stack(w_mx), jnp.bfloat16)     # (2, 1152, 128)
    p['mx_b'] = jnp.asarray(np.stack(mx_b))                   # (2, 1, 128) f32
    # path_gate in post-binarize() state: gate = 1.0 on the active path
    p['gate'] = jnp.ones((N_MIXED, 1, CPAD), jnp.float32)

    # post: ConvBNReLU(C[cnt-1], C[cnt], 1, 1, 0), scale folded
    wpo = randn(keys[20], (C_LIST[CNT_LAYERS - 1], C_LIST[CNT_LAYERS]))
    s, b = _bn_fold(keys[21], C_LIST[CNT_LAYERS])
    p['w_post'] = jnp.asarray(_pad_np(wpo * s[None, :], (CPAD, CPAD)), jnp.bfloat16)
    p['po_b'] = _row128(b)

    # classifier: Linear(C[cnt], num_classes)
    wcls = randn(keys[22], (C_LIST[CNT_LAYERS], NUM_CLASSES))
    p['w_cls'] = jnp.asarray(_pad_np(wcls, (CPAD, CPAD)), jnp.bfloat16)
    bcls = np.asarray(0.05 * jax.random.normal(keys[23], (NUM_CLASSES,), jnp.float32))
    p['b_cls'] = _row128(bcls)

    # pooling matrix (1/49 folded, selects only real rows) + interior row mask
    pool = np.zeros((NB_PAD, M_PAD), np.float32)
    mask = np.zeros((M_PAD, 1), np.float32)
    for n in range(N_BATCH):
        for h in range(OUT_HW):
            for w_ in range(OUT_HW):
                r = n * ROWS_PER_IMG + h * GRID + w_
                pool[n, r] = 1.0 / (OUT_HW * OUT_HW)
                mask[r, 0] = 1.0
    p['pool'] = jnp.asarray(pool, jnp.bfloat16)                                # (8, 128)
    p['mask'] = jnp.asarray(np.broadcast_to(mask, (M_PAD, CPAD)).copy())       # (128, 128)
    return p


# ---------------- forward pass (one pallas_call) ----------------
@jax.jit
def network_forward(params, x_nchw):
    p = params
    assert x_nchw.shape[0] == N_BATCH
    # Boundary-only data prep (single XLA fusion): NCHW -> NHWC, stride-2 im2col of the
    # tiny 3-channel input, laid out directly on the padded 8x8-per-image row grid.
    x = jnp.transpose(x_nchw, (0, 2, 3, 1)).astype(jnp.float32)        # (2, 16, 16, 3)
    span = 2 * (OUT_HW - 1) + 1                                        # 13
    cols = []
    for kh in range(3):
        for kw in range(3):
            cols.append(x[:, kh:kh + span:2, kw:kw + span:2, :])       # (2, 7, 7, 3) each
    patches = jnp.concatenate(cols, axis=-1)                           # (2, 7, 7, 27)
    patches = jnp.pad(patches, ((0, 0), (0, GRID - OUT_HW),
                                (0, GRID - OUT_HW), (0, K_FIRST_PAD - K_FIRST)))
    patches = patches.reshape(M_PAD, K_FIRST_PAD).astype(jnp.bfloat16)  # (128, 32)

    vm = pl.BlockSpec(memory_space=pltpu.MemorySpace.VMEM)
    logits_pad = pl.pallas_call(
        _forward_kernel,
        out_shape=jax.ShapeDtypeStruct((NB_PAD, CPAD), jnp.float32),
        in_specs=[vm] * 16,
        out_specs=vm,
        scratch_shapes=[
            pltpu.VMEM((XH_ROWS, CPAD), jnp.float32),      # zero-halo activation buffer
            pltpu.VMEM((M_PAD, 9 * CPAD), jnp.bfloat16),   # K-merged shifted-copies slab
        ],
    )(patches, p['w_first'], p['stem_b'],
      p['w_dw'], p['dw_b'], p['w_pw'], p['pw_b'],
      p['w_mx'], p['mx_b'], p['gate'],
      p['w_post'], p['po_b'],
      p['pool'], p['w_cls'], p['b_cls'], p['mask'])
    # lane-dense [8, 128] output slab; real logits are rows [:N_BATCH], lanes [:NUM_CLASSES]
    return logits_pad[:N_BATCH, :NUM_CLASSES]


if __name__ == "__main__":
    key = jax.random.PRNGKey(0)
    kp, kx = jax.random.split(key)
    params = init_params(kp)
    x = jax.random.normal(kx, (N_BATCH, 3, IN_HW, IN_HW), jnp.float32)   # NCHW like PyTorch
    logits = network_forward(params, x)
    logits = jax.block_until_ready(logits)
    assert logits.shape == (N_BATCH, NUM_CLASSES)
    assert bool(jnp.all(jnp.isfinite(logits)))
    print("KERNEL_OK")
</pallas_src>

<mosaic_0001>
module attributes {stable_mosaic.version = 11 : i64} {
  func.func @_forward_kernel(%arg0: memref<128x32xbf16, #tpu.memory_space<vmem>>, %arg1: memref<32x128xbf16, #tpu.memory_space<vmem>>, %arg2: memref<1x128xf32, #tpu.memory_space<vmem>>, %arg3: memref<9x1x128xf32, #tpu.memory_space<vmem>>, %arg4: memref<1x128xf32, #tpu.memory_space<vmem>>, %arg5: memref<128x128xbf16, #tpu.memory_space<vmem>>, %arg6: memref<1x128xf32, #tpu.memory_space<vmem>>, %arg7: memref<2x1152x128xbf16, #tpu.memory_space<vmem>>, %arg8: memref<2x1x128xf32, #tpu.memory_space<vmem>>, %arg9: memref<2x1x128xf32, #tpu.memory_space<vmem>>, %arg10: memref<128x128xbf16, #tpu.memory_space<vmem>>, %arg11: memref<1x128xf32, #tpu.memory_space<vmem>>, %arg12: memref<8x128xbf16, #tpu.memory_space<vmem>>, %arg13: memref<128x128xbf16, #tpu.memory_space<vmem>>, %arg14: memref<1x128xf32, #tpu.memory_space<vmem>>, %arg15: memref<128x128xf32, #tpu.memory_space<vmem>>, %arg16: memref<8x128xf32, #tpu.memory_space<vmem>>, %arg17: memref<160x128xf32, #tpu.memory_space<vmem>>, %arg18: memref<128x1152xbf16, #tpu.memory_space<vmem>>) attributes {dimension_semantics = [], scalar_prefetch = 0 : i64, scratch_operands = 2 : i64, tpu.core_type = #tpu.core_type<tc>} {
    %cst = arith.constant 0.000000e+00 : f32
    %0 = vector.broadcast %cst : f32 to vector<160x128xf32>
    %c0 = arith.constant 0 : index
    %c0_0 = arith.constant 0 : index
    %1 = vector.load %arg17[%c0, %c0_0] : memref<160x128xf32, #tpu.memory_space<vmem>>, vector<160x128xf32>
    tpu.vector_store %arg17[%c0, %c0_0], %0 {strides = array<i32>} : memref<160x128xf32, #tpu.memory_space<vmem>>, vector<160x128xf32>,
    %c0_1 = arith.constant 0 : index
    %c0_2 = arith.constant 0 : index
    %2 = vector.load %arg0[%c0_1, %c0_2] : memref<128x32xbf16, #tpu.memory_space<vmem>>, vector<128x32xbf16>
    %c0_3 = arith.constant 0 : index
    %c0_4 = arith.constant 0 : index
    %3 = vector.load %arg1[%c0_3, %c0_4] : memref<32x128xbf16, #tpu.memory_space<vmem>>, vector<32x128xbf16>
    %cst_5 = arith.constant dense<0.000000e+00> : vector<128x128xf32>
    %4 = tpu.matmul %2, %3, %cst_5 {dimension_numbers = #tpu.dot_dimension_numbers<[1], [0], [0], [1], [0, 0, 1, 1], [], []>} : vector<128x32xbf16>, vector<32x128xbf16>, vector<128x128xf32> -> vector<128x128xf32>
    %c0_6 = arith.constant 0 : index
    %c0_7 = arith.constant 0 : index
    %5 = vector.load %arg2[%c0_6, %c0_7] : memref<1x128xf32, #tpu.memory_space<vmem>>, vector<1x128xf32>
    %6 = vector.broadcast %5 : vector<1x128xf32> to vector<128x128xf32>
    %7 = arith.addf %4, %6 : vector<128x128xf32>
    %cst_8 = arith.constant 0.000000e+00 : f32
    %cst_9 = arith.constant 6.000000e+00 : f32
    %8 = vector.broadcast %cst_8 : f32 to vector<128x128xf32>
    %9 = arith.maximumf %8, %7 : vector<128x128xf32>
    %10 = vector.broadcast %cst_9 : f32 to vector<128x128xf32>
    %11 = arith.minimumf %10, %9 : vector<128x128xf32>
    %c0_10 = arith.constant 0 : index
    %c0_11 = arith.constant 0 : index
    %12 = vector.load %arg15[%c0_10, %c0_11] : memref<128x128xf32, #tpu.memory_space<vmem>>, vector<128x128xf32>
    %13 = arith.mulf %11, %12 : vector<128x128xf32>
    %c16 = arith.constant 16 : index
    %c0_12 = arith.constant 0 : index
    %14 = vector.load %arg17[%c16, %c0_12] : memref<160x128xf32, #tpu.memory_space<vmem>>, vector<128x128xf32>
    tpu.vector_store %arg17[%c16, %c0_12], %13 {strides = array<i32>} : memref<160x128xf32, #tpu.memory_space<vmem>>, vector<128x128xf32>,
    %cst_13 = arith.constant 0.000000e+00 : f32
    %15 = vector.broadcast %cst_13 : f32 to vector<128x128xf32>
    %c7 = arith.constant 7 : index
    %c0_14 = arith.constant 0 : index
    %16 = vector.load %arg17[%c7, %c0_14] : memref<160x128xf32, #tpu.memory_space<vmem>>, vector<128x128xf32>
    %c0_15 = arith.constant 0 : index
    %c0_16 = arith.constant 0 : index
    %c0_17 = arith.constant 0 : index
    %17 = vector.load %arg3[%c0_15, %c0_16, %c0_17] : memref<9x1x128xf32, #tpu.memory_space<vmem>>, vector<1x1x128xf32>
    %18 = vector.shape_cast %17 : vector<1x1x128xf32> to vector<1x128xf32>
    %19 = vector.broadcast %18 : vector<1x128xf32> to vector<128x128xf32>
    %20 = arith.mulf %16, %19 : vector<128x128xf32>
    %21 = arith.addf %15, %20 : vector<128x128xf32>
    %c8 = arith.constant 8 : index
    %c0_18 = arith.constant 0 : index
    %22 = vector.load %arg17[%c8, %c0_18] : memref<160x128xf32, #tpu.memory_space<vmem>>, vector<128x128xf32>
    %c1 = arith.constant 1 : index
    %c0_19 = arith.constant 0 : index
    %c0_20 = arith.constant 0 : index
    %23 = vector.load %arg3[%c1, %c0_19, %c0_20] : memref<9x1x128xf32, #tpu.memory_space<vmem>>, vector<1x1x128xf32>
    %24 = vector.shape_cast %23 : vector<1x1x128xf32> to vector<1x128xf32>
    %25 = vector.broadcast %24 : vector<1x128xf32> to vector<128x128xf32>
    %26 = arith.mulf %22, %25 : vector<128x128xf32>
    %27 = arith.addf %21, %26 : vector<128x128xf32>
    %c9 = arith.constant 9 : index
    %c0_21 = arith.constant 0 : index
    %28 = vector.load %arg17[%c9, %c0_21] : memref<160x128xf32, #tpu.memory_space<vmem>>, vector<128x128xf32>
    %c2 = arith.constant 2 : index
    %c0_22 = arith.constant 0 : index
    %c0_23 = arith.constant 0 : index
    %29 = vector.load %arg3[%c2, %c0_22, %c0_23] : memref<9x1x128xf32, #tpu.memory_space<vmem>>, vector<1x1x128xf32>
    %30 = vector.shape_cast %29 : vector<1x1x128xf32> to vector<1x128xf32>
    %31 = vector.broadcast %30 : vector<1x128xf32> to vector<128x128xf32>
    %32 = arith.mulf %28, %31 : vector<128x128xf32>
    %33 = arith.addf %27, %32 : vector<128x128xf32>
    %c15 = arith.constant 15 : index
    %c0_24 = arith.constant 0 : index
    %34 = vector.load %arg17[%c15, %c0_24] : memref<160x128xf32, #tpu.memory_space<vmem>>, vector<128x128xf32>
    %c3 = arith.constant 3 : index
    %c0_25 = arith.constant 0 : index
    %c0_26 = arith.constant 0 : index
    %35 = vector.load %arg3[%c3, %c0_25, %c0_26] : memref<9x1x128xf32, #tpu.memory_space<vmem>>, vector<1x1x128xf32>
    %36 = vector.shape_cast %35 : vector<1x1x128xf32> to vector<1x128xf32>
    %37 = vector.broadcast %36 : vector<1x128xf32> to vector<128x128xf32>
    %38 = arith.mulf %34, %37 : vector<128x128xf32>
    %39 = arith.addf %33, %38 : vector<128x128xf32>
    %c16_27 = arith.constant 16 : index
    %c0_28 = arith.constant 0 : index
    %40 = vector.load %arg17[%c16_27, %c0_28] : memref<160x128xf32, #tpu.memory_space<vmem>>, vector<128x128xf32>
    %c4 = arith.constant 4 : index
    %c0_29 = arith.constant 0 : index
    %c0_30 = arith.constant 0 : index
    %41 = vector.load %arg3[%c4, %c0_29, %c0_30] : memref<9x1x128xf32, #tpu.memory_space<vmem>>, vector<1x1x128xf32>
    %42 = vector.shape_cast %41 : vector<1x1x128xf32> to vector<1x128xf32>
    %43 = vector.broadcast %42 : vector<1x128xf32> to vector<128x128xf32>
    %44 = arith.mulf %40, %43 : vector<128x128xf32>
    %45 = arith.addf %39, %44 : vector<128x128xf32>
    %c17 = arith.constant 17 : index
    %c0_31 = arith.constant 0 : index
    %46 = vector.load %arg17[%c17, %c0_31] : memref<160x128xf32, #tpu.memory_space<vmem>>, vector<128x128xf32>
    %c5 = arith.constant 5 : index
    %c0_32 = arith.constant 0 : index
    %c0_33 = arith.constant 0 : index
    %47 = vector.load %arg3[%c5, %c0_32, %c0_33] : memref<9x1x128xf32, #tpu.memory_space<vmem>>, vector<1x1x128xf32>
    %48 = vector.shape_cast %47 : vector<1x1x128xf32> to vector<1x128xf32>
    %49 = vector.broadcast %48 : vector<1x128xf32> to vector<128x128xf32>
    %50 = arith.mulf %46, %49 : vector<128x128xf32>
    %51 = arith.addf %45, %50 : vector<128x128xf32>
    %c23 = arith.constant 23 : index
    %c0_34 = arith.constant 0 : index
    %52 = vector.load %arg17[%c23, %c0_34] : memref<160x128xf32, #tpu.memory_space<vmem>>, vector<128x128xf32>
    %c6 = arith.constant 6 : index
    %c0_35 = arith.constant 0 : index
    %c0_36 = arith.constant 0 : index
    %53 = vector.load %arg3[%c6, %c0_35, %c0_36] : memref<9x1x128xf32, #tpu.memory_space<vmem>>, vector<1x1x128xf32>
    %54 = vector.shape_cast %53 : vector<1x1x128xf32> to vector<1x128xf32>
    %55 = vector.broadcast %54 : vector<1x128xf32> to vector<128x128xf32>
    %56 = arith.mulf %52, %55 : vector<128x128xf32>
    %57 = arith.addf %51, %56 : vector<128x128xf32>
    %c24 = arith.constant 24 : index
    %c0_37 = arith.constant 0 : index
    %58 = vector.load %arg17[%c24, %c0_37] : memref<160x128xf32, #tpu.memory_space<vmem>>, vector<128x128xf32>
    %c7_38 = arith.constant 7 : index
    %c0_39 = arith.constant 0 : index
    %c0_40 = arith.constant 0 : index
    %59 = vector.load %arg3[%c7_38, %c0_39, %c0_40] : memref<9x1x128xf32, #tpu.memory_space<vmem>>, vector<1x1x128xf32>
    %60 = vector.shape_cast %59 : vector<1x1x128xf32> to vector<1x128xf32>
    %61 = vector.broadcast %60 : vector<1x128xf32> to vector<128x128xf32>
    %62 = arith.mulf %58, %61 : vector<128x128xf32>
    %63 = arith.addf %57, %62 : vector<128x128xf32>
    %c25 = arith.constant 25 : index
    %c0_41 = arith.constant 0 : index
    %64 = vector.load %arg17[%c25, %c0_41] : memref<160x128xf32, #tpu.memory_space<vmem>>, vector<128x128xf32>
    %c8_42 = arith.constant 8 : index
    %c0_43 = arith.constant 0 : index
    %c0_44 = arith.constant 0 : index
    %65 = vector.load %arg3[%c8_42, %c0_43, %c0_44] : memref<9x1x128xf32, #tpu.memory_space<vmem>>, vector<1x1x128xf32>
    %66 = vector.shape_cast %65 : vector<1x1x128xf32> to vector<1x128xf32>
    %67 = vector.broadcast %66 : vector<1x128xf32> to vector<128x128xf32>
    %68 = arith.mulf %64, %67 : vector<128x128xf32>
    %69 = arith.addf %63, %68 : vector<128x128xf32>
    %c0_45 = arith.constant 0 : index
    %c0_46 = arith.constant 0 : index
    %70 = vector.load %arg4[%c0_45, %c0_46] : memref<1x128xf32, #tpu.memory_space<vmem>>, vector<1x128xf32>
    %71 = vector.broadcast %70 : vector<1x128xf32> to vector<128x128xf32>
    %72 = arith.addf %69, %71 : vector<128x128xf32>
    %cst_47 = arith.constant 0.000000e+00 : f32
    %cst_48 = arith.constant 6.000000e+00 : f32
    %73 = vector.broadcast %cst_47 : f32 to vector<128x128xf32>
    %74 = arith.maximumf %73, %72 : vector<128x128xf32>
    %75 = vector.broadcast %cst_48 : f32 to vector<128x128xf32>
    %76 = arith.minimumf %75, %74 : vector<128x128xf32>
    %77 = arith.truncf %76 : vector<128x128xf32> to vector<128x128xbf16>
    %c0_49 = arith.constant 0 : index
    %c0_50 = arith.constant 0 : index
    %78 = vector.load %arg5[%c0_49, %c0_50] : memref<128x128xbf16, #tpu.memory_space<vmem>>, vector<128x128xbf16>
    %cst_51 = arith.constant dense<0.000000e+00> : vector<128x128xf32>
    %79 = tpu.matmul %77, %78, %cst_51 {dimension_numbers = #tpu.dot_dimension_numbers<[1], [0], [0], [1], [0, 0, 1, 1], [], []>} : vector<128x128xbf16>, vector<128x128xbf16>, vector<128x128xf32> -> vector<128x128xf32>
    %c0_52 = arith.constant 0 : index
    %c0_53 = arith.constant 0 : index
    %80 = vector.load %arg6[%c0_52, %c0_53] : memref<1x128xf32, #tpu.memory_space<vmem>>, vector<1x128xf32>
    %81 = vector.broadcast %80 : vector<1x128xf32> to vector<128x128xf32>
    %82 = arith.addf %79, %81 : vector<128x128xf32>
    %c0_54 = arith.constant 0 : index
    %c0_55 = arith.constant 0 : index
    %83 = vector.load %arg15[%c0_54, %c0_55] : memref<128x128xf32, #tpu.memory_space<vmem>>, vector<128x128xf32>
    %84 = arith.mulf %82, %83 : vector<128x128xf32>
    %c16_56 = arith.constant 16 : index
    %c0_57 = arith.constant 0 : index
    %85 = vector.load %arg17[%c16_56, %c0_57] : memref<160x128xf32, #tpu.memory_space<vmem>>, vector<128x128xf32>
    tpu.vector_store %arg17[%c16_56, %c0_57], %84 {strides = array<i32>} : memref<160x128xf32, #tpu.memory_space<vmem>>, vector<128x128xf32>,
    %c7_58 = arith.constant 7 : index
    %c0_59 = arith.constant 0 : index
    %86 = vector.load %arg17[%c7_58, %c0_59] : memref<160x128xf32, #tpu.memory_space<vmem>>, vector<128x128xf32>
    %87 = arith.truncf %86 : vector<128x128xf32> to vector<128x128xbf16>
    %c0_60 = arith.constant 0 : index
    %c0_61 = arith.constant 0 : index
    %88 = vector.load %arg18[%c0_60, %c0_61] : memref<128x1152xbf16, #tpu.memory_space<vmem>>, vector<128x128xbf16>
    tpu.vector_store %arg18[%c0_60, %c0_61], %87 {strides = array<i32>} : memref<128x1152xbf16, #tpu.memory_space<vmem>>, vector<128x128xbf16>,
    %c8_62 = arith.constant 8 : index
    %c0_63 = arith.constant 0 : index
    %89 = vector.load %arg17[%c8_62, %c0_63] : memref<160x128xf32, #tpu.memory_space<vmem>>, vector<128x128xf32>
    %90 = arith.truncf %89 : vector<128x128xf32> to vector<128x128xbf16>
    %c0_64 = arith.constant 0 : index
    %c128 = arith.constant 128 : index
    %91 = vector.load %arg18[%c0_64, %c128] : memref<128x1152xbf16, #tpu.memory_space<vmem>>, vector<128x128xbf16>
    tpu.vector_store %arg18[%c0_64, %c128], %90 {strides = array<i32>} : memref<128x1152xbf16, #tpu.memory_space<vmem>>, vector<128x128xbf16>,
    %c9_65 = arith.constant 9 : index
    %c0_66 = arith.constant 0 : index
    %92 = vector.load %arg17[%c9_65, %c0_66] : memref<160x128xf32, #tpu.memory_space<vmem>>, vector<128x128xf32>
    %93 = arith.truncf %92 : vector<128x128xf32> to vector<128x128xbf16>
    %c0_67 = arith.constant 0 : index
    %c256 = arith.constant 256 : index
    %94 = vector.load %arg18[%c0_67, %c256] : memref<128x1152xbf16, #tpu.memory_space<vmem>>, vector<128x128xbf16>
    tpu.vector_store %arg18[%c0_67, %c256], %93 {strides = array<i32>} : memref<128x1152xbf16, #tpu.memory_space<vmem>>, vector<128x128xbf16>,
    %c15_68 = arith.constant 15 : index
    %c0_69 = arith.constant 0 : index
    %95 = vector.load %arg17[%c15_68, %c0_69] : memref<160x128xf32, #tpu.memory_space<vmem>>, vector<128x128xf32>
    %96 = arith.truncf %95 : vector<128x128xf32> to vector<128x128xbf16>
    %c0_70 = arith.constant 0 : index
    %c384 = arith.constant 384 : index
    %97 = vector.load %arg18[%c0_70, %c384] : memref<128x1152xbf16, #tpu.memory_space<vmem>>, vector<128x128xbf16>
    tpu.vector_store %arg18[%c0_70, %c384], %96 {strides = array<i32>} : memref<128x1152xbf16, #tpu.memory_space<vmem>>, vector<128x128xbf16>,
    %c16_71 = arith.constant 16 : index
    %c0_72 = arith.constant 0 : index
    %98 = vector.load %arg17[%c16_71, %c0_72] : memref<160x128xf32, #tpu.memory_space<vmem>>, vector<128x128xf32>
    %99 = arith.truncf %98 : vector<128x128xf32> to vector<128x128xbf16>
    %c0_73 = arith.constant 0 : index
    %c512 = arith.constant 512 : index
    %100 = vector.load %arg18[%c0_73, %c512] : memref<128x1152xbf16, #tpu.memory_space<vmem>>, vector<128x128xbf16>
    tpu.vector_store %arg18[%c0_73, %c512], %99 {strides = array<i32>} : memref<128x1152xbf16, #tpu.memory_space<vmem>>, vector<128x128xbf16>,
    %c17_74 = arith.constant 17 : index
    %c0_75 = arith.constant 0 : index
    %101 = vector.load %arg17[%c17_74, %c0_75] : memref<160x128xf32, #tpu.memory_space<vmem>>, vector<128x128xf32>
    %102 = arith.truncf %101 : vector<128x128xf32> to vector<128x128xbf16>
    %c0_76 = arith.constant 0 : index
    %c640 = arith.constant 640 : index
    %103 = vector.load %arg18[%c0_76, %c640] : memref<128x1152xbf16, #tpu.memory_space<vmem>>, vector<128x128xbf16>
    tpu.vector_store %arg18[%c0_76, %c640], %102 {strides = array<i32>} : memref<128x1152xbf16, #tpu.memory_space<vmem>>, vector<128x128xbf16>,
    %c23_77 = arith.constant 23 : index
    %c0_78 = arith.constant 0 : index
    %104 = vector.load %arg17[%c23_77, %c0_78] : memref<160x128xf32, #tpu.memory_space<vmem>>, vector<128x128xf32>
    %105 = arith.truncf %104 : vector<128x128xf32> to vector<128x128xbf16>
    %c0_79 = arith.constant 0 : index
    %c768 = arith.constant 768 : index
    %106 = vector.load %arg18[%c0_79, %c768] : memref<128x1152xbf16, #tpu.memory_space<vmem>>, vector<128x128xbf16>
    tpu.vector_store %arg18[%c0_79, %c768], %105 {strides = array<i32>} : memref<128x1152xbf16, #tpu.memory_space<vmem>>, vector<128x128xbf16>,
    %c24_80 = arith.constant 24 : index
    %c0_81 = arith.constant 0 : index
    %107 = vector.load %arg17[%c24_80, %c0_81] : memref<160x128xf32, #tpu.memory_space<vmem>>, vector<128x128xf32>
    %108 = arith.truncf %107 : vector<128x128xf32> to vector<128x128xbf16>
    %c0_82 = arith.constant 0 : index
    %c896 = arith.constant 896 : index
    %109 = vector.load %arg18[%c0_82, %c896] : memref<128x1152xbf16, #tpu.memory_space<vmem>>, vector<128x128xbf16>
    tpu.vector_store %arg18[%c0_82, %c896], %108 {strides = array<i32>} : memref<128x1152xbf16, #tpu.memory_space<vmem>>, vector<128x128xbf16>,
    %c25_83 = arith.constant 25 : index
    %c0_84 = arith.constant 0 : index
    %110 = vector.load %arg17[%c25_83, %c0_84] : memref<160x128xf32, #tpu.memory_space<vmem>>, vector<128x128xf32>
    %111 = arith.truncf %110 : vector<128x128xf32> to vector<128x128xbf16>
    %c0_85 = arith.constant 0 : index
    %c1024 = arith.constant 1024 : index
    %112 = vector.load %arg18[%c0_85, %c1024] : memref<128x1152xbf16, #tpu.memory_space<vmem>>, vector<128x128xbf16>
    tpu.vector_store %arg18[%c0_85, %c1024], %111 {strides = array<i32>} : memref<128x1152xbf16, #tpu.memory_space<vmem>>, vector<128x128xbf16>,
    %c0_86 = arith.constant 0 : index
    %c0_87 = arith.constant 0 : index
    %113 = vector.load %arg18[%c0_86, %c0_87] : memref<128x1152xbf16, #tpu.memory_space<vmem>>, vector<128x1152xbf16>
    %c0_88 = arith.constant 0 : index
    %c0_89 = arith.constant 0 : index
    %c0_90 = arith.constant 0 : index
    %114 = vector.load %arg7[%c0_88, %c0_89, %c0_90] : memref<2x1152x128xbf16, #tpu.memory_space<vmem>>, vector<1x1152x128xbf16>
    %115 = vector.shape_cast %114 : vector<1x1152x128xbf16> to vector<1152x128xbf16>
    %cst_91 = arith.constant dense<0.000000e+00> : vector<128x128xf32>
    %116 = tpu.matmul %113, %115, %cst_91 {dimension_numbers = #tpu.dot_dimension_numbers<[1], [0], [0], [1], [0, 0, 1, 1], [], []>} : vector<128x1152xbf16>, vector<1152x128xbf16>, vector<128x128xf32> -> vector<128x128xf32>
    %c0_92 = arith.constant 0 : index
    %c0_93 = arith.constant 0 : index
    %c0_94 = arith.constant 0 : index
    %117 = vector.load %arg8[%c0_92, %c0_93, %c0_94] : memref<2x1x128xf32, #tpu.memory_space<vmem>>, vector<1x1x128xf32>
    %118 = vector.shape_cast %117 : vector<1x1x128xf32> to vector<1x128xf32>
    %119 = vector.broadcast %118 : vector<1x128xf32> to vector<128x128xf32>
    %120 = arith.addf %116, %119 : vector<128x128xf32>
    %cst_95 = arith.constant 0.000000e+00 : f32
    %cst_96 = arith.constant 6.000000e+00 : f32
    %121 = vector.broadcast %cst_95 : f32 to vector<128x128xf32>
    %122 = arith.maximumf %121, %120 : vector<128x128xf32>
    %123 = vector.broadcast %cst_96 : f32 to vector<128x128xf32>
    %124 = arith.minimumf %123, %122 : vector<128x128xf32>
    %c0_97 = arith.constant 0 : index
    %c0_98 = arith.constant 0 : index
    %125 = vector.load %arg15[%c0_97, %c0_98] : memref<128x128xf32, #tpu.memory_space<vmem>>, vector<128x128xf32>
    %126 = arith.mulf %124, %125 : vector<128x128xf32>
    %c0_99 = arith.constant 0 : index
    %c0_100 = arith.constant 0 : index
    %c0_101 = arith.constant 0 : index
    %127 = vector.load %arg9[%c0_99, %c0_100, %c0_101] : memref<2x1x128xf32, #tpu.memory_space<vmem>>, vector<1x1x128xf32>
    %128 = vector.shape_cast %127 : vector<1x1x128xf32> to vector<1x128xf32>
    %129 = vector.broadcast %128 : vector<1x128xf32> to vector<128x128xf32>
    %130 = arith.mulf %129, %126 : vector<128x128xf32>
    %131 = arith.addf %84, %130 : vector<128x128xf32>
    %c16_102 = arith.constant 16 : index
    %c0_103 = arith.constant 0 : index
    %132 = vector.load %arg17[%c16_102, %c0_103] : memref<160x128xf32, #tpu.memory_space<vmem>>, vector<128x128xf32>
    tpu.vector_store %arg17[%c16_102, %c0_103], %131 {strides = array<i32>} : memref<160x128xf32, #tpu.memory_space<vmem>>, vector<128x128xf32>,
    %c7_104 = arith.constant 7 : index
    %c0_105 = arith.constant 0 : index
    %133 = vector.load %arg17[%c7_104, %c0_105] : memref<160x128xf32, #tpu.memory_space<vmem>>, vector<128x128xf32>
    %134 = arith.truncf %133 : vector<128x128xf32> to vector<128x128xbf16>
    %c0_106 = arith.constant 0 : index
    %c0_107 = arith.constant 0 : index
    %135 = vector.load %arg18[%c0_106, %c0_107] : memref<128x1152xbf16, #tpu.memory_space<vmem>>, vector<128x128xbf16>
    tpu.vector_store %arg18[%c0_106, %c0_107], %134 {strides = array<i32>} : memref<128x1152xbf16, #tpu.memory_space<vmem>>, vector<128x128xbf16>,
    %c8_108 = arith.constant 8 : index
    %c0_109 = arith.constant 0 : index
    %136 = vector.load %arg17[%c8_108, %c0_109] : memref<160x128xf32, #tpu.memory_space<vmem>>, vector<128x128xf32>
    %137 = arith.truncf %136 : vector<128x128xf32> to vector<128x128xbf16>
    %c0_110 = arith.constant 0 : index
    %c128_111 = arith.constant 128 : index
    %138 = vector.load %arg18[%c0_110, %c128_111] : memref<128x1152xbf16, #tpu.memory_space<vmem>>, vector<128x128xbf16>
    tpu.vector_store %arg18[%c0_110, %c128_111], %137 {strides = array<i32>} : memref<128x1152xbf16, #tpu.memory_space<vmem>>, vector<128x128xbf16>,
    %c9_112 = arith.constant 9 : index
    %c0_113 = arith.constant 0 : index
    %139 = vector.load %arg17[%c9_112, %c0_113] : memref<160x128xf32, #tpu.memory_space<vmem>>, vector<128x128xf32>
    %140 = arith.truncf %139 : vector<128x128xf32> to vector<128x128xbf16>
    %c0_114 = arith.constant 0 : index
    %c256_115 = arith.constant 256 : index
    %141 = vector.load %arg18[%c0_114, %c256_115] : memref<128x1152xbf16, #tpu.memory_space<vmem>>, vector<128x128xbf16>
    tpu.vector_store %arg18[%c0_114, %c256_115], %140 {strides = array<i32>} : memref<128x1152xbf16, #tpu.memory_space<vmem>>, vector<128x128xbf16>,
    %c15_116 = arith.constant 15 : index
    %c0_117 = arith.constant 0 : index
    %142 = vector.load %arg17[%c15_116, %c0_117] : memref<160x128xf32, #tpu.memory_space<vmem>>, vector<128x128xf32>
    %143 = arith.truncf %142 : vector<128x128xf32> to vector<128x128xbf16>
    %c0_118 = arith.constant 0 : index
    %c384_119 = arith.constant 384 : index
    %144 = vector.load %arg18[%c0_118, %c384_119] : memref<128x1152xbf16, #tpu.memory_space<vmem>>, vector<128x128xbf16>
    tpu.vector_store %arg18[%c0_118, %c384_119], %143 {strides = array<i32>} : memref<128x1152xbf16, #tpu.memory_space<vmem>>, vector<128x128xbf16>,
    %c16_120 = arith.constant 16 : index
    %c0_121 = arith.constant 0 : index
    %145 = vector.load %arg17[%c16_120, %c0_121] : memref<160x128xf32, #tpu.memory_space<vmem>>, vector<128x128xf32>
    %146 = arith.truncf %145 : vector<128x128xf32> to vector<128x128xbf16>
    %c0_122 = arith.constant 0 : index
    %c512_123 = arith.constant 512 : index
    %147 = vector.load %arg18[%c0_122, %c512_123] : memref<128x1152xbf16, #tpu.memory_space<vmem>>, vector<128x128xbf16>
    tpu.vector_store %arg18[%c0_122, %c512_123], %146 {strides = array<i32>} : memref<128x1152xbf16, #tpu.memory_space<vmem>>, vector<128x128xbf16>,
    %c17_124 = arith.constant 17 : index
    %c0_125 = arith.constant 0 : index
    %148 = vector.load %arg17[%c17_124, %c0_125] : memref<160x128xf32, #tpu.memory_space<vmem>>, vector<128x128xf32>
    %149 = arith.truncf %148 : vector<128x128xf32> to vector<128x128xbf16>
    %c0_126 = arith.constant 0 : index
    %c640_127 = arith.constant 640 : index
    %150 = vector.load %arg18[%c0_126, %c640_127] : memref<128x1152xbf16, #tpu.memory_space<vmem>>, vector<128x128xbf16>
    tpu.vector_store %arg18[%c0_126, %c640_127], %149 {strides = array<i32>} : memref<128x1152xbf16, #tpu.memory_space<vmem>>, vector<128x128xbf16>,
    %c23_128 = arith.constant 23 : index
    %c0_129 = arith.constant 0 : index
    %151 = vector.load %arg17[%c23_128, %c0_129] : memref<160x128xf32, #tpu.memory_space<vmem>>, vector<128x128xf32>
    %152 = arith.truncf %151 : vector<128x128xf32> to vector<128x128xbf16>
    %c0_130 = arith.constant 0 : index
    %c768_131 = arith.constant 768 : index
    %153 = vector.load %arg18[%c0_130, %c768_131] : memref<128x1152xbf16, #tpu.memory_space<vmem>>, vector<128x128xbf16>
    tpu.vector_store %arg18[%c0_130, %c768_131], %152 {strides = array<i32>} : memref<128x1152xbf16, #tpu.memory_space<vmem>>, vector<128x128xbf16>,
    %c24_132 = arith.constant 24 : index
    %c0_133 = arith.constant 0 : index
    %154 = vector.load %arg17[%c24_132, %c0_133] : memref<160x128xf32, #tpu.memory_space<vmem>>, vector<128x128xf32>
    %155 = arith.truncf %154 : vector<128x128xf32> to vector<128x128xbf16>
    %c0_134 = arith.constant 0 : index
    %c896_135 = arith.constant 896 : index
    %156 = vector.load %arg18[%c0_134, %c896_135] : memref<128x1152xbf16, #tpu.memory_space<vmem>>, vector<128x128xbf16>
    tpu.vector_store %arg18[%c0_134, %c896_135], %155 {strides = array<i32>} : memref<128x1152xbf16, #tpu.memory_space<vmem>>, vector<128x128xbf16>,
    %c25_136 = arith.constant 25 : index
    %c0_137 = arith.constant 0 : index
    %157 = vector.load %arg17[%c25_136, %c0_137] : memref<160x128xf32, #tpu.memory_space<vmem>>, vector<128x128xf32>
    %158 = arith.truncf %157 : vector<128x128xf32> to vector<128x128xbf16>
    %c0_138 = arith.constant 0 : index
    %c1024_139 = arith.constant 1024 : index
    %159 = vector.load %arg18[%c0_138, %c1024_139] : memref<128x1152xbf16, #tpu.memory_space<vmem>>, vector<128x128xbf16>
    tpu.vector_store %arg18[%c0_138, %c1024_139], %158 {strides = array<i32>} : memref<128x1152xbf16, #tpu.memory_space<vmem>>, vector<128x128xbf16>,
    %c0_140 = arith.constant 0 : index
    %c0_141 = arith.constant 0 : index
    %160 = vector.load %arg18[%c0_140, %c0_141] : memref<128x1152xbf16, #tpu.memory_space<vmem>>, vector<128x1152xbf16>
    %c1_142 = arith.constant 1 : index
    %c0_143 = arith.constant 0 : index
    %c0_144 = arith.constant 0 : index
    %161 = vector.load %arg7[%c1_142, %c0_143, %c0_144] : memref<2x1152x128xbf16, #tpu.memory_space<vmem>>, vector<1x1152x128xbf16>
    %162 = vector.shape_cast %161 : vector<1x1152x128xbf16> to vector<1152x128xbf16>
    %cst_145 = arith.constant dense<0.000000e+00> : vector<128x128xf32>
    %163 = tpu.matmul %160, %162, %cst_145 {dimension_numbers = #tpu.dot_dimension_numbers<[1], [0], [0], [1], [0, 0, 1, 1], [], []>} : vector<128x1152xbf16>, vector<1152x128xbf16>, vector<128x128xf32> -> vector<128x128xf32>
    %c1_146 = arith.constant 1 : index
    %c0_147 = arith.constant 0 : index
    %c0_148 = arith.constant 0 : index
    %164 = vector.load %arg8[%c1_146, %c0_147, %c0_148] : memref<2x1x128xf32, #tpu.memory_space<vmem>>, vector<1x1x128xf32>
    %165 = vector.shape_cast %164 : vector<1x1x128xf32> to vector<1x128xf32>
    %166 = vector.broadcast %165 : vector<1x128xf32> to vector<128x128xf32>
    %167 = arith.addf %163, %166 : vector<128x128xf32>
    %cst_149 = arith.constant 0.000000e+00 : f32
    %cst_150 = arith.constant 6.000000e+00 : f32
    %168 = vector.broadcast %cst_149 : f32 to vector<128x128xf32>
    %169 = arith.maximumf %168, %167 : vector<128x128xf32>
    %170 = vector.broadcast %cst_150 : f32 to vector<128x128xf32>
    %171 = arith.minimumf %170, %169 : vector<128x128xf32>
    %c0_151 = arith.constant 0 : index
    %c0_152 = arith.constant 0 : index
    %172 = vector.load %arg15[%c0_151, %c0_152] : memref<128x128xf32, #tpu.memory_space<vmem>>, vector<128x128xf32>
    %173 = arith.mulf %171, %172 : vector<128x128xf32>
    %c1_153 = arith.constant 1 : index
    %c0_154 = arith.constant 0 : index
    %c0_155 = arith.constant 0 : index
    %174 = vector.load %arg9[%c1_153, %c0_154, %c0_155] : memref<2x1x128xf32, #tpu.memory_space<vmem>>, vector<1x1x128xf32>
    %175 = vector.shape_cast %174 : vector<1x1x128xf32> to vector<1x128xf32>
    %176 = vector.broadcast %175 : vector<1x128xf32> to vector<128x128xf32>
    %177 = arith.mulf %176, %173 : vector<128x128xf32>
    %178 = arith.addf %131, %177 : vector<128x128xf32>
    %179 = arith.truncf %178 : vector<128x128xf32> to vector<128x128xbf16>
    %c0_156 = arith.constant 0 : index
    %c0_157 = arith.constant 0 : index
    %180 = vector.load %arg10[%c0_156, %c0_157] : memref<128x128xbf16, #tpu.memory_space<vmem>>, vector<128x128xbf16>
    %cst_158 = arith.constant dense<0.000000e+00> : vector<128x128xf32>
    %181 = tpu.matmul %179, %180, %cst_158 {dimension_numbers = #tpu.dot_dimension_numbers<[1], [0], [0], [1], [0, 0, 1, 1], [], []>} : vector<128x128xbf16>, vector<128x128xbf16>, vector<128x128xf32> -> vector<128x128xf32>
    %c0_159 = arith.constant 0 : index
    %c0_160 = arith.constant 0 : index
    %182 = vector.load %arg11[%c0_159, %c0_160] : memref<1x128xf32, #tpu.memory_space<vmem>>, vector<1x128xf32>
    %183 = vector.broadcast %182 : vector<1x128xf32> to vector<128x128xf32>
    %184 = arith.addf %181, %183 : vector<128x128xf32>
    %cst_161 = arith.constant 0.000000e+00 : f32
    %cst_162 = arith.constant 6.000000e+00 : f32
    %185 = vector.broadcast %cst_161 : f32 to vector<128x128xf32>
    %186 = arith.maximumf %185, %184 : vector<128x128xf32>
    %187 = vector.broadcast %cst_162 : f32 to vector<128x128xf32>
    %188 = arith.minimumf %187, %186 : vector<128x128xf32>
    %c0_163 = arith.constant 0 : index
    %c0_164 = arith.constant 0 : index
    %189 = vector.load %arg12[%c0_163, %c0_164] : memref<8x128xbf16, #tpu.memory_space<vmem>>, vector<8x128xbf16>
    %190 = arith.truncf %188 : vector<128x128xf32> to vector<128x128xbf16>
    %cst_165 = arith.constant dense<0.000000e+00> : vector<8x128xf32>
    %191 = tpu.matmul %189, %190, %cst_165 {dimension_numbers = #tpu.dot_dimension_numbers<[1], [0], [0], [1], [0, 0, 1, 1], [], []>} : vector<8x128xbf16>, vector<128x128xbf16>, vector<8x128xf32> -> vector<8x128xf32>
    %192 = arith.truncf %191 : vector<8x128xf32> to vector<8x128xbf16>
    %c0_166 = arith.constant 0 : index
    %c0_167 = arith.constant 0 : index
    %193 = vector.load %arg13[%c0_166, %c0_167] : memref<128x128xbf16, #tpu.memory_space<vmem>>, vector<128x128xbf16>
    %cst_168 = arith.constant dense<0.000000e+00> : vector<8x128xf32>
    %194 = tpu.matmul %192, %193, %cst_168 {dimension_numbers = #tpu.dot_dimension_numbers<[1], [0], [0], [1], [0, 0, 1, 1], [], []>} : vector<8x128xbf16>, vector<128x128xbf16>, vector<8x128xf32> -> vector<8x128xf32>
    %c0_169 = arith.constant 0 : index
    %c0_170 = arith.constant 0 : index
    %195 = vector.load %arg14[%c0_169, %c0_170] : memref<1x128xf32, #tpu.memory_space<vmem>>, vector<1x128xf32>
    %196 = vector.broadcast %195 : vector<1x128xf32> to vector<8x128xf32>
    %197 = arith.addf %194, %196 : vector<8x128xf32>
    %c0_171 = arith.constant 0 : index
    %c0_172 = arith.constant 0 : index
    %198 = vector.load %arg16[%c0_171, %c0_172] : memref<8x128xf32, #tpu.memory_space<vmem>>, vector<8x128xf32>
    tpu.vector_store %arg16[%c0_171, %c0_172], %197 {strides = array<i32>} : memref<8x128xf32, #tpu.memory_space<vmem>>, vector<8x128xf32>,
    return
  }
}

</mosaic_0001>

<bundles_post_ra>
// kernel: network_forward.1
= control target key start
LH: loop header
LB: loop body
LE: loop exit
PB: predicated region body
PF: predicated region fallthrough
CT: control target
= control target key end

     0   :  { %v5876_v1 = vmov 0.0   ;;  %vm153_vm0 = vcmask 261120   ;;  %vm5877_vm1 = vmmov 0   ;;  %s7881_s1 = inlined_call_operand.vmem [shape: bf16[32,128], index: 1, kind: input, shape index: {}]   ;;  %s7882_s0 = inlined_call_operand.vmem [shape: bf16[128,32], index: 0, kind: input, shape index: {}]   ;;  %s7883_s5 = inlined_call_operand.vmem [shape: bf16[128,128], index: 5, kind: input, shape index: {}]   ;;  %s7884_s7 = inlined_call_operand.vmem [shape: bf16[2,1152,128], index: 7, kind: input, shape index: {}]   ;;  %s7885_s2 = inlined_call_operand.vmem [shape: f32[1,128], index: 2, kind: input, shape index: {}]   ;;  %s7886_s15 = inlined_call_operand.vmem [shape: f32[128,128], index: 15, kind: input, shape index: {}]   ;;  %s7887_s3 = inlined_call_operand.vmem [shape: f32[9,1,128], index: 3, kind: input, shape index: {}]   ;;  %s7888_s4 = inlined_call_operand.vmem [shape: f32[1,128], index: 4, kind: input, shape index: {}]   ;;  %s7889_s6 = inlined_call_operand.vmem [shape: f32[1,128], index: 6, kind: input, shape index: {}]   ;;  %s7890_s8 = inlined_call_operand.vmem [shape: f32[2,1,128], index: 8, kind: input, shape index: {}]   ;;  %s7891_s9 = inlined_call_operand.vmem [shape: f32[2,1,128], index: 9, kind: input, shape index: {}]   ;;  %s7892_s10 = inlined_call_operand.vmem [shape: bf16[128,128], index: 10, kind: input, shape index: {}]   ;;  %s7893_s13 = inlined_call_operand.vmem [shape: bf16[128,128], index: 13, kind: input, shape index: {}]   ;;  %s7894_s11 = inlined_call_operand.vmem [shape: f32[1,128], index: 11, kind: input, shape index: {}]   ;;  %s7895_s12 = inlined_call_operand.vmem [shape: bf16[8,128], index: 12, kind: input, shape index: {}]   ;;  %s7896_s14 = inlined_call_operand.vmem [shape: f32[1,128], index: 14, kind: input, shape index: {}]   ;;  %s7897_s16 = inlined_call_operand.vmem [shape: f32[8,128], index: 16, kind: output, shape index: {}]  }
   0x1   :  { %7899 = sst [smem:[#allocation4_spill]] %s7881_s1  ;;  %54 = vst [vmem:[#allocation2] sm:$0xff] %v5876_v1  ;;  %55 = vst [vmem:[#allocation2 + $0x8] sm:$0xff] %v5876_v1  ;;  %v5656_v3 = vld [vmem:[%s7882_s0] sm:$0xff]   ;;  %v5657_v4 = vld [vmem:[%s7882_s0 + $0x8] sm:$0xff]  }
   0x2   :  { %s7900_s23 = sld [smem:[#allocation4_spill]]  ;;  %72 = vst [vmem:[#allocation2 + $0x90] sm:$0xff] %v5876_v1  ;;  %73 = vst [vmem:[#allocation2 + $0x98] sm:$0xff] %v5876_v1  ;;  %5468 = vmatprep.mubr.msk.bf16.mxu0 %vm153_vm0, %v5656_v3  ;;  %v5658_v5 = vld [vmem:[%s7882_s0 + $0x10] sm:$0xff]   ;;  %v5659_v6 = vld [vmem:[%s7882_s0 + $0x18] sm:$0xff]  }
   0x3   :  { %v5660_v7 = vld [vmem:[%s7882_s0 + $0x20] sm:$0xff]   ;;  %v5661_v8 = vld [vmem:[%s7882_s0 + $0x28] sm:$0xff]   ;;  %v5662_v9 = vld [vmem:[%s7882_s0 + $0x30] sm:$0xff]  }
   0x4   :  { %v5663_v10 = vld [vmem:[%s7882_s0 + $0x38] sm:$0xff]   ;;  %v5664_v11 = vld [vmem:[%s7883_s5] sm:$0xff]   ;;  %v5665_v12 = vld [vmem:[%s7883_s5 + $0x8] sm:$0xff]  }
   0x5   :  { %5484 = vmatprep.subr.bf16.mxu1 %v5664_v11  ;;  %v5666_v13 = vld [vmem:[%s7883_s5 + $0x10] sm:$0xff]   ;;  %v5667_v14 = vld [vmem:[%s7883_s5 + $0x18] sm:$0xff]   ;;  %v5668_v15 = vld [vmem:[%s7883_s5 + $0x20] sm:$0xff]  }
   0x6   :  { %5485 = vmatpush3.bf16.msra.mxu1 %v5664_v11  ;;  %v5669_v16 = vld [vmem:[%s7883_s5 + $0x28] sm:$0xff]   ;;  %v5670_v17 = vld [vmem:[%s7883_s5 + $0x30] sm:$0xff]   ;;  %v5671_v18 = vld [vmem:[%s7883_s5 + $0x38] sm:$0xff]  }
   0x7   :  { %5486 = vmatprep.subr.bf16.mxu1 %v5665_v12  ;;  %v5672_v19 = vld [vmem:[%s7884_s7 + $0x40] sm:$0xff]   ;;  %v5676_v22 = vld [vmem:[%s7884_s7 + $0x48] sm:$0xff]   ;;  %v5680_v25 = vld [vmem:[%s7884_s7 + $0x50] sm:$0xff]  }
   0x8   :  { %v5654_v0 = vld [vmem:[%s7900_s23] sm:$0xff]   ;;  %v5655_v2 = vld [vmem:[%s7900_s23 + $0x8] sm:$0xff]   ;;  %v5681_v26 = vld [vmem:[%s7884_s7 + $0x10] sm:$0xff]  }
   0x9   :  { %5464 = vmatprep.subr.bf16.mxu0 %v5654_v0  ;;  %v5673_v20 = vld [vmem:[%s7884_s7] sm:$0xff]   ;;  %v5677_v23 = vld [vmem:[%s7884_s7 + $0x8] sm:$0xff]   ;;  %v5684_v30 = vld [vmem:[%s7884_s7 + $0x58] sm:$0xff]  }
   0xa   :  { %5465 = vmatpush3.bf16.msra.mxu0 %v5654_v0  ;;  %5487 = vmatpush3.bf16.msra.mxu1 %v5665_v12  ;;  %v5674_v21 = vld [vmem:[%s7884_s7 + $0xc0] sm:$0xff]   ;;  %v309_v31 = vld [vmem:[%s7886_s15 + $0x10] sm:$0xff]  ;;  %v5685_v35 = vld [vmem:[%s7884_s7 + $0x18] sm:$0xff]  }
   0xb   :  { %5466 = vmatprep.subr.bf16.mxu0 %v5655_v2  ;;  %5488 = vmatprep.subr.bf16.mxu1 %v5666_v13  ;;  %v6043_v24 = vld [vmem:[%s7885_s2] ss:$0 sm:$0xff]  ;;  %v310_v41 = vld [vmem:[%s7886_s15 + $0x18] sm:$0xff]  ;;  %v355_v43 = vld [vmem:[#allocation2 + $0x7] sm:$0xff] }
   0xc   :  { %v6062_v34 = vld [vmem:[%s7887_s3] ss:$0 sm:$0xff]  ;;  %v6078_v44 = vld [vmem:[%s7887_s3 + $0x1] ss:$0 sm:$0xff]  ;;  %v308_v51 = vld [vmem:[%s7886_s15 + $0x8] sm:$0xff] }
   0xd   :  { %v307_v37 = vld [vmem:[%s7886_s15] sm:$0xff]  ;;  %v378_v52 = vmul.f32 %v6062_v34, %v355_v43  ;;  %v434_v53 = vmul.f32 0.0, %v6078_v44  ;;  %v313_v63 = vld [vmem:[%s7886_s15 + $0x30] sm:$0xff] }
   0xe   :  { %5467 = vmatpush3.bf16.msra.mxu0 %v5655_v2  ;;  %5489 = vmatpush3.bf16.msra.mxu1 %v5666_v13  ;;  %v6088_v54 = vld [vmem:[%s7887_s3 + $0x4] ss:$0 sm:$0xff]  ;;  %v6093_v58 = vld [vmem:[%s7887_s3 + $0x7] ss:$0 sm:$0xff] }
   0xf   :  { %5490 = vmatprep.subr.bf16.mxu1 %v5667_v14  ;;  %4886 = vmatprep.subr.bf16.mxu0 %v5672_v19  ;;  %v311_v3 = vld [vmem:[%s7886_s15 + $0x20] sm:$0xff] }
  0x11   :  { %5469 = vmatmul.mubr.msk.bf16.vlgmr.msra.gmra.mrb[0].mxu0 %vm153_vm0, %v5657_v4 }
  0x12   :  { %5472 = vmatprep.mubr.msk.bf16.mxu0 %vm153_vm0, %v5658_v5  ;;  %5491 = vmatpush3.bf16.msra.mxu1 %v5667_v14 }
  0x13   :  { %5492 = vmatprep.subr.bf16.mxu1 %v5668_v15  ;;  %4887 = vmatpush3.bf16.msra.mxu0 %v5673_v20 }
  0x14   :  { %4888 = vmatprep.subr.bf16.mxu0 %v5676_v22  ;;  %v6137_v22 = vld [vmem:[%s7887_s3 + $0x8] ss:$0 sm:$0xff] }
  0x16   :  { %5493 = vmatpush3.bf16.msra.mxu1 %v5668_v15  ;;  %v6120_v15 = vld [vmem:[%s7887_s3 + $0x2] ss:$0 sm:$0xff] }
  0x17   :  { %5494 = vmatprep.subr.bf16.mxu1 %v5669_v16  ;;  %4889 = vmatpush3.bf16.msra.mxu0 %v5677_v23 }
  0x18   :  { %4890 = vmatprep.subr.bf16.mxu0 %v5680_v25 }
  0x19   :  { %5473 = vmatmul.mubr.msk.bf16.gmra.mrb[4].mxu0 %vm153_vm0, %v5659_v6 }
  0x1a   :  { %5476 = vmatprep.mubr.msk.bf16.mxu0 %vm153_vm0, %v5660_v7  ;;  %5495 = vmatpush3.bf16.msra.mxu1 %v5669_v16  ;;  %v6107_v7 = vadd.f32 %v434_v53, %v378_v52  ;;  %v315_v52 = vld [vmem:[%s7886_s15 + $0x40] sm:$0xff] }
  0x1b   :  { %5496 = vmatprep.subr.bf16.mxu1 %v5670_v17  ;;  %4891 = vmatpush3.bf16.msra.mxu0 %v5681_v26 }
  0x1c   :  { %4892 = vmatprep.subr.bf16.mxu0 %v5684_v30 }
  0x1e   :  { %5497 = vmatpush3.bf16.msra.mxu1 %v5670_v17 }
  0x1f   :  { %5498 = vmatprep.subr.bf16.mxu1 %v5671_v18  ;;  %4893 = vmatpush3.bf16.msra.mxu0 %v5685_v35 }
  0x21   :  { %5477 = vmatmul.mubr.msk.bf16.gmra.mrb[8].mxu0 %vm153_vm0, %v5661_v8 }
  0x22   :  { %5480 = vmatprep.mubr.msk.bf16.mxu0 %vm153_vm0, %v5662_v9  ;;  %5499 = vmatpush3.bf16.msra.mxu1 %v5671_v18  ;;  %v314_v9 = vld [vmem:[%s7886_s15 + $0x38] sm:$0xff] }
  0x23   :  { %4950 = vmatprep.subr.bf16.mxu1 %v5674_v21  ;;  %v6132_v21 = vld [vmem:[%s7887_s3 + $0x3] ss:$0 sm:$0xff] }
  0x29   :  { %5481 = vmatmul.mubr.msk.bf16.gmra.mrb[12].mxu0 %vm153_vm0, %v5663_v10 }
  0xe4   :  { %v5470_v27 = vpop.f32.mrb[0].mxu0 }
  0xe5   :  { %v221_v28 = vadd.f32 %v5470_v27, %v6043_v24  ;;  %v212_v29 = vpop.f32.mrb[1].mxu0  ;;  %v312_v27 = vld [vmem:[%s7886_s15 + $0x28] sm:$0xff] }
  0xe6   :  { %v213_v32 = vadd.f32 %v6043_v24, %v212_v29  ;;  %v5471_v33 = vpop.f32.mrb[2].mxu0 }
  0xe7   :  { %v277_v36 = vmax.f32 %v221_v28, 0.0  ;;  %v224_v38 = vadd.f32 %v5471_v33, %v6043_v24  ;;  %v215_v39 = vpop.f32.mrb[3].mxu0 }
  0xe8   :  { %v275_v40 = vmax.f32 %v213_v32, 0.0  ;;  %v216_v42 = vadd.f32 %v6043_v24, %v215_v39 }
  0xe9   :  { %v293_v45 = vmin.f32 %v277_v36, 6.0  ;;  %v278_v46 = vmax.f32 %v224_v38, 0.0 }
  0xea   :  { %v291_v47 = vmin.f32 %v275_v40, 6.0  ;;  %v276_v48 = vmax.f32 %v216_v42, 0.0 }
  0xeb   :  { %v325_v49 = vmul.f32 %v309_v31, %v293_v45  ;;  %v294_v50 = vmin.f32 %v278_v46, 6.0  ;;  %v317_v45 = vld [vmem:[%s7886_s15 + $0x50] sm:$0xff] }
  0xec   :  { %v323_v55 = vmul.f32 %v307_v37, %v291_v47  ;;  %v292_v56 = vmin.f32 %v276_v48, 6.0  ;;  %v5474_v57 = vpop.f32.mrb[4].mxu0 }
  0xed   :  { %341 = vst [vmem:[#allocation2 + $0x20] sm:$0xff] %v325_v49  ;;  %v326_v59 = vmul.f32 %v310_v41, %v294_v50  ;;  %v237_v60 = vadd.f32 %v5474_v57, %v6043_v24  ;;  %v228_v61 = vpop.f32.mrb[5].mxu0  ;;  %v6105_v6 = vmul.f32 %v6078_v44, %v325_v49  ;;  %v6115_v12 = vmul.f32 %v6088_v54, %v325_v49 }
  0xee   :  { %339 = vst [vmem:[#allocation2 + $0x10] sm:$0xff] %v323_v55  ;;  %v324_v62 = vmul.f32 %v308_v51, %v292_v56  ;;  %v229_v0 = vadd.f32 %v6043_v24, %v228_v61  ;;  %v5475_v1 = vpop.f32.mrb[6].mxu0  ;;  %v435_v11 = vmul.f32 %v6078_v44, %v323_v55  ;;  %v6123_v16 = vmul.f32 %v6088_v54, %v323_v55  ;;  %v6195_v61 = vld [vmem:[%s7887_s3 + $0x5] ss:$0 sm:$0xff] }
  0xef   :  { %342 = vst [vmem:[#allocation2 + $0x28] sm:$0xff] %v326_v59  ;;  %v281_v2 = vmax.f32 %v237_v60, 0.0  ;;  %v240_v4 = vadd.f32 %v5475_v1, %v6043_v24  ;;  %v231_v5 = vpop.f32.mrb[7].mxu0  ;;  %v6126_v17 = vmul.f32 %v6093_v58, %v325_v49  ;;  %v6140_v23 = vmul.f32 %v6078_v44, %v326_v59 }
  0xf0   :  { %340 = vst [vmem:[#allocation2 + $0x18] sm:$0xff] %v324_v62  ;;  %v279_v8 = vmax.f32 %v229_v0, 0.0  ;;  %v232_v10 = vadd.f32 %v6043_v24, %v231_v5  ;;  %v436_v20 = vmul.f32 %v6078_v44, %v324_v62  ;;  %v6148_v28 = vmul.f32 %v6088_v54, %v324_v62  ;;  %v318_v0 = vld [vmem:[%s7886_s15 + $0x58] sm:$0xff] }
  0xf1   :  { %v297_v13 = vmin.f32 %v281_v2, 6.0  ;;  %v282_v14 = vmax.f32 %v240_v4, 0.0  ;;  %v6151_v29 = vmul.f32 %v6093_v58, %v324_v62  ;;  %v6156_v33 = vmul.f32 %v6088_v54, %v326_v59 }
  0xf2   :  { %v295_v18 = vmin.f32 %v279_v8, 6.0  ;;  %v280_v19 = vmax.f32 %v232_v10, 0.0  ;;  %v6159_v35 = vmul.f32 %v6093_v58, %v326_v59 }
  0xf3   :  { %v6142_v25 = vmul.f32 %v313_v63, %v297_v13  ;;  %v298_v26 = vmin.f32 %v282_v14, 6.0  ;;  %v6213_v13 = vld [vmem:[%s7887_s3 + $0x6] ss:$0 sm:$0xff] }
  0xf4   :  { %v6153_v30 = vmul.f32 %v311_v3, %v295_v18  ;;  %v296_v31 = vmin.f32 %v280_v19, 6.0  ;;  %v5478_v32 = vpop.f32.mrb[8].mxu0 }
  0xf5   :  { %345 = vst [vmem:[#allocation2 + $0x40] sm:$0xff] %v6142_v25  ;;  %v6162_v36 = vmul.f32 %v314_v9, %v298_v26  ;;  %v253_v37 = vadd.f32 %v5478_v32, %v6043_v24  ;;  %v244_v38 = vpop.f32.mrb[9].mxu0  ;;  %v356_v39 = vld [vmem:[#allocation2 + $0xf] sm:$0xff]  ;;  %v6167_v41 = vmul.f32 %v6078_v44, %v6142_v25  ;;  %v6171_v42 = vmul.f32 %v6093_v58, %v6142_v25 }
  0xf6   :  { %v466_v40 = vld [vmem:[#allocation2 + $0x9] sm:$0xff]  ;;  %343 = vst [vmem:[#allocation2 + $0x30] sm:$0xff] %v6153_v30  ;;  %v6174_v43 = vmul.f32 %v312_v27, %v296_v31  ;;  %v245_v46 = vadd.f32 %v6043_v24, %v244_v38  ;;  %v5479_v47 = vpop.f32.mrb[10].mxu0  ;;  %v379_v48 = vmul.f32 %v6062_v34, %v356_v39  ;;  %v6181_v49 = vld [vmem:[#allocation2 + $0x21] sm:$0xff]  ;;  %v531_v60 = vmul.f32 %v6132_v21, %v356_v39 }
  0xf7   :  { %v490_v50 = vmul.f32 %v6120_v15, %v466_v40  ;;  %346 = vst [vmem:[#allocation2 + $0x48] sm:$0xff] %v6162_v36  ;;  %v285_v51 = vmax.f32 %v253_v37, 0.0  ;;  %v256_v53 = vadd.f32 %v5479_v47, %v6043_v24  ;;  %v247_v55 = vpop.f32.mrb[11].mxu0  ;;  %v357_v56 = vld [vmem:[#allocation2 + $0x17] sm:$0xff]  ;;  %v6189_v57 = vld [vmem:[#allocation2 + $0x1f] sm:$0xff]  ;;  %v6199_v62 = vmul.f32 %v6137_v22, %v6181_v49  ;;  %v316_v32 = vld [vmem:[%s7886_s15 + $0x48] sm:$0xff] }
  0xf8   :  { %v467_v59 = vld [vmem:[#allocation2 + $0x11] sm:$0xff]  ;;  %344 = vst [vmem:[#allocation2 + $0x38] sm:$0xff] %v6174_v43  ;;  %v283_v63 = vmax.f32 %v245_v46, 0.0  ;;  %v248_v1 = vadd.f32 %v6043_v24, %v247_v55  ;;  %v380_v2 = vmul.f32 %v6062_v34, %v357_v56  ;;  %v381_v3 = vmul.f32 %v6062_v34, %v6189_v57  ;;  %v468_v4 = vld [vmem:[#allocation2 + $0x19] sm:$0xff] }
  0xf9   :  { %v301_v5 = vmin.f32 %v285_v51, 6.0  ;;  %v286_v8 = vmax.f32 %v256_v53, 0.0  ;;  %v451_v9 = vadd.f32 %v435_v11, %v379_v48  ;;  %v491_v10 = vmul.f32 %v6120_v15, %v467_v59 }
  0xfa   :  { %v299_v14 = vmin.f32 %v283_v63, 6.0  ;;  %v284_v18 = vmax.f32 %v248_v1, 0.0  ;;  %v452_v19 = vadd.f32 %v436_v20, %v380_v2  ;;  %v453_v26 = vadd.f32 %v6105_v6, %v381_v3  ;;  %v321_v63 = vld [vmem:[%s7886_s15 + $0x70] sm:$0xff] }
  0xfb   :  { %v6216_v27 = vmul.f32 %v317_v45, %v301_v5  ;;  %v302_v31 = vmin.f32 %v286_v8, 6.0  ;;  %v506_v11 = vadd.f32 %v490_v50, %v6107_v7  ;;  %v507_v37 = vadd.f32 %v491_v10, %v451_v9  ;;  %v322_v5 = vld [vmem:[%s7886_s15 + $0x78] sm:$0xff] }
  0xfc   :  { %v6222_v38 = vmul.f32 %v315_v52, %v299_v14  ;;  %v300_v39 = vmin.f32 %v284_v18, 6.0  ;;  %v5482_v40 = vpop.f32.mrb[12].mxu0  ;;  %v532_v46 = vmul.f32 %v6132_v21, %v357_v56  ;;  %v613_v20 = vmul.f32 %v6195_v61, %v467_v59 }
  0xfd   :  { %349 = vst [vmem:[#allocation2 + $0x60] sm:$0xff] %v6216_v27  ;;  %v6227_v6 = vmul.f32 %v318_v0, %v302_v31  ;;  %v269_v45 = vadd.f32 %v5482_v40, %v6043_v24  ;;  %v260_v47 = vpop.f32.mrb[13].mxu0  ;;  %v547_v48 = vadd.f32 %v531_v60, %v506_v11  ;;  %v614_v51 = vmul.f32 %v6195_v61, %v468_v4  ;;  %v319_v60 = vld [vmem:[%s7886_s15 + $0x60] sm:$0xff] }
  0xfe   :  { %347 = vst [vmem:[#allocation2 + $0x50] sm:$0xff] %v6222_v38  ;;  %v6232_v7 = vmul.f32 %v316_v32, %v300_v39  ;;  %v261_v50 = vadd.f32 %v6043_v24, %v260_v47  ;;  %v5483_v52 = vpop.f32.mrb[14].mxu0  ;;  %v548_v53 = vadd.f32 %v532_v46, %v507_v37  ;;  %v654_v55 = vmul.f32 %v6213_v13, %v357_v56 }
  0xff   :  { %350 = vst [vmem:[#allocation2 + $0x68] sm:$0xff] %v6227_v6  ;;  %v289_v59 = vmax.f32 %v269_v45, 0.0  ;;  %v272_v0 = vadd.f32 %v5483_v52, %v6043_v24  ;;  %v263_v1 = vpop.f32.mrb[15].mxu0  ;;  %v588_v2 = vadd.f32 %v6123_v16, %v547_v48  ;;  %v655_v3 = vmul.f32 %v6213_v13, %v6189_v57  ;;  %v320_v16 = vld [vmem:[%s7886_s15 + $0x68] sm:$0xff] }
 0x100   :  { %348 = vst [vmem:[#allocation2 + $0x58] sm:$0xff] %v6232_v7  ;;  %v287_v56 = vmax.f32 %v261_v50, 0.0  ;;  %v264_v8 = vadd.f32 %v6043_v24, %v263_v1  ;;  %v589_v9 = vadd.f32 %v6148_v28, %v548_v53  ;;  %v736_v10 = vmul.f32 %v6137_v22, %v468_v4  ;;  %v359_v45 = vld [vmem:[#allocation2 + $0x27] sm:$0xff]  ;;  %v471_v1 = vld [vmem:[#allocation2 + $0x31] sm:$0xff] }
 0x101   :  { %v305_v14 = vmin.f32 %v289_v59, 6.0  ;;  %v290_v18 = vmax.f32 %v272_v0, 0.0  ;;  %v629_v31 = vadd.f32 %v613_v20, %v588_v2  ;;  %v439_v32 = vmul.f32 %v6078_v44, %v6153_v30  ;;  %v470_v52 = vld [vmem:[#allocation2 + $0x29] sm:$0xff] }
 0x102   :  { %v303_v11 = vmin.f32 %v287_v56, 6.0  ;;  %v288_v37 = vmax.f32 %v264_v8, 0.0  ;;  %v630_v39 = vadd.f32 %v614_v51, %v589_v9  ;;  %v492_v40 = vmul.f32 %v6120_v15, %v468_v4  ;;  %v360_v51 = vld [vmem:[#allocation2 + $0x2f] sm:$0xff] }
 0x103   :  { %v6260_v24 = vmul.f32 %v321_v63, %v305_v14  ;;  %v306_v28 = vmin.f32 %v290_v18, 6.0  ;;  %v670_v46 = vadd.f32 %v654_v55, %v629_v31  ;;  %v493_v47 = vmul.f32 %v6120_v15, %v6181_v49 }
 0x104   :  { %v6264_v48 = vmul.f32 %v319_v60, %v303_v11  ;;  %v304_v50 = vmin.f32 %v288_v37, 6.0  ;;  %v671_v20 = vadd.f32 %v655_v3, %v630_v39  ;;  %v508_v53 = vadd.f32 %v492_v40, %v452_v19  ;;  %v6279_v19 = vld [vmem:[%s7888_s4] ss:$0 sm:$0xff]  ;;  %v361_v40 = vld [vmem:[#allocation2 + $0x37] sm:$0xff] }
 0x105   :  { %353 = vst [vmem:[#allocation2 + $0x80] sm:$0xff] %v6260_v24  ;;  %v6267_v59 = vmul.f32 %v322_v5, %v306_v28  ;;  %v711_v4 = vadd.f32 %v6151_v29, %v670_v46  ;;  %v509_v63 = vadd.f32 %v493_v47, %v453_v26  ;;  %v533_v55 = vmul.f32 %v6132_v21, %v6189_v57 }
 0x106   :  { %351 = vst [vmem:[#allocation2 + $0x70] sm:$0xff] %v6264_v48  ;;  %v6273_v0 = vmul.f32 %v320_v16, %v304_v50  ;;  %v712_v60 = vadd.f32 %v6126_v17, %v671_v20  ;;  %v534_v2 = vmul.f32 %v6132_v21, %v359_v45  ;;  %v615_v29 = vmul.f32 %v6195_v61, %v6181_v49 }
 0x107   :  { %354 = vst [vmem:[#allocation2 + $0x88] sm:$0xff] %v6267_v59  ;;  %v752_v57 = vadd.f32 %v736_v10, %v711_v4  ;;  %v549_v26 = vadd.f32 %v533_v55, %v508_v53  ;;  %v616_v3 = vmul.f32 %v6195_v61, %v470_v52  ;;  %v656_v56 = vmul.f32 %v6213_v13, %v359_v45 }
 0x108   :  { %352 = vst [vmem:[#allocation2 + $0x78] sm:$0xff] %v6273_v0  ;;  %v753_v17 = vadd.f32 %v6199_v62, %v712_v60  ;;  %v550_v5 = vadd.f32 %v534_v2, %v509_v63  ;;  %v657_v8 = vmul.f32 %v6213_v13, %v360_v51  ;;  %v698_v9 = vmul.f32 %v6093_v58, %v6153_v30  ;;  %v472_v60 = vld [vmem:[#allocation2 + $0x39] sm:$0xff] }
 0x109   :  { %v775_v49 = vadd.f32 %v6279_v19, %v752_v57  ;;  %v590_v14 = vadd.f32 %v6115_v12, %v549_v26  ;;  %v738_v10 = vmul.f32 %v6137_v22, %v470_v52  ;;  %v739_v18 = vmul.f32 %v6137_v22, %v471_v1 }
 0x10a   :  { %v776_v16 = vadd.f32 %v6279_v19, %v753_v17  ;;  %v591_v31 = vadd.f32 %v6156_v33, %v550_v5  ;;  %v382_v62 = vmul.f32 %v6062_v34, %v359_v45  ;;  %v383_v11 = vmul.f32 %v6062_v34, %v360_v51  ;;  %v473_v17 = vld [vmem:[#allocation2 + $0x41] sm:$0xff] }
 0x10b   :  { %v791_v37 = vmax.f32 %v775_v49, 0.0  ;;  %v631_v39 = vadd.f32 %v615_v29, %v590_v14  ;;  %v440_v28 = vmul.f32 %v6078_v44, %v6174_v43  ;;  %v494_v12 = vmul.f32 %v6120_v15, %v470_v52  ;;  %v362_v52 = vld [vmem:[#allocation2 + $0x3f] sm:$0xff] }
 0x10c   :  { %v792_v46 = vmax.f32 %v776_v16, 0.0  ;;  %v632_v47 = vadd.f32 %v616_v3, %v591_v31  ;;  %v454_v50 = vadd.f32 %v6140_v23, %v382_v62  ;;  %v455_v20 = vadd.f32 %v439_v32, %v383_v11 }
 0x10d   :  { %v807_v53 = vmin.f32 %v791_v37, 6.0  ;;  %v672_v4 = vadd.f32 %v656_v56, %v631_v39  ;;  %v495_v33 = vmul.f32 %v6120_v15, %v471_v1  ;;  %v535_v45 = vmul.f32 %v6132_v21, %v360_v51 }
 0x10e   :  { %v808_v63 = vmin.f32 %v792_v46, 6.0  ;;  %v673_v55 = vadd.f32 %v657_v8, %v632_v47  ;;  %v510_v2 = vadd.f32 %v494_v12, %v454_v50  ;;  %v536_v29 = vmul.f32 %v6132_v21, %v361_v40  ;;  %v363_v50 = vld [vmem:[#allocation2 + $0x47] sm:$0xff] }
 0x10f   :  { %v713_v57 = vadd.f32 %v6159_v35, %v672_v4  ;;  %v511_v26 = vadd.f32 %v495_v33, %v455_v20  ;;  %v576_v23 = vmul.f32 %v6088_v54, %v6153_v30  ;;  %v577_v32 = vmul.f32 %v6088_v54, %v6174_v43 }
 0x110   :  { %v823_v3 = vpack.c.bf16 %v808_v63, %v807_v53  ;;  %v714_v56 = vadd.f32 %v698_v9, %v673_v55  ;;  %v551_v51 = vadd.f32 %v535_v45, %v510_v2  ;;  %v617_v5 = vmul.f32 %v6195_v61, %v471_v1  ;;  %v364_v2 = vld [vmem:[#allocation2 + $0x4f] sm:$0xff] }
 0x111   :  { %v754_v8 = vadd.f32 %v738_v10, %v713_v57  ;;  %v552_v49 = vadd.f32 %v536_v29, %v511_v26  ;;  %v618_v14 = vmul.f32 %v6195_v61, %v472_v60  ;;  %v658_v35 = vmul.f32 %v6213_v13, %v361_v40  ;;  %v5675_v57 = vld [vmem:[%s7884_s7 + $0x80] sm:$0xff]  }
 0x112   :  { %5500 = vmatprep.mubr.bf16.mxu1 %v823_v3  ;;  %v755_v16 = vadd.f32 %v739_v18, %v714_v56  ;;  %v592_v31 = vadd.f32 %v576_v23, %v551_v51  ;;  %v659_v30 = vmul.f32 %v6213_v13, %v362_v52  ;;  %v699_v62 = vmul.f32 %v6093_v58, %v6174_v43 }
 0x113   :  { %v777_v9 = vadd.f32 %v6279_v19, %v754_v8  ;;  %v593_v11 = vadd.f32 %v577_v32, %v552_v49  ;;  %v740_v37 = vmul.f32 %v6137_v22, %v472_v60  ;;  %v741_v1 = vmul.f32 %v6137_v22, %v473_v17  ;;  %v474_v32 = vld [vmem:[#allocation2 + $0x49] sm:$0xff] }
 0x114   :  { %v778_v10 = vadd.f32 %v6279_v19, %v755_v16  ;;  %v633_v39 = vadd.f32 %v617_v5, %v592_v31  ;;  %v384_v12 = vmul.f32 %v6062_v34, %v361_v40  ;;  %v385_v18 = vmul.f32 %v6062_v34, %v362_v52  ;;  %v475_v16 = vld [vmem:[#allocation2 + $0x51] sm:$0xff] }
 0x115   :  { %v793_v46 = vmax.f32 %v777_v9, 0.0  ;;  %v634_v47 = vadd.f32 %v618_v14, %v593_v11  ;;  %v442_v43 = vmul.f32 %v6078_v44, %v6162_v36  ;;  %v443_v20 = vmul.f32 %v6078_v44, %v6222_v38 }
 0x116   :  { %v794_v53 = vmax.f32 %v778_v10, 0.0  ;;  %v674_v4 = vadd.f32 %v658_v35, %v633_v39  ;;  %v456_v33 = vadd.f32 %v440_v28, %v384_v12  ;;  %v457_v45 = vadd.f32 %v6167_v41, %v385_v18  ;;  %v5678_v41 = vld [vmem:[%s7884_s7 + $0xc8] sm:$0xff]  }
 0x117   :  { %v809_v63 = vmin.f32 %v793_v46, 6.0  ;;  %v675_v55 = vadd.f32 %v659_v30, %v634_v47  ;;  %v496_v40 = vmul.f32 %v6120_v15, %v472_v60  ;;  %v497_v29 = vmul.f32 %v6120_v15, %v473_v17 }
 0x118   :  { %v810_v26 = vmin.f32 %v794_v53, 6.0  ;;  %v715_v23 = vadd.f32 %v699_v62, %v674_v4  ;;  %v537_v3 = vmul.f32 %v6132_v21, %v362_v52  ;;  %v538_v28 = vmul.f32 %v6132_v21, %v363_v50 }
 0x119   :  { %v716_v56 = vadd.f32 %v6171_v42, %v675_v55  ;;  %v512_v60 = vadd.f32 %v496_v40, %v456_v33  ;;  %v513_v51 = vadd.f32 %v497_v29, %v457_v45  ;;  %v578_v5 = vmul.f32 %v6088_v54, %v6142_v25  ;;  %v5679_v42 = vld [vmem:[%s7884_s7 + $0x88] sm:$0xff]  }
 0x11a   :  { %v824_v8 = vpack.c.bf16 %v810_v26, %v809_v63  ;;  %v756_v49 = vadd.f32 %v740_v37, %v715_v23  ;;  %v579_v14 = vmul.f32 %v6088_v54, %v6162_v36  ;;  %v619_v52 = vmul.f32 %v6195_v61, %v473_v17 }
 0x11b   :  { %v757_v35 = vadd.f32 %v741_v1, %v716_v56  ;;  %v553_v31 = vadd.f32 %v537_v3, %v512_v60  ;;  %v554_v30 = vadd.f32 %v538_v28, %v513_v51  ;;  %v620_v62 = vmul.f32 %v6195_v61, %v474_v32  ;;  %v365_v3 = vld [vmem:[#allocation2 + $0x57] sm:$0xff] }
 0x11c   :  { %5501 = vmatmul.mubr.bf16.vlgmr.msra.gmra.mrb[0].mxu1 %v824_v8  ;;  %v779_v25 = vadd.f32 %v6279_v19, %v756_v49  ;;  %v660_v9 = vmul.f32 %v6213_v13, %v363_v50  ;;  %v661_v11 = vmul.f32 %v6213_v13, %v364_v2  ;;  %v701_v17 = vmul.f32 %v6093_v58, %v6162_v36  ;;  %v5682_v36 = vld [vmem:[%s7884_s7 + $0xd0] sm:$0xff]   ;;  %v476_v56 = vld [vmem:[#allocation2 + $0x59] sm:$0xff] }
 0x11d   :  { %v780_v37 = vadd.f32 %v6279_v19, %v757_v35  ;;  %v594_v1 = vadd.f32 %v578_v5, %v553_v31  ;;  %v595_v10 = vadd.f32 %v579_v14, %v554_v30  ;;  %v702_v39 = vmul.f32 %v6093_v58, %v6222_v38  ;;  %4951 = vmatpush3.bf16.msra.mxu1 %v5675_v57 }
 0x11e   :  { %v795_v12 = vmax.f32 %v779_v25, 0.0  ;;  %v742_v18 = vmul.f32 %v6137_v22, %v474_v32  ;;  %v743_v46 = vmul.f32 %v6137_v22, %v475_v16  ;;  %v386_v47 = vmul.f32 %v6062_v34, %v363_v50  ;;  %4952 = vmatprep.subr.bf16.mxu1 %v5678_v41  ;;  %v5683_v50 = vld [vmem:[%s7884_s7 + $0x90] sm:$0xff]   ;;  %v5686_v41 = vld [vmem:[%s7884_s7 + $0xd8] sm:$0xff]  }
 0x11f   :  { %v796_v53 = vmax.f32 %v780_v37, 0.0  ;;  %v635_v4 = vadd.f32 %v619_v52, %v594_v1  ;;  %v636_v33 = vadd.f32 %v620_v62, %v595_v10  ;;  %v387_v45 = vmul.f32 %v6062_v34, %v364_v2  ;;  %v366_v52 = vld [vmem:[#allocation2 + $0x5f] sm:$0xff] }
 0x120   :  { %v811_v63 = vmin.f32 %v795_v12, 6.0  ;;  %v444_v55 = vmul.f32 %v6078_v44, %v6232_v7  ;;  %v445_v40 = vmul.f32 %v6078_v44, %v6216_v27  ;;  %v458_v29 = vadd.f32 %v442_v43, %v386_v47 }
 0x121   :  { %v812_v57 = vmin.f32 %v796_v53, 6.0  ;;  %v676_v26 = vadd.f32 %v660_v9, %v635_v4  ;;  %v677_v23 = vadd.f32 %v661_v11, %v636_v33  ;;  %v459_v28 = vadd.f32 %v443_v20, %v387_v45  ;;  %4953 = vmatpush3.bf16.msra.mxu1 %v5679_v42  ;;  %v477_v42 = vld [vmem:[#allocation2 + $0x61] sm:$0xff] }
 0x122   :  { %v498_v60 = vmul.f32 %v6120_v15, %v474_v32  ;;  %v499_v51 = vmul.f32 %v6120_v15, %v475_v16  ;;  %v539_v43 = vmul.f32 %v6132_v21, %v364_v2  ;;  %v540_v5 = vmul.f32 %v6132_v21, %v365_v3  ;;  %4954 = vmatprep.subr.bf16.mxu1 %v5682_v36 }
 0x123   :  { %v825_v8 = vpack.c.bf16 %v812_v57, %v811_v63  ;;  %v717_v49 = vadd.f32 %v701_v17, %v676_v26  ;;  %v718_v14 = vadd.f32 %v702_v39, %v677_v23  ;;  %v580_v20 = vmul.f32 %v6088_v54, %v6222_v38  ;;  %v367_v63 = vld [vmem:[#allocation2 + $0x67] sm:$0xff] }
 0x124   :  { %v514_v35 = vadd.f32 %v498_v60, %v458_v29  ;;  %v515_v31 = vadd.f32 %v499_v51, %v459_v28  ;;  %v581_v30 = vmul.f32 %v6088_v54, %v6232_v7  ;;  %v621_v32 = vmul.f32 %v6195_v61, %v475_v16  ;;  %v478_v57 = vld [vmem:[#allocation2 + $0x69] sm:$0xff] }
 0x125   :  { %5504 = vmatprep.mubr.bf16.mxu1 %v825_v8  ;;  %v758_v62 = vadd.f32 %v742_v18, %v717_v49  ;;  %v759_v2 = vadd.f32 %v743_v46, %v718_v14  ;;  %v622_v25 = vmul.f32 %v6195_v61, %v476_v56  ;;  %v662_v9 = vmul.f32 %v6213_v13, %v365_v3  ;;  %v368_v28 = vld [vmem:[#allocation2 + $0x6f] sm:$0xff] }
 0x126   :  { %v555_v11 = vadd.f32 %v539_v43, %v514_v35  ;;  %v556_v17 = vadd.f32 %v540_v5, %v515_v31  ;;  %v663_v37 = vmul.f32 %v6213_v13, %v366_v52  ;;  %v703_v38 = vmul.f32 %v6093_v58, %v6232_v7  ;;  %4955 = vmatpush3.bf16.msra.mxu1 %v5683_v50 }
 0x127   :  { %v781_v1 = vadd.f32 %v6279_v19, %v758_v62  ;;  %v782_v16 = vadd.f32 %v6279_v19, %v759_v2  ;;  %v704_v10 = vmul.f32 %v6093_v58, %v6216_v27  ;;  %v744_v39 = vmul.f32 %v6137_v22, %v476_v56  ;;  %4956 = vmatprep.subr.bf16.mxu1 %v5686_v41 }
 0x128   :  { %v596_v12 = vadd.f32 %v580_v20, %v555_v11  ;;  %v597_v18 = vadd.f32 %v581_v30, %v556_v17  ;;  %v745_v46 = vmul.f32 %v6137_v22, %v477_v42  ;;  %v388_v47 = vmul.f32 %v6062_v34, %v365_v3 }
 0x129   :  { %v797_v36 = vmax.f32 %v781_v1, 0.0  ;;  %v798_v53 = vmax.f32 %v782_v16, 0.0  ;;  %v389_v7 = vmul.f32 %v6062_v34, %v366_v52  ;;  %v446_v4 = vmul.f32 %v6078_v44, %v6227_v6  ;;  %v5832_v16 = vld [vmem:[%s7887_s3] ss:$0 sm:$0xff] }
 0x12a   :  { %v637_v33 = vadd.f32 %v621_v32, %v596_v12  ;;  %v638_v45 = vadd.f32 %v622_v25, %v597_v18  ;;  %v447_v29 = vmul.f32 %v6078_v44, %v6264_v48  ;;  %v460_v50 = vadd.f32 %v444_v55, %v388_v47  ;;  %v369_v47 = vld [vmem:[#allocation2 + $0x77] sm:$0xff] }
 0x12b   :  { %v813_v26 = vmin.f32 %v797_v36, 6.0  ;;  %v814_v23 = vmin.f32 %v798_v53, 6.0  ;;  %v461_v41 = vadd.f32 %v445_v40, %v389_v7  ;;  %v500_v3 = vmul.f32 %v6120_v15, %v476_v56  ;;  %v479_v56 = vld [vmem:[#allocation2 + $0x71] sm:$0xff] }
 0x12c   :  { %v678_v60 = vadd.f32 %v662_v9, %v637_v33  ;;  %v679_v51 = vadd.f32 %v663_v37, %v638_v45  ;;  %v501_v34 = vmul.f32 %v6120_v15, %v477_v42  ;;  %v541_v43 = vmul.f32 %v6132_v21, %v366_v52 }
 0x12d   :  { %v826_v5 = vpack.c.bf16 %v814_v23, %v813_v26  ;;  %v516_v8 = vadd.f32 %v500_v3, %v460_v50  ;;  %v542_v49 = vmul.f32 %v6132_v21, %v367_v63  ;;  %v582_v44 = vmul.f32 %v6088_v54, %v6216_v27 }
 0x12e   :  { %v719_v55 = vadd.f32 %v703_v38, %v678_v60  ;;  %v720_v14 = vadd.f32 %v704_v10, %v679_v51  ;;  %v517_v20 = vadd.f32 %v501_v34, %v461_v41  ;;  %v583_v40 = vmul.f32 %v6088_v54, %v6227_v6  ;;  %v480_v41 = vld [vmem:[#allocation2 + $0x79] sm:$0xff] }
 0x12f   :  { %5505 = vmatmul.mubr.bf16.gmra.mrb[4].mxu1 %v826_v5  ;;  %v557_v35 = vadd.f32 %v541_v43, %v516_v8  ;;  %v623_v31 = vmul.f32 %v6195_v61, %v477_v42  ;;  %v624_v52 = vmul.f32 %v6195_v61, %v478_v57  ;;  %v664_v30 = vmul.f32 %v6213_v13, %v367_v63  ;;  %v370_v5 = vld [vmem:[#allocation2 + $0x7f] sm:$0xff] }
 0x130   :  { %v760_v32 = vadd.f32 %v744_v39, %v719_v55  ;;  %v761_v62 = vadd.f32 %v745_v46, %v720_v14  ;;  %v558_v2 = vadd.f32 %v542_v49, %v517_v20  ;;  %v665_v27 = vmul.f32 %v6213_v13, %v368_v28  ;;  %v481_v55 = vld [vmem:[#allocation2 + $0x81] sm:$0xff] }
 0x131   :  { %v598_v25 = vadd.f32 %v582_v44, %v557_v35  ;;  %v705_v9 = vmul.f32 %v6093_v58, %v6227_v6  ;;  %v706_v54 = vmul.f32 %v6093_v58, %v6264_v48  ;;  %v746_v11 = vmul.f32 %v6137_v22, %v478_v57  ;;  %v5833_v58 = vld [vmem:[%s7887_s3 + $0x1] ss:$0 sm:$0xff] }
 0x132   :  { %v783_v42 = vadd.f32 %v6279_v19, %v760_v32  ;;  %v784_v17 = vadd.f32 %v6279_v19, %v761_v62  ;;  %v599_v37 = vadd.f32 %v583_v40, %v558_v2  ;;  %v747_v38 = vmul.f32 %v6137_v22, %v479_v56 }
 0x133   :  { %v639_v1 = vadd.f32 %v623_v31, %v598_v25  ;;  %v390_v10 = vmul.f32 %v5832_v16, %v367_v63  ;;  %v391_v39 = vmul.f32 %v5832_v16, %v368_v28  ;;  %v448_v6 = vmul.f32 %v5833_v58, %v6273_v0 }
 0x134   :  { %v799_v12 = vmax.f32 %v783_v42, 0.0  ;;  %v800_v18 = vmax.f32 %v784_v17, 0.0  ;;  %v640_v46 = vadd.f32 %v624_v52, %v599_v37  ;;  %v449_v36 = vmul.f32 %v5833_v58, %v6260_v24  ;;  %v522_v17 = vld [vmem:[#allocation2 + $0x87] sm:$0xff] }
 0x135   :  { %v680_v22 = vadd.f32 %v664_v30, %v639_v1  ;;  %v462_v53 = vadd.f32 %v446_v4, %v390_v10  ;;  %v463_v7 = vadd.f32 %v447_v29, %v391_v39  ;;  %v502_v33 = vmul.f32 %v6120_v15, %v478_v57  ;;  %v5834_v4 = vld [vmem:[%s7887_s3 + $0x4] ss:$0 sm:$0xff] }
 0x136   :  { %v815_v45 = vmin.f32 %v799_v12, 6.0  ;;  %v816_v63 = vmin.f32 %v800_v18, 6.0  ;;  %v681_v50 = vadd.f32 %v665_v27, %v640_v46  ;;  %v503_v26 = vmul.f32 %v6120_v15, %v479_v56  ;;  %v5838_v18 = vld [vmem:[%s7887_s3 + $0x3] ss:$0 sm:$0xff] }
 0x137   :  { %v721_v23 = vadd.f32 %v705_v9, %v680_v22  ;;  %v518_v3 = vadd.f32 %v502_v33, %v462_v53  ;;  %v543_v60 = vmul.f32 %v6132_v21, %v368_v28  ;;  %v544_v51 = vmul.f32 %v6132_v21, %v369_v47  ;;  %v645_v33 = vld [vmem:[#allocation2 + $0x8f] sm:$0xff] }
 0x138   :  { %v827_v34 = vpack.c.bf16 %v816_v63, %v815_v45  ;;  %v722_v43 = vadd.f32 %v706_v54, %v681_v50  ;;  %v519_v8 = vadd.f32 %v503_v26, %v463_v7  ;;  %v584_v29 = vmul.f32 %v5834_v4, %v6264_v48  ;;  %v5835_v48 = vld [vmem:[%s7887_s3 + $0x7] ss:$0 sm:$0xff] }
 0x139   :  { %v762_v57 = vadd.f32 %v746_v11, %v721_v23  ;;  %v559_v49 = vadd.f32 %v543_v60, %v518_v3  ;;  %v585_v15 = vmul.f32 %v5834_v4, %v6273_v0  ;;  %v625_v44 = vmul.f32 %v6195_v61, %v479_v56 }
 0x13a   :  { %5508 = vmatprep.mubr.bf16.mxu1 %v827_v34  ;;  %v763_v28 = vadd.f32 %v747_v38, %v722_v43  ;;  %v560_v21 = vadd.f32 %v544_v51, %v519_v8  ;;  %v626_v14 = vmul.f32 %v6195_v61, %v480_v41  ;;  %v666_v20 = vmul.f32 %v6213_v13, %v369_v47  ;;  %v5836_v61 = vld [vmem:[%s7887_s3 + $0x8] ss:$0 sm:$0xff]  ;;  %v5840_v43 = vld [vmem:[%s7887_s3 + $0x6] ss:$0 sm:$0xff] }
 0x13b   :  { %v785_v40 = vadd.f32 %v6279_v19, %v762_v57  ;;  %v600_v35 = vadd.f32 %v584_v29, %v559_v49  ;;  %v667_v31 = vmul.f32 %v6213_v13, %v370_v5  ;;  %v707_v52 = vmul.f32 %v5835_v48, %v6273_v0  ;;  %v5837_v0 = vld [vmem:[%s7887_s3 + $0x2] ss:$0 sm:$0xff] }
 0x13c   :  { %v786_v56 = vadd.f32 %v6279_v19, %v763_v28  ;;  %v601_v30 = vadd.f32 %v585_v15, %v560_v21  ;;  %v708_v32 = vmul.f32 %v5835_v48, %v6260_v24  ;;  %v748_v62 = vmul.f32 %v5836_v61, %v480_v41  ;;  %v727_v15 = vld [vmem:[#allocation2 + $0x91] sm:$0xff] }
 0x13d   :  { %v801_v2 = vmax.f32 %v785_v40, 0.0  ;;  %v641_v27 = vadd.f32 %v625_v44, %v600_v35  ;;  %v749_v25 = vmul.f32 %v5836_v61, %v481_v55  ;;  %v392_v13 = vmul.f32 %v5832_v16, %v369_v47  ;;  %v604_v47 = vld [vmem:[#allocation2 + $0x89] sm:$0xff] }
 0x13e   :  { %v802_v9 = vmax.f32 %v786_v56, 0.0  ;;  %v642_v54 = vadd.f32 %v626_v14, %v601_v30  ;;  %v393_v11 = vmul.f32 %v5832_v16, %v370_v5  ;;  %v504_v42 = vmul.f32 %v5837_v0, %v480_v41 }
 0x13f   :  { %v817_v37 = vmin.f32 %v801_v2, 6.0  ;;  %v682_v38 = vadd.f32 %v666_v20, %v641_v27  ;;  %v464_v1 = vadd.f32 %v448_v6, %v392_v13  ;;  %v505_v10 = vmul.f32 %v5837_v0, %v481_v55 }
 0x140   :  { %v818_v39 = vmin.f32 %v802_v9, 6.0  ;;  %v683_v58 = vadd.f32 %v667_v31, %v642_v54  ;;  %v465_v12 = vadd.f32 %v449_v36, %v393_v11  ;;  %v545_v46 = vmul.f32 %v5838_v18, %v370_v5  ;;  %v5839_v36 = vld [vmem:[%s7887_s3 + $0x5] ss:$0 sm:$0xff] }
 0x141   :  { %v723_v16 = vadd.f32 %v707_v52, %v682_v38  ;;  %v520_v22 = vadd.f32 %v504_v42, %v464_v1  ;;  %v546_v53 = vmul.f32 %v5838_v18, %v522_v17  ;;  %v586_v7 = vmul.f32 %v5834_v4, %v6260_v24  ;;  %v5689_v42 = vld [vmem:[%s7884_s7 + $0x20] sm:$0xff]   ;;  %v5693_v38 = vld [vmem:[%s7884_s7 + $0x28] sm:$0xff]   ;;  %v5699_v18 = vld [vmem:[%s7884_s7 + $0xb0] sm:$0xff]  }
 0x142   :  { %v828_v45 = vpack.c.bf16 %v818_v39, %v817_v37  ;;  %v724_v63 = vadd.f32 %v708_v32, %v683_v58  ;;  %v521_v50 = vadd.f32 %v505_v10, %v465_v12  ;;  %v587_v6 = vmul.f32 %v5834_v4, %v6267_v59  ;;  %v5692_v37 = vld [vmem:[%s7884_s7 + $0x68] sm:$0xff]   ;;  %v5696_v39 = vld [vmem:[%s7884_s7 + $0x70] sm:$0xff]  }
 0x143   :  { %v764_v26 = vadd.f32 %v748_v62, %v723_v16  ;;  %v561_v23 = vadd.f32 %v545_v46, %v520_v22  ;;  %v627_v41 = vmul.f32 %v5839_v36, %v481_v55  ;;  %v628_v51 = vmul.f32 %v5839_v36, %v604_v47  ;;  %v6467_v55 = vld [vmem:[#allocation2] sm:$0xff]  ;;  %v5694_v1 = vld [vmem:[%s7884_s7 + $0xe8] sm:$0xff]   ;;  %v5697_v58 = vld [vmem:[%s7884_s7 + $0x30] sm:$0xff]  }
 0x144   :  { %5509 = vmatmul.mubr.bf16.gmra.mrb[8].mxu1 %v828_v45  ;;  %v765_v3 = vadd.f32 %v749_v25, %v724_v63  ;;  %v562_v60 = vadd.f32 %v546_v53, %v521_v50  ;;  %v668_v5 = vmul.f32 %v5840_v43, %v522_v17  ;;  %v669_v29 = vmul.f32 %v5840_v43, %v645_v33  ;;  %v5691_v17 = vld [vmem:[%s7884_s7 + $0xa0] sm:$0xff]   ;;  %v5695_v10 = vld [vmem:[%s7884_s7 + $0xa8] sm:$0xff]   ;;  %v5698_v12 = vld [vmem:[%s7884_s7 + $0xf0] sm:$0xff]  }
 0x145   :  { %v787_v34 = vadd.f32 %v6279_v19, %v764_v26  ;;  %v602_v24 = vadd.f32 %v586_v7, %v561_v23  ;;  %v710_v21 = vmul.f32 %v6467_v55, %v5835_v48  ;;  %v709_v20 = vmul.f32 %v5835_v48, %v6267_v59  ;;  %v5687_v48 = vld [vmem:[%s7884_s7 + $0x98] sm:$0xff]   ;;  %v5704_v53 = vld [vmem:[%s7884_s7 + $0x140] sm:$0xff]   ;;  %v1001_v63 = vld [vmem:[%s7886_s15 + $0x10] sm:$0xff] }
 0x146   :  { %v788_v8 = vadd.f32 %v6279_v19, %v765_v3  ;;  %v603_v4 = vadd.f32 %v587_v6, %v562_v60  ;;  %v750_v40 = vmul.f32 %v5836_v61, %v604_v47  ;;  %v751_v56 = vmul.f32 %v5836_v61, %v727_v15  ;;  %v5688_v61 = vld [vmem:[%s7884_s7 + $0x60] sm:$0xff]   ;;  %4957 = vmatpush3.bf16.msra.mxu1 %v5687_v48  ;;  %v5700_v46 = vld [vmem:[%s7884_s7 + $0x78] sm:$0xff]  }
 0x147   :  { %v803_v57 = vmax.f32 %v787_v34, 0.0  ;;  %v643_v49 = vadd.f32 %v627_v41, %v602_v24  ;;  %4894 = vmatprep.subr.bf16.mxu0 %v5688_v61  ;;  %v5701_v47 = vld [vmem:[%s7884_s7 + $0x38] sm:$0xff]   ;;  %v5714_v7 = vld [vmem:[%s7884_s7 + $0x1c0] sm:$0xff]   ;;  %v1000_v34 = vld [vmem:[%s7886_s15 + $0x8] sm:$0xff] }
 0x148   :  { %v804_v44 = vmax.f32 %v788_v8, 0.0  ;;  %v644_v28 = vadd.f32 %v628_v51, %v603_v4  ;;  %4895 = vmatpush3.bf16.msra.mxu0 %v5689_v42  ;;  %v5702_v16 = vld [vmem:[%s7884_s7 + $0xf8] sm:$0xff]   ;;  %v6533_v33 = vld [vmem:[%s7889_s6] ss:$0 sm:$0xff]  ;;  %v1004_v61 = vld [vmem:[%s7886_s15 + $0x28] sm:$0xff] }
 0x149   :  { %v684_v14 = vadd.f32 %v668_v5, %v643_v49  ;;  %v819_v35 = vmin.f32 %v803_v57, 6.0  ;;  %4896 = vmatprep.subr.bf16.mxu0 %v5692_v37  ;;  %v5703_v22 = vld [vmem:[%s7884_s7 + $0xb8] sm:$0xff]   ;;  %v999_v26 = vld [vmem:[%s7886_s15] sm:$0xff]  ;;  %v5709_v42 = vld [vmem:[%s7884_s7 + $0x110] sm:$0xff]  }
 0x14a   :  { %v820_v31 = vmin.f32 %v804_v44, 6.0  ;;  %v685_v52 = vadd.f32 %v669_v29, %v644_v28  ;;  %v1002_v41 = vld [vmem:[%s7886_s15 + $0x18] sm:$0xff]  ;;  %v1047_v29 = vld [vmem:[#allocation2 + $0x7] sm:$0xff] }
 0x14b   :  { %v725_v30 = vadd.f32 %v709_v20, %v684_v14  ;;  %v5705_v49 = vld [vmem:[%s7884_s7 + $0x100] sm:$0xff]  }
 0x14c   :  { %v829_v32 = vpack.c.bf16 %v820_v31, %v819_v35  ;;  %v726_v62 = vadd.f32 %v710_v21, %v685_v52  ;;  %4897 = vmatpush3.bf16.msra.mxu0 %v5693_v38  ;;  %v5706_v21 = vld [vmem:[%s7884_s7 + $0x148] sm:$0xff]  }
 0x14d   :  { %v766_v2 = vadd.f32 %v750_v40, %v725_v30  ;;  %4898 = vmatprep.subr.bf16.mxu0 %v5696_v39  ;;  %v5707_v30 = vld [vmem:[%s7884_s7 + $0x108] sm:$0xff]  }
 0x14e   :  { %5512 = vmatprep.mubr.bf16.mxu1 %v829_v32  ;;  %v767_v27 = vadd.f32 %v751_v56, %v726_v62  ;;  %v5715_v56 = vld [vmem:[%s7884_s7 + $0x180] sm:$0xff]   ;;  %v5716_v32 = vld [vmem:[%s7884_s7 + $0x1c8] sm:$0xff]  }
 0x14f   :  { %v789_v25 = vadd.f32 %v6279_v19, %v766_v2  ;;  %v5708_v2 = vld [vmem:[%s7884_s7 + $0x150] sm:$0xff]  }
 0x150   :  { %v790_v13 = vadd.f32 %v6279_v19, %v767_v27  ;;  %v5690_v19 = vld [vmem:[%s7884_s7 + $0xe0] sm:$0xff]   ;;  %4899 = vmatpush3.bf16.msra.mxu0 %v5697_v58  ;;  %v5710_v58 = vld [vmem:[%s7884_s7 + $0x158] sm:$0xff]  }
 0x151   :  { %v805_v9 = vmax.f32 %v789_v25, 0.0  ;;  %4958 = vmatprep.subr.bf16.mxu1 %v5690_v19  ;;  %4900 = vmatprep.subr.bf16.mxu0 %v5700_v46  ;;  %v1005_v25 = vld [vmem:[%s7886_s15 + $0x30] sm:$0xff] }
 0x152   :  { %v806_v54 = vmax.f32 %v790_v13, 0.0  ;;  %4959 = vmatpush3.bf16.msra.mxu1 %v5691_v17  ;;  %v5720_v19 = vld [vmem:[%s7884_s7 + $0x1d0] sm:$0xff]  }
 0x153   :  { %v821_v11 = vmin.f32 %v805_v9, 6.0  ;;  %4960 = vmatprep.subr.bf16.mxu1 %v5694_v1 }
 0x154   :  { %v822_v0 = vmin.f32 %v806_v54, 6.0  ;;  %4901 = vmatpush3.bf16.msra.mxu0 %v5701_v47  ;;  %v1003_v54 = vld [vmem:[%s7886_s15 + $0x20] sm:$0xff]  ;;  %v5721_v47 = vld [vmem:[%s7884_s7 + $0x190] sm:$0xff]  }
 0x155   :  { %5014 = vmatprep.subr.bf16.mxu0 %v5704_v53 }
 0x156   :  { %v830_v59 = vpack.c.bf16 %v822_v0, %v821_v11  ;;  %4961 = vmatpush3.bf16.msra.mxu1 %v5695_v10  ;;  %v1006_v11 = vld [vmem:[%s7886_s15 + $0x38] sm:$0xff]  ;;  %v5717_v0 = vld [vmem:[%s7884_s7 + $0x188] sm:$0xff]  }
 0x157   :  { %4962 = vmatprep.subr.bf16.mxu1 %v5698_v12 }
 0x158   :  { %5513 = vmatmul.mubr.bf16.gmra.mrb[12].mxu1 %v830_v59 }
 0x15a   :  { %4963 = vmatpush3.bf16.msra.mxu1 %v5699_v18 }
 0x15b   :  { %4964 = vmatprep.subr.bf16.mxu1 %v5702_v16 }
 0x15e   :  { %4965 = vmatpush3.bf16.msra.mxu1 %v5703_v22 }
 0x15f   :  { %5078 = vmatprep.subr.bf16.mxu1 %v5714_v7  ;;  %v5711_v7 = vld [vmem:[%s7884_s7 + $0x118] sm:$0xff]  }
 0x1ef   :  { %v5502_v45 = vpop.f32.mrb[0].mxu1 }
 0x1f0   :  { %v945_v50 = vadd.f32 %v5502_v45, %v6533_v33  ;;  %v936_v6 = vpop.f32.mrb[1].mxu1  ;;  %v5722_v45 = vld [vmem:[%s7884_s7 + $0x1d8] sm:$0xff]  }
 0x1f1   :  { %v937_v23 = vadd.f32 %v6533_v33, %v936_v6  ;;  %v5503_v36 = vpop.f32.mrb[2].mxu1  ;;  %v5713_v6 = vld [vmem:[%s7884_s7 + $0x120] sm:$0xff]  }
 0x1f2   :  { %v6546_v3 = vmul.f32 %v1001_v63, %v945_v50  ;;  %v948_v60 = vadd.f32 %v5503_v36, %v6533_v33  ;;  %v939_v51 = vpop.f32.mrb[3].mxu1  ;;  %v5712_v63 = vld [vmem:[%s7884_s7 + $0x160] sm:$0xff]   ;;  %v5723_v50 = vld [vmem:[%s7884_s7 + $0x198] sm:$0xff]  }
 0x1f3   :  { %v6552_v24 = vmul.f32 %v999_v26, %v937_v23  ;;  %v940_v43 = vadd.f32 %v6533_v33, %v939_v51  ;;  %v5726_v26 = vld [vmem:[%s7884_s7 + $0x1e0] sm:$0xff]   ;;  %v5718_v23 = vld [vmem:[%s7884_s7 + $0x168] sm:$0xff]  }
 0x1f4   :  { %1033 = vst [vmem:[#allocation2 + $0x20] sm:$0xff] %v6546_v3  ;;  %v6556_v5 = vmul.f32 %v1002_v41, %v948_v60  ;;  %v5727_v41 = vld [vmem:[%s7884_s7 + $0x1a0] sm:$0xff]  }
 0x1f5   :  { %1031 = vst [vmem:[#allocation2 + $0x10] sm:$0xff] %v6552_v24  ;;  %v6559_v8 = vmul.f32 %v1000_v34, %v940_v43  ;;  %v1095_v4 = vpack.c.bf16 %v6552_v24, %v6467_v55  ;;  %v5719_v34 = vld [vmem:[%s7884_s7 + $0x128] sm:$0xff]   ;;  %v5724_v43 = vld [vmem:[%s7884_s7 + $0x170] sm:$0xff]  }
 0x1f6   :  { %1034 = vst [vmem:[#allocation2 + $0x28] sm:$0xff] %v6556_v5 }
 0x1f7   :  { %1032 = vst [vmem:[#allocation2 + $0x18] sm:$0xff] %v6559_v8  ;;  %2022 = vmatprep.mubr.bf16.mxu0 %v1095_v4  ;;  %v6575_v14 = vpack.c.bf16 %v6546_v3, %v6559_v8 }
 0x1fc   :  { %v1048_v57 = vld [vmem:[#allocation2 + $0xf] sm:$0xff] }
 0x1fd   :  { %v1063_v15 = vpack.c.bf16 %v1048_v57, %v1047_v29  ;;  %v1111_v44 = vld [vmem:[#allocation2 + $0x9] sm:$0xff]  ;;  %v6624_v39 = vld [vmem:[#allocation2 + $0x21] sm:$0xff] }
 0x1fe   :  { %v6568_v28 = vld [vmem:[#allocation2 + $0x27] sm:$0xff]  ;;  %v1144_v20 = vld [vmem:[#allocation2 + $0x17] sm:$0xff]  ;;  %v1145_v35 = vld [vmem:[#allocation2 + $0x1f] sm:$0xff] }
 0x1ff   :  { %v6577_v40 = vld [vmem:[#allocation2 + $0x11] sm:$0xff]  ;;  %2023 = vmatmul.mubr.bf16.vlgmr.msra.gmra.mrb[16].mxu0 %v1063_v15  ;;  %v1159_v31 = vpack.c.bf16 %v1144_v20, %v1048_v57  ;;  %v1160_v62 = vpack.c.bf16 %v6568_v28, %v1145_v35  ;;  %v6620_v1 = vpack.c.bf16 %v1145_v35, %v1144_v20  ;;  %v6622_v10 = vld [vmem:[#allocation2 + $0x19] sm:$0xff]  ;;  %v5729_v20 = vld [vmem:[%s7884_s7 + $0x1a8] sm:$0xff]  }
 0x200   :  { %v1127_v52 = vpack.c.bf16 %v6577_v40, %v1111_v44  ;;  %2030 = vmatprep.mubr.bf16.mxu0 %v6575_v14  ;;  %5015 = vmatpush3.bf16.msra.mxu0 %v5705_v49  ;;  %v6648_v53 = vpack.c.bf16 %v6624_v39, %v6622_v10 }
 0x201   :  { %2119 = vmatprep.mubr.bf16.mxu1 %v1159_v31  ;;  %5016 = vmatprep.subr.bf16.mxu0 %v5706_v21  ;;  %v5725_v31 = vld [vmem:[%s7884_s7 + $0x130] sm:$0xff]  }
 0x202   :  { %v5506_v27 = vpop.f32.mrb[4].mxu1  ;;  %2120 = vmatmul.mubr.bf16.vlgmr.msra.gmra.mrb[16].mxu1 %v1127_v52  ;;  %v5732_v52 = vld [vmem:[%s7884_s7 + $0x1f0] sm:$0xff]  }
 0x203   :  { %v961_v13 = vadd.f32 %v5506_v27, %v6533_v33  ;;  %v952_v9 = vpop.f32.mrb[5].mxu1  ;;  %2127 = vmatprep.mubr.bf16.mxu1 %v1160_v62  ;;  %5079 = vmatpush3.bf16.msra.mxu1 %v5715_v56  ;;  %v5730_v56 = vld [vmem:[%s7884_s7 + $0x178] sm:$0xff]   ;;  %v1007_v62 = vld [vmem:[%s7886_s15 + $0x40] sm:$0xff]  ;;  %v5733_v27 = vld [vmem:[%s7884_s7 + $0x1b0] sm:$0xff]  }
 0x204   :  { %v953_v59 = vadd.f32 %v6533_v33, %v952_v9  ;;  %v5507_v48 = vpop.f32.mrb[6].mxu1  ;;  %5017 = vmatpush3.bf16.msra.mxu0 %v5707_v30  ;;  %5080 = vmatprep.subr.bf16.mxu1 %v5716_v32  ;;  %v1009_v30 = vld [vmem:[%s7886_s15 + $0x50] sm:$0xff] }
 0x205   :  { %v6617_v17 = vmul.f32 %v1005_v25, %v961_v13  ;;  %v964_v37 = vadd.f32 %v5507_v48, %v6533_v33  ;;  %v955_v38 = vpop.f32.mrb[7].mxu1  ;;  %5018 = vmatprep.subr.bf16.mxu0 %v5708_v2  ;;  %v5731_v2 = vld [vmem:[%s7884_s7 + $0x138] sm:$0xff]  }
 0x206   :  { %v6629_v12 = vmul.f32 %v1003_v54, %v953_v59  ;;  %v956_v18 = vadd.f32 %v6533_v33, %v955_v38 }
 0x207   :  { %1037 = vst [vmem:[#allocation2 + $0x40] sm:$0xff] %v6617_v17  ;;  %v6633_v46 = vmul.f32 %v1006_v11, %v964_v37  ;;  %2031 = vmatmul.mubr.bf16.gmra.mrb[20].mxu0 %v6620_v1  ;;  %5081 = vmatpush3.bf16.msra.mxu1 %v5717_v0  ;;  %v5734_v0 = vld [vmem:[%s7884_s7 + $0x1f8] sm:$0xff]  }
 0x208   :  { %1035 = vst [vmem:[#allocation2 + $0x30] sm:$0xff] %v6629_v12  ;;  %v6640_v16 = vmul.f32 %v1004_v61, %v956_v18  ;;  %v6644_v22 = vpack.c.bf16 %v6629_v12, %v6556_v5  ;;  %5019 = vmatpush3.bf16.msra.mxu0 %v5709_v42  ;;  %5082 = vmatprep.subr.bf16.mxu1 %v5720_v19  ;;  %v1010_v61 = vld [vmem:[%s7886_s15 + $0x58] sm:$0xff]  ;;  %v6749_v42 = vld [vmem:[%s7884_s7 + $0x200] sm:$0xff]  }
 0x209   :  { %1038 = vst [vmem:[#allocation2 + $0x48] sm:$0xff] %v6633_v46  ;;  %5020 = vmatprep.subr.bf16.mxu0 %v5710_v58  ;;  %v1008_v58 = vld [vmem:[%s7886_s15 + $0x48] sm:$0xff] }
 0x20a   :  { %1036 = vst [vmem:[#allocation2 + $0x38] sm:$0xff] %v6640_v16  ;;  %2038 = vmatprep.mubr.bf16.mxu0 %v6644_v22  ;;  %2128 = vmatmul.mubr.bf16.gmra.mrb[20].mxu1 %v6648_v53  ;;  %v6691_v29 = vpack.c.bf16 %v6617_v17, %v6640_v16 }
 0x20b   :  { %5083 = vmatpush3.bf16.msra.mxu1 %v5721_v47 }
 0x20c   :  { %5021 = vmatpush3.bf16.msra.mxu0 %v5711_v7  ;;  %5084 = vmatprep.subr.bf16.mxu1 %v5722_v45  ;;  %v5735_v45 = vld [vmem:[%s7884_s7 + $0x1b8] sm:$0xff]  }
 0x20d   :  { %5022 = vmatprep.subr.bf16.mxu0 %v5712_v63 }
 0x20f   :  { %v1147_v36 = vld [vmem:[#allocation2 + $0x2f] sm:$0xff]  ;;  %5085 = vmatpush3.bf16.msra.mxu1 %v5723_v50 }
 0x210   :  { %v6679_v60 = vpack.c.bf16 %v1147_v36, %v6568_v28  ;;  %v6681_v51 = vld [vmem:[#allocation2 + $0x47] sm:$0xff]  ;;  %5023 = vmatpush3.bf16.msra.mxu0 %v5713_v6  ;;  %5086 = vmatprep.subr.bf16.mxu1 %v5726_v26 }
 0x211   :  { %v1148_v4 = vld [vmem:[#allocation2 + $0x37] sm:$0xff]  ;;  %v1149_v49 = vld [vmem:[#allocation2 + $0x3f] sm:$0xff]  ;;  %5024 = vmatprep.subr.bf16.mxu0 %v5718_v23  ;;  %v6696_v44 = vld [vmem:[#allocation2 + $0x29] sm:$0xff] }
 0x212   :  { %v6693_v57 = vld [vmem:[#allocation2 + $0x31] sm:$0xff]  ;;  %v1161_v15 = vpack.c.bf16 %v1148_v4, %v1147_v36  ;;  %2039 = vmatmul.mubr.bf16.gmra.mrb[24].mxu0 %v6679_v60  ;;  %v5728_v28 = vld [vmem:[%s7884_s7 + $0x1e8] sm:$0xff]   ;;  %v1162_v35 = vpack.c.bf16 %v6681_v51, %v1149_v49  ;;  %v6733_v9 = vpack.c.bf16 %v1149_v49, %v1148_v4  ;;  %v6735_v54 = vld [vmem:[#allocation2 + $0x39] sm:$0xff] }
 0x213   :  { %2046 = vmatprep.mubr.bf16.mxu0 %v6691_v29  ;;  %v6704_v21 = vpack.c.bf16 %v6693_v57, %v6696_v44  ;;  %5087 = vmatpush3.bf16.msra.mxu1 %v5727_v41  ;;  %v6737_v11 = vld [vmem:[#allocation2 + $0x41] sm:$0xff] }
 0x214   :  { %2135 = vmatprep.mubr.bf16.mxu1 %v1161_v15  ;;  %5025 = vmatpush3.bf16.msra.mxu0 %v5719_v34  ;;  %v6763_v7 = vpack.c.bf16 %v6737_v11, %v6735_v54 }
 0x215   :  { %2136 = vmatmul.mubr.bf16.gmra.mrb[24].mxu1 %v6704_v21  ;;  %5026 = vmatprep.subr.bf16.mxu0 %v5724_v43 }
 0x216   :  { %2143 = vmatprep.mubr.bf16.mxu1 %v1162_v35  ;;  %5088 = vmatprep.subr.bf16.mxu1 %v5728_v28  ;;  %v1013_v35 = vld [vmem:[%s7886_s15 + $0x70] sm:$0xff] }
 0x217   :  { %v5510_v32 = vpop.f32.mrb[8].mxu1  ;;  %5089 = vmatpush3.bf16.msra.mxu1 %v5729_v20 }
 0x218   :  { %v977_v25 = vadd.f32 %v5510_v32, %v6533_v33  ;;  %v968_v13 = vpop.f32.mrb[9].mxu1  ;;  %5027 = vmatpush3.bf16.msra.mxu0 %v5725_v31  ;;  %5090 = vmatprep.subr.bf16.mxu1 %v5732_v52 }
 0x219   :  { %v969_v59 = vadd.f32 %v6533_v33, %v968_v13  ;;  %v5511_v48 = vpop.f32.mrb[10].mxu1  ;;  %5028 = vmatprep.subr.bf16.mxu0 %v5730_v56  ;;  %v1011_v56 = vld [vmem:[%s7886_s15 + $0x60] sm:$0xff] }
 0x21a   :  { %v6751_v19 = vmul.f32 %v1009_v30, %v977_v25  ;;  %v980_v37 = vadd.f32 %v5511_v48, %v6533_v33  ;;  %v971_v38 = vpop.f32.mrb[11].mxu1  ;;  %2047 = vmatmul.mubr.bf16.gmra.mrb[28].mxu0 %v6733_v9  ;;  %v1012_v48 = vld [vmem:[%s7886_s15 + $0x68] sm:$0xff] }
 0x21b   :  { %v6758_v18 = vmul.f32 %v1007_v62, %v969_v59  ;;  %v972_v47 = vadd.f32 %v6533_v33, %v971_v38  ;;  %5091 = vmatpush3.bf16.msra.mxu1 %v5733_v27  ;;  %v1014_v62 = vld [vmem:[%s7886_s15 + $0x78] sm:$0xff] }
 0x21c   :  { %1041 = vst [vmem:[#allocation2 + $0x60] sm:$0xff] %v6751_v19  ;;  %v6769_v63 = vmul.f32 %v1010_v61, %v980_v37  ;;  %5029 = vmatpush3.bf16.msra.mxu0 %v5731_v2  ;;  %5092 = vmatprep.subr.bf16.mxu1 %v5734_v0 }
 0x21d   :  { %1039 = vst [vmem:[#allocation2 + $0x50] sm:$0xff] %v6758_v18  ;;  %v6772_v50 = vmul.f32 %v1008_v58, %v972_v47  ;;  %v6776_v6 = vpack.c.bf16 %v6758_v18, %v6633_v46  ;;  %2144 = vmatmul.mubr.bf16.gmra.mrb[28].mxu1 %v6763_v7  ;;  %5516 = vmatprep.subr.bf16.mxu0 %v6749_v42 }
 0x21e   :  { %1042 = vst [vmem:[#allocation2 + $0x68] sm:$0xff] %v6769_v63 }
 0x21f   :  { %1040 = vst [vmem:[#allocation2 + $0x58] sm:$0xff] %v6772_v50  ;;  %2054 = vmatprep.mubr.bf16.mxu0 %v6776_v6  ;;  %5093 = vmatpush3.bf16.msra.mxu1 %v5735_v45  ;;  %v6788_v34 = vpack.c.bf16 %v6751_v19, %v6772_v50 }
 0x224   :  { %v1151_v26 = vld [vmem:[#allocation2 + $0x4f] sm:$0xff] }
 0x225   :  { %v6784_v23 = vpack.c.bf16 %v1151_v26, %v6681_v51  ;;  %v1154_v36 = vld [vmem:[#allocation2 + $0x67] sm:$0xff] }
 0x226   :  { %v1152_v41 = vld [vmem:[#allocation2 + $0x57] sm:$0xff]  ;;  %v1153_v4 = vld [vmem:[#allocation2 + $0x5f] sm:$0xff]  ;;  %v6793_v15 = vld [vmem:[#allocation2 + $0x49] sm:$0xff] }
 0x227   :  { %v6790_v43 = vld [vmem:[#allocation2 + $0x51] sm:$0xff]  ;;  %v1163_v49 = vpack.c.bf16 %v1152_v41, %v1151_v26  ;;  %2055 = vmatmul.mubr.bf16.gmra.mrb[32].mxu0 %v6784_v23  ;;  %v1164_v28 = vpack.c.bf16 %v1154_v36, %v1153_v4  ;;  %v6812_v2 = vpack.c.bf16 %v1153_v4, %v1152_v41  ;;  %v6814_v27 = vld [vmem:[#allocation2 + $0x59] sm:$0xff]  ;;  %v6816_v25 = vld [vmem:[#allocation2 + $0x61] sm:$0xff] }
 0x228   :  { %2062 = vmatprep.mubr.bf16.mxu0 %v6788_v34  ;;  %v6798_v51 = vpack.c.bf16 %v6790_v43, %v6793_v15  ;;  %v6833_v58 = vpack.c.bf16 %v6816_v25, %v6814_v27 }
 0x229   :  { %2151 = vmatprep.mubr.bf16.mxu1 %v1163_v49 }
 0x22a   :  { %2152 = vmatmul.mubr.bf16.gmra.mrb[32].mxu1 %v6798_v51 }
 0x22b   :  { %v5514_v20 = vpop.f32.mrb[12].mxu1  ;;  %2159 = vmatprep.mubr.bf16.mxu1 %v1164_v28 }
 0x22c   :  { %v993_v31 = vadd.f32 %v5514_v20, %v6533_v33  ;;  %v984_v52 = vpop.f32.mrb[13].mxu1 }
 0x22d   :  { %v985_v30 = vadd.f32 %v6533_v33, %v984_v52  ;;  %v5515_v32 = vpop.f32.mrb[14].mxu1 }
 0x22e   :  { %v6818_v13 = vmul.f32 %v1013_v35, %v993_v31  ;;  %v996_v0 = vadd.f32 %v5515_v32, %v6533_v33  ;;  %v987_v59 = vpop.f32.mrb[15].mxu1 }
 0x22f   :  { %v6824_v61 = vmul.f32 %v1011_v56, %v985_v30  ;;  %v988_v37 = vadd.f32 %v6533_v33, %v987_v59  ;;  %2063 = vmatmul.mubr.bf16.gmra.mrb[36].mxu0 %v6812_v2  ;;  %v1191_v59 = vpack.c.bf16 %v6559_v8, %v6552_v24  ;;  %v1192_v24 = vpack.c.bf16 %v6556_v5, %v6546_v3  ;;  %v5739_v8 = vld [vmem:[%s7884_s7 + $0x218] sm:$0xff]   ;;  %v5741_v5 = vld [vmem:[%s7884_s7 + $0x228] sm:$0xff]  }
 0x230   :  { %1045 = vst [vmem:[#allocation2 + $0x80] sm:$0xff] %v6818_v13  ;;  %v6829_v38 = vmul.f32 %v1014_v62, %v996_v0  ;;  %v1223_v62 = vpack.c.bf16 %v6622_v10, %v6577_v40  ;;  %v1224_v40 = vpack.c.bf16 %v6696_v44, %v6624_v39  ;;  %v5738_v10 = vld [vmem:[%s7884_s7 + $0x210] sm:$0xff]   ;;  %v1193_v3 = vpack.c.bf16 %v6640_v16, %v6629_v12  ;;  %v5743_v16 = vld [vmem:[%s7884_s7 + $0x238] sm:$0xff]  }
 0x231   :  { %1043 = vst [vmem:[#allocation2 + $0x70] sm:$0xff] %v6824_v61  ;;  %v6836_v47 = vmul.f32 %v1012_v48, %v988_v37  ;;  %v6840_v45 = vpack.c.bf16 %v6824_v61, %v6769_v63  ;;  %v5737_v48 = vld [vmem:[%s7884_s7 + $0x208] sm:$0xff]   ;;  %v1226_v39 = vpack.c.bf16 %v6793_v15, %v6737_v11  ;;  %v1194_v12 = vpack.c.bf16 %v6633_v46, %v6617_v17  ;;  %v5751_v15 = vld [vmem:[%s7884_s7 + $0x258] sm:$0xff]  }
 0x232   :  { %1046 = vst [vmem:[#allocation2 + $0x88] sm:$0xff] %v6829_v38  ;;  %2160 = vmatmul.mubr.bf16.gmra.mrb[36].mxu1 %v6833_v58  ;;  %v1195_v17 = vpack.c.bf16 %v6772_v50, %v6758_v18  ;;  %v1294_v11 = vpack.c.bf16 %v6467_v55, %v6829_v38  ;;  %v1318_v55 = vld [vmem:[#allocation2 + $0x91] sm:$0xff]  ;;  %v5747_v50 = vld [vmem:[%s7884_s7 + $0x248] sm:$0xff]  }
 0x233   :  { %1044 = vst [vmem:[#allocation2 + $0x78] sm:$0xff] %v6836_v47  ;;  %2070 = vmatprep.mubr.bf16.mxu0 %v6840_v45  ;;  %v6852_v49 = vpack.c.bf16 %v6818_v13, %v6836_v47 }
 0x238   :  { %v1155_v33 = vld [vmem:[#allocation2 + $0x6f] sm:$0xff] }
 0x239   :  { %v6846_v26 = vpack.c.bf16 %v1155_v33, %v1154_v36  ;;  %v6848_v41 = vld [vmem:[#allocation2 + $0x87] sm:$0xff] }
 0x23a   :  { %v1156_v4 = vld [vmem:[#allocation2 + $0x77] sm:$0xff]  ;;  %v1157_v20 = vld [vmem:[#allocation2 + $0x7f] sm:$0xff]  ;;  %v6857_v31 = vld [vmem:[#allocation2 + $0x69] sm:$0xff] }
 0x23b   :  { %v6854_v28 = vld [vmem:[#allocation2 + $0x71] sm:$0xff]  ;;  %v1165_v35 = vpack.c.bf16 %v1156_v4, %v1155_v33  ;;  %2071 = vmatmul.mubr.bf16.gmra.mrb[40].mxu0 %v6846_v26  ;;  %v1166_v52 = vpack.c.bf16 %v6848_v41, %v1157_v20  ;;  %v6866_v56 = vpack.c.bf16 %v1157_v20, %v1156_v4  ;;  %v6868_v30 = vld [vmem:[#allocation2 + $0x79] sm:$0xff]  ;;  %v6870_v32 = vld [vmem:[#allocation2 + $0x81] sm:$0xff]  ;;  %v1228_v46 = vpack.c.bf16 %v6857_v31, %v6816_v25 }
 0x23c   :  { %2078 = vmatprep.mubr.bf16.mxu0 %v6852_v49  ;;  %v6862_v36 = vpack.c.bf16 %v6854_v28, %v6857_v31  ;;  %v6877_v0 = vpack.c.bf16 %v6870_v32, %v6868_v30  ;;  %v1222_v44 = vld [vmem:[#allocation2 + $0x89] sm:$0xff]  ;;  %v5753_v20 = vld [vmem:[%s7884_s7 + $0x260] sm:$0xff]  }
 0x23d   :  { %2167 = vmatprep.mubr.bf16.mxu1 %v1165_v35 }
 0x23e   :  { %2168 = vmatmul.mubr.bf16.gmra.mrb[40].mxu1 %v6862_v36 }
 0x23f   :  { %2175 = vmatprep.mubr.bf16.mxu1 %v1166_v52 }
 0x243   :  { %2079 = vmatmul.mubr.bf16.gmra.mrb[44].mxu0 %v6866_v56 }
 0x244   :  { %2216 = vmatprep.mubr.bf16.mxu0 %v1223_v62 }
 0x246   :  { %2176 = vmatmul.mubr.bf16.gmra.mrb[44].mxu1 %v6877_v0 }
 0x247   :  { %2313 = vmatprep.mubr.bf16.mxu1 %v6575_v14  ;;  %v1225_v14 = vpack.c.bf16 %v6735_v54, %v6693_v57  ;;  %v1229_v57 = vpack.c.bf16 %v6868_v30, %v6854_v28  ;;  %v1230_v54 = vpack.c.bf16 %v1222_v44, %v6870_v32  ;;  %v5752_v28 = vld [vmem:[%s7884_s7 + $0x2a0] sm:$0xff]  }
 0x248   :  { %v5755_v30 = vld [vmem:[%s7884_s7 + $0x2c0] sm:$0xff]  }
 0x24b   :  { %2217 = vmatmul.mubr.bf16.vlgmr.msra.gmra.mrb[48].mxu0 %v1191_v59 }
 0x24c   :  { %2224 = vmatprep.mubr.bf16.mxu0 %v1224_v40  ;;  %5517 = vmatpush3.bf16.msra.mxu0 %v6749_v42  ;;  %v1198_v42 = vpack.c.bf16 %v6829_v38, %v6818_v13 }
 0x24d   :  { %5518 = vmatprep.subr.bf16.mxu0 %v5737_v48 }
 0x24e   :  { %2314 = vmatmul.mubr.bf16.vlgmr.msra.gmra.mrb[48].mxu1 %v6620_v1  ;;  %v5740_v1 = vld [vmem:[%s7884_s7 + $0x220] sm:$0xff]  }
 0x24f   :  { %2321 = vmatprep.mubr.bf16.mxu1 %v6644_v22  ;;  %v5742_v22 = vld [vmem:[%s7884_s7 + $0x230] sm:$0xff]  }
 0x250   :  { %5519 = vmatpush3.bf16.msra.mxu0 %v5737_v48 }
 0x251   :  { %5520 = vmatprep.subr.bf16.mxu0 %v5738_v10 }
 0x253   :  { %2225 = vmatmul.mubr.bf16.gmra.mrb[52].mxu0 %v1192_v24 }
 0x254   :  { %2232 = vmatprep.mubr.bf16.mxu0 %v1225_v14  ;;  %5521 = vmatpush3.bf16.msra.mxu0 %v5738_v10 }
 0x255   :  { %5522 = vmatprep.subr.bf16.mxu0 %v5739_v8 }
 0x256   :  { %2322 = vmatmul.mubr.bf16.gmra.mrb[52].mxu1 %v6679_v60  ;;  %v1227_v60 = vpack.c.bf16 %v6814_v27, %v6790_v43  ;;  %v5750_v43 = vld [vmem:[%s7884_s7 + $0x298] sm:$0xff]  }
 0x257   :  { %2329 = vmatprep.mubr.bf16.mxu1 %v6691_v29  ;;  %v1196_v29 = vpack.c.bf16 %v6769_v63, %v6751_v19  ;;  %v1254_v19 = vld [vmem:[#allocation2 + $0x8f] sm:$0xff]  ;;  %v1326_v63 = vpack.c.bf16 %v1318_v55, %v1222_v44 }
 0x258   :  { %5523 = vmatpush3.bf16.msra.mxu0 %v5739_v8  ;;  %v1262_v18 = vpack.c.bf16 %v1254_v19, %v6848_v41  ;;  %v5758_v55 = vld [vmem:[%s7884_s7 + $0x2a8] sm:$0xff]  }
 0x259   :  { %5524 = vmatprep.subr.bf16.mxu0 %v5740_v1 }
 0x25b   :  { %2233 = vmatmul.mubr.bf16.gmra.mrb[56].mxu0 %v1193_v3 }
 0x25c   :  { %2240 = vmatprep.mubr.bf16.mxu0 %v1226_v39  ;;  %5525 = vmatpush3.bf16.msra.mxu0 %v5740_v1 }
 0x25d   :  { %5526 = vmatprep.subr.bf16.mxu0 %v5741_v5 }
 0x25e   :  { %2330 = vmatmul.mubr.bf16.gmra.mrb[56].mxu1 %v6733_v9  ;;  %v1197_v9 = vpack.c.bf16 %v6836_v47, %v6824_v61 }
 0x25f   :  { %2337 = vmatprep.mubr.bf16.mxu1 %v6776_v6  ;;  %v5748_v6 = vld [vmem:[%s7884_s7 + $0x290] sm:$0xff]  }
 0x260   :  { %5527 = vmatpush3.bf16.msra.mxu0 %v5741_v5 }
 0x261   :  { %5528 = vmatprep.subr.bf16.mxu0 %v5742_v22 }
 0x263   :  { %2241 = vmatmul.mubr.bf16.gmra.mrb[60].mxu0 %v1194_v12 }
 0x264   :  { %2248 = vmatprep.mubr.bf16.mxu0 %v1227_v60  ;;  %5529 = vmatpush3.bf16.msra.mxu0 %v5742_v22 }
 0x265   :  { %5530 = vmatprep.subr.bf16.mxu0 %v5743_v16 }
 0x266   :  { %2338 = vmatmul.mubr.bf16.gmra.mrb[60].mxu1 %v6784_v23  ;;  %v5749_v23 = vld [vmem:[%s7884_s7 + $0x250] sm:$0xff]  }
 0x267   :  { %2345 = vmatprep.mubr.bf16.mxu1 %v6788_v34 }
 0x268   :  { %5531 = vmatpush3.bf16.msra.mxu0 %v5743_v16 }
 0x26b   :  { %2249 = vmatmul.mubr.bf16.gmra.mrb[64].mxu0 %v1195_v17 }
 0x26c   :  { %2256 = vmatprep.mubr.bf16.mxu0 %v1228_v46 }
 0x26e   :  { %2346 = vmatmul.mubr.bf16.gmra.mrb[64].mxu1 %v6812_v2 }
 0x26f   :  { %2353 = vmatprep.mubr.bf16.mxu1 %v6840_v45 }
 0x273   :  { %2257 = vmatmul.mubr.bf16.gmra.mrb[68].mxu0 %v1196_v29 }
 0x274   :  { %2264 = vmatprep.mubr.bf16.mxu0 %v1229_v57 }
 0x276   :  { %2354 = vmatmul.mubr.bf16.gmra.mrb[68].mxu1 %v6846_v26 }
 0x277   :  { %2361 = vmatprep.mubr.bf16.mxu1 %v6852_v49 }
 0x27b   :  { %2265 = vmatmul.mubr.bf16.gmra.mrb[72].mxu0 %v1197_v9 }
 0x27c   :  { %2272 = vmatprep.mubr.bf16.mxu0 %v1230_v54 }
 0x27e   :  { %2362 = vmatmul.mubr.bf16.gmra.mrb[72].mxu1 %v6866_v56  ;;  %v5754_v56 = vld [vmem:[%s7884_s7 + $0x300] sm:$0xff]  }
 0x27f   :  { %2369 = vmatprep.mubr.bf16.mxu1 %v1294_v11  ;;  %5222 = vmatprep.subr.bf16.mxu0 %v5754_v56  ;;  %v5769_v56 = vld [vmem:[%s7884_s7 + $0x2e8] sm:$0xff]  }
 0x283   :  { %2273 = vmatmul.mubr.bf16.gmra.mrb[76].mxu0 %v1198_v42  ;;  %v5757_v42 = vld [vmem:[%s7884_s7 + $0x2c8] sm:$0xff]  }
 0x284   :  { %5532 = vmatprep.mubr.bf16.mxu0 %v6648_v53  ;;  %v5744_v53 = vld [vmem:[%s7884_s7 + $0x280] sm:$0xff]  }
 0x285   :  { %5158 = vmatprep.subr.bf16.mxu1 %v5744_v53  ;;  %v5759_v53 = vld [vmem:[%s7884_s7 + $0x268] sm:$0xff]  }
 0x286   :  { %2370 = vmatmul.mubr.bf16.gmra.mrb[76].mxu1 %v1262_v18 }
 0x28b   :  { %5533 = vmatmul.mubr.bf16.vlgmr.msra.gmra.mrb[80].mxu0 %v6704_v21  ;;  %v5745_v21 = vld [vmem:[%s7884_s7 + $0x240] sm:$0xff]  }
 0x28c   :  { %5536 = vmatprep.mubr.bf16.mxu0 %v6763_v7  ;;  %5159 = vmatpush3.bf16.msra.mxu1 %v5745_v21  ;;  %v5746_v7 = vld [vmem:[%s7884_s7 + $0x288] sm:$0xff]  }
 0x28d   :  { %5160 = vmatprep.subr.bf16.mxu1 %v5746_v7  ;;  %5223 = vmatpush3.bf16.msra.mxu0 %v5755_v30 }
 0x290   :  { %5161 = vmatpush3.bf16.msra.mxu1 %v5747_v50  ;;  %v5760_v50 = vld [vmem:[%s7884_s7 + $0x310] sm:$0xff]  }
 0x291   :  { %5162 = vmatprep.subr.bf16.mxu1 %v5748_v6  ;;  %v5761_v6 = vld [vmem:[%s7884_s7 + $0x2d0] sm:$0xff]  }
 0x293   :  { %5537 = vmatmul.mubr.bf16.gmra.mrb[84].mxu0 %v6798_v51  ;;  %v6982_v51 = vld [vmem:[%s7890_s8] ss:$0 sm:$0xff] }
 0x294   :  { %5540 = vmatprep.mubr.bf16.mxu0 %v6833_v58  ;;  %5163 = vmatpush3.bf16.msra.mxu1 %v5749_v23  ;;  %v5762_v23 = vld [vmem:[%s7884_s7 + $0x318] sm:$0xff]  }
 0x295   :  { %5164 = vmatprep.subr.bf16.mxu1 %v5750_v43 }
 0x298   :  { %5165 = vmatpush3.bf16.msra.mxu1 %v5751_v15 }
 0x299   :  { %5166 = vmatprep.subr.bf16.mxu1 %v5752_v28  ;;  %v5766_v28 = vld [vmem:[%s7884_s7 + $0x320] sm:$0xff]  }
 0x29b   :  { %5541 = vmatmul.mubr.bf16.gmra.mrb[88].mxu0 %v6862_v36 }
 0x29c   :  { %5544 = vmatprep.mubr.bf16.mxu0 %v6877_v0  ;;  %5167 = vmatpush3.bf16.msra.mxu1 %v5753_v20  ;;  %v5756_v0 = vld [vmem:[%s7884_s7 + $0x308] sm:$0xff]   ;;  %v5767_v20 = vld [vmem:[%s7884_s7 + $0x2e0] sm:$0xff]  }
 0x29d   :  { %5224 = vmatprep.subr.bf16.mxu0 %v5756_v0  ;;  %5168 = vmatprep.subr.bf16.mxu1 %v5758_v55 }
 0x29e   :  { %5225 = vmatpush3.bf16.msra.mxu0 %v5757_v42 }
 0x29f   :  { %5226 = vmatprep.subr.bf16.mxu0 %v5760_v50 }
 0x2a0   :  { %5169 = vmatpush3.bf16.msra.mxu1 %v5759_v53 }
 0x2a2   :  { %5227 = vmatpush3.bf16.msra.mxu0 %v5761_v6 }
 0x2a3   :  { %5545 = vmatmul.mubr.bf16.gmra.mrb[92].mxu0 %v1326_v63  ;;  %5228 = vmatprep.subr.bf16.mxu0 %v5762_v23 }
 0x2d2   :  { %v4902_v34 = vpop.f32.mrb[16].mxu0 }
 0x2d3   :  { %v4903_v2 = vpop.f32.mrb[17].mxu0 }
 0x2d4   :  { %v4904_v27 = vadd.f32 %v4903_v2, %v4902_v34  ;;  %v4905_v25 = vpop.f32.mrb[18].mxu0 }
 0x2d5   :  { %v4966_v13 = vpop.f32.mrb[16].mxu1  ;;  %v4906_v61 = vpop.f32.mrb[19].mxu0 }
 0x2d6   :  { %v2025_v37 = vadd.f32 %v4904_v27, %v6982_v51  ;;  %v4907_v38 = vadd.f32 %v4906_v61, %v4905_v25  ;;  %v4967_v58 = vpop.f32.mrb[17].mxu1 }
 0x2d7   :  { %v4968_v47 = vadd.f32 %v4967_v58, %v4966_v13  ;;  %v4969_v45 = vpop.f32.mrb[18].mxu1 }
 0x2d8   :  { %v2028_v33 = vadd.f32 %v4907_v38, %v6982_v51  ;;  %v4970_v26 = vpop.f32.mrb[19].mxu1 }
 0x2d9   :  { %v6986_v41 = vadd.f32 %v4968_v47, %v2025_v37  ;;  %v4971_v4 = vadd.f32 %v4970_v26, %v4969_v45  ;;  %v5763_v47 = vld [vmem:[%s7884_s7 + $0x2d8] sm:$0xff]   ;;  %v5764_v26 = vld [vmem:[%s7884_s7 + $0x2b0] sm:$0xff]  }
 0x2da   :  { %v4908_v49 = vpop.f32.mrb[20].mxu0  ;;  %5229 = vmatpush3.bf16.msra.mxu0 %v5763_v47  ;;  %5170 = vmatprep.subr.bf16.mxu1 %v5764_v26 }
 0x2db   :  { %v6994_v35 = vadd.f32 %v4971_v4, %v2028_v33  ;;  %v4909_v31 = vpop.f32.mrb[21].mxu0  ;;  %v5765_v4 = vld [vmem:[%s7884_s7 + $0x270] sm:$0xff]   ;;  %5230 = vmatprep.subr.bf16.mxu0 %v5766_v28 }
 0x2dc   :  { %v4910_v36 = vadd.f32 %v4909_v31, %v4908_v49  ;;  %v4911_v52 = vpop.f32.mrb[22].mxu0  ;;  %v5768_v31 = vld [vmem:[%s7884_s7 + $0x328] sm:$0xff]   ;;  %5171 = vmatpush3.bf16.msra.mxu1 %v5765_v4 }
 0x2dd   :  { %v4972_v32 = vpop.f32.mrb[20].mxu1  ;;  %v4912_v62 = vpop.f32.mrb[23].mxu0 }
 0x2de   :  { %v2033_v59 = vadd.f32 %v4910_v36, %v6982_v51  ;;  %v4913_v48 = vadd.f32 %v4912_v62, %v4911_v52  ;;  %v4973_v40 = vpop.f32.mrb[21].mxu1  ;;  %5231 = vmatpush3.bf16.msra.mxu0 %v5767_v20  ;;  %v5770_v62 = vld [vmem:[%s7884_s7 + $0x2b8] sm:$0xff]  }
 0x2df   :  { %v4974_v10 = vadd.f32 %v4973_v40, %v4972_v32  ;;  %v4975_v24 = vpop.f32.mrb[22].mxu1  ;;  %5232 = vmatprep.subr.bf16.mxu0 %v5768_v31  ;;  %5172 = vmatprep.subr.bf16.mxu1 %v5770_v62 }
 0x2e0   :  { %v2036_v8 = vadd.f32 %v4913_v48, %v6982_v51  ;;  %v4976_v14 = vpop.f32.mrb[23].mxu1  ;;  %v5771_v48 = vld [vmem:[%s7884_s7 + $0x278] sm:$0xff]  }
 0x2e1   :  { %v7007_v1 = vadd.f32 %v4974_v10, %v2033_v59  ;;  %v4977_v3 = vadd.f32 %v4976_v14, %v4975_v24  ;;  %v5773_v14 = vld [vmem:[%s7884_s7 + $0x2f0] sm:$0xff]   ;;  %5173 = vmatpush3.bf16.msra.mxu1 %v5771_v48 }
 0x2e2   :  { %5233 = vmatpush3.bf16.msra.mxu0 %v5769_v56 }
 0x2e3   :  { %v7009_v5 = vadd.f32 %v4977_v3, %v2036_v8  ;;  %v5772_v8 = vld [vmem:[%s7884_s7 + $0x330] sm:$0xff]   ;;  %v5774_v3 = vld [vmem:[%s7884_s7 + $0x338] sm:$0xff]  }
 0x2e4   :  { %5234 = vmatprep.subr.bf16.mxu0 %v5772_v8 }
 0x2e5   :  { %v4914_v39 = vpop.f32.mrb[24].mxu0 }
 0x2e6   :  { %v4915_v22 = vpop.f32.mrb[25].mxu0  ;;  %5235 = vmatpush3.bf16.msra.mxu0 %v5773_v14 }
 0x2e7   :  { %v4916_v12 = vadd.f32 %v4915_v22, %v4914_v39  ;;  %v4917_v16 = vpop.f32.mrb[26].mxu0  ;;  %5236 = vmatprep.subr.bf16.mxu0 %v5774_v3 }
 0x2e8   :  { %v4978_v60 = vpop.f32.mrb[24].mxu1  ;;  %v4918_v17 = vpop.f32.mrb[27].mxu0 }
 0x2e9   :  { %v2041_v46 = vadd.f32 %v4916_v12, %v6982_v51  ;;  %v4919_v29 = vadd.f32 %v4918_v17, %v4917_v16  ;;  %v4979_v57 = vpop.f32.mrb[25].mxu1 }
 0x2ea   :  { %v4980_v44 = vadd.f32 %v4979_v57, %v4978_v60  ;;  %v4981_v9 = vpop.f32.mrb[26].mxu1 }
 0x2eb   :  { %v2044_v54 = vadd.f32 %v4919_v29, %v6982_v51  ;;  %v4982_v11 = vpop.f32.mrb[27].mxu1 }
 0x2ec   :  { %v7016_v19 = vadd.f32 %v4980_v44, %v2041_v46  ;;  %v4983_v18 = vadd.f32 %v4982_v11, %v4981_v9  ;;  %v5775_v44 = vld [vmem:[%s7884_s7 + $0x2f8] sm:$0xff]   ;;  %v5776_v11 = vld [vmem:[%s7884_s7 + $0x380] sm:$0xff]  }
 0x2ed   :  { %v4920_v63 = vpop.f32.mrb[28].mxu0  ;;  %5237 = vmatpush3.bf16.msra.mxu0 %v5775_v44  ;;  %5286 = vmatprep.subr.bf16.mxu1 %v5776_v11 }
 0x2ee   :  { %v7024_v21 = vadd.f32 %v4983_v18, %v2044_v54  ;;  %v4921_v7 = vpop.f32.mrb[29].mxu0 }
 0x2ef   :  { %v4922_v34 = vadd.f32 %v4921_v7, %v4920_v63  ;;  %v4923_v43 = vpop.f32.mrb[30].mxu0 }
 0x2f0   :  { %v4984_v15 = vpop.f32.mrb[28].mxu1  ;;  %v4924_v2 = vpop.f32.mrb[31].mxu0 }
 0x2f1   :  { %v2049_v27 = vadd.f32 %v4922_v34, %v6982_v51  ;;  %v4925_v25 = vadd.f32 %v4924_v2, %v4923_v43  ;;  %v4985_v13 = vpop.f32.mrb[29].mxu1 }
 0x2f2   :  { %v4986_v61 = vadd.f32 %v4985_v13, %v4984_v15  ;;  %v4987_v37 = vpop.f32.mrb[30].mxu1 }
 0x2f3   :  { %v2052_v38 = vadd.f32 %v4925_v25, %v6982_v51  ;;  %v4988_v58 = vpop.f32.mrb[31].mxu1 }
 0x2f4   :  { %v7040_v45 = vadd.f32 %v4986_v61, %v2049_v27  ;;  %v4989_v33 = vadd.f32 %v4988_v58, %v4987_v37 }
 0x2f6   :  { %v7048_v49 = vadd.f32 %v4989_v33, %v2052_v38  ;;  %v5784_v33 = vld [vmem:[%s7884_s7 + $0x400] sm:$0xff]  }
 0x2f7   :  { %5350 = vmatprep.subr.bf16.mxu0 %v5784_v33 }
 0x2fa   :  { %v4926_v36 = vpop.f32.mrb[32].mxu0 }
 0x2fb   :  { %v4927_v52 = vpop.f32.mrb[33].mxu0 }
 0x2fc   :  { %v4928_v30 = vadd.f32 %v4927_v52, %v4926_v36  ;;  %v4929_v32 = vpop.f32.mrb[34].mxu0 }
 0x2fd   :  { %v4990_v0 = vpop.f32.mrb[32].mxu1  ;;  %v4930_v59 = vpop.f32.mrb[35].mxu0 }
 0x2fe   :  { %v2057_v40 = vadd.f32 %v4928_v30, %v6982_v51  ;;  %v4931_v10 = vadd.f32 %v4930_v59, %v4929_v32  ;;  %v4991_v24 = vpop.f32.mrb[33].mxu1 }
 0x2ff   :  { %v4992_v39 = vadd.f32 %v4991_v24, %v4990_v0  ;;  %v4993_v22 = vpop.f32.mrb[34].mxu1 }
 0x300   :  { %v2060_v12 = vadd.f32 %v4931_v10, %v6982_v51  ;;  %v4994_v16 = vpop.f32.mrb[35].mxu1 }
 0x301   :  { %v7079_v60 = vadd.f32 %v4992_v39, %v2057_v40  ;;  %v4995_v17 = vadd.f32 %v4994_v16, %v4993_v22 }
 0x302   :  { %v4932_v46 = vpop.f32.mrb[36].mxu0 }
 0x303   :  { %v7081_v29 = vadd.f32 %v4995_v17, %v2060_v12  ;;  %v4933_v57 = vpop.f32.mrb[37].mxu0 }
 0x304   :  { %v4934_v9 = vadd.f32 %v4933_v57, %v4932_v46  ;;  %v4935_v54 = vpop.f32.mrb[38].mxu0 }
 0x305   :  { %v4996_v42 = vpop.f32.mrb[36].mxu1  ;;  %v4936_v18 = vpop.f32.mrb[39].mxu0 }
 0x306   :  { %v2065_v55 = vadd.f32 %v4934_v9, %v6982_v51  ;;  %v4937_v63 = vadd.f32 %v4936_v18, %v4935_v54  ;;  %v4997_v53 = vpop.f32.mrb[37].mxu1 }
 0x307   :  { %v4998_v7 = vadd.f32 %v4997_v53, %v4996_v42  ;;  %v4999_v50 = vpop.f32.mrb[38].mxu1 }
 0x308   :  { %v2068_v6 = vadd.f32 %v4937_v63, %v6982_v51  ;;  %v5000_v23 = vpop.f32.mrb[39].mxu1 }
 0x309   :  { %v7091_v34 = vadd.f32 %v4998_v7, %v2065_v55  ;;  %v5001_v43 = vadd.f32 %v5000_v23, %v4999_v50 }
 0x30b   :  { %v7093_v15 = vadd.f32 %v5001_v43, %v2068_v6 }
 0x30e   :  { %v4938_v2 = vpop.f32.mrb[40].mxu0 }
 0x30f   :  { %v4939_v27 = vpop.f32.mrb[41].mxu0 }
 0x310   :  { %v4940_v25 = vadd.f32 %v4939_v27, %v4938_v2  ;;  %v4941_v13 = vpop.f32.mrb[42].mxu0 }
 0x311   :  { %v5002_v61 = vpop.f32.mrb[40].mxu1  ;;  %v4942_v37 = vpop.f32.mrb[43].mxu0 }
 0x312   :  { %v2073_v38 = vadd.f32 %v4940_v25, %v6982_v51  ;;  %v4943_v58 = vadd.f32 %v4942_v37, %v4941_v13  ;;  %v5003_v47 = vpop.f32.mrb[41].mxu1 }
 0x313   :  { %v5004_v26 = vadd.f32 %v5003_v47, %v5002_v61  ;;  %v5005_v4 = vpop.f32.mrb[42].mxu1 }
 0x314   :  { %v2076_v28 = vadd.f32 %v4943_v58, %v6982_v51  ;;  %v5006_v20 = vpop.f32.mrb[43].mxu1 }
 0x315   :  { %v7100_v31 = vadd.f32 %v5004_v26, %v2073_v38  ;;  %v5007_v36 = vadd.f32 %v5006_v20, %v5005_v4 }
 0x316   :  { %v4944_v52 = vpop.f32.mrb[44].mxu0 }
 0x317   :  { %v7102_v56 = vadd.f32 %v5007_v36, %v2076_v28  ;;  %v4945_v30 = vpop.f32.mrb[45].mxu0 }
 0x318   :  { %v4946_v32 = vadd.f32 %v4945_v30, %v4944_v52  ;;  %v4947_v62 = vpop.f32.mrb[46].mxu0 }
 0x319   :  { %v5008_v0 = vpop.f32.mrb[44].mxu1  ;;  %v4948_v59 = vpop.f32.mrb[47].mxu0 }
 0x31a   :  { %v2081_v48 = vadd.f32 %v4946_v32, %v6982_v51  ;;  %v4949_v40 = vadd.f32 %v4948_v59, %v4947_v62  ;;  %v5009_v10 = vpop.f32.mrb[45].mxu1 }
 0x31b   :  { %v5010_v24 = vadd.f32 %v5009_v10, %v5008_v0  ;;  %v5011_v8 = vpop.f32.mrb[46].mxu1 }
 0x31c   :  { %v2084_v14 = vadd.f32 %v4949_v40, %v6982_v51  ;;  %v5012_v3 = vpop.f32.mrb[47].mxu1 }
 0x31d   :  { %v7106_v39 = vadd.f32 %v5010_v24, %v2081_v48  ;;  %v5013_v22 = vadd.f32 %v5012_v3, %v5011_v8 }
 0x31e   :  { %v5030_v12 = vpop.f32.mrb[48].mxu0 }
 0x31f   :  { %v7108_v16 = vadd.f32 %v5013_v22, %v2084_v14  ;;  %v5031_v17 = vpop.f32.mrb[49].mxu0 }
 0x320   :  { %v5032_v46 = vadd.f32 %v5031_v17, %v5030_v12  ;;  %v5033_v57 = vpop.f32.mrb[50].mxu0 }
 0x321   :  { %v5094_v44 = vpop.f32.mrb[48].mxu1  ;;  %v5034_v9 = vpop.f32.mrb[51].mxu0 }
 0x322   :  { %v2219_v54 = vadd.f32 %v5032_v46, %v6986_v41  ;;  %v5035_v11 = vadd.f32 %v5034_v9, %v5033_v57  ;;  %v5095_v42 = vpop.f32.mrb[49].mxu1 }
 0x323   :  { %v5096_v18 = vadd.f32 %v5095_v42, %v5094_v44  ;;  %v5097_v55 = vpop.f32.mrb[50].mxu1 }
 0x324   :  { %v2222_v51 = vadd.f32 %v5035_v11, %v6994_v35  ;;  %v5098_v63 = vpop.f32.mrb[51].mxu1 }
 0x325   :  { %v5099_v53 = vadd.f32 %v5098_v63, %v5097_v55  ;;  %v7112_v7 = vadd.f32 %v5096_v18, %v2219_v54 }
 0x326   :  { %v5036_v50 = vpop.f32.mrb[52].mxu0 }
 0x327   :  { %v5037_v6 = vpop.f32.mrb[53].mxu0  ;;  %v7114_v23 = vadd.f32 %v5099_v53, %v2222_v51 }
 0x328   :  { %v5038_v43 = vadd.f32 %v5037_v6, %v5036_v50  ;;  %v5039_v2 = vpop.f32.mrb[54].mxu0 }
 0x329   :  { %v5100_v27 = vpop.f32.mrb[52].mxu1  ;;  %v5040_v25 = vpop.f32.mrb[55].mxu0 }
 0x32a   :  { %v2227_v41 = vadd.f32 %v5038_v43, %v7007_v1  ;;  %v5041_v13 = vadd.f32 %v5040_v25, %v5039_v2  ;;  %v5101_v61 = vpop.f32.mrb[53].mxu1 }
 0x32b   :  { %v5102_v37 = vadd.f32 %v5101_v61, %v5100_v27  ;;  %v5103_v38 = vpop.f32.mrb[54].mxu1 }
 0x32c   :  { %v2230_v35 = vadd.f32 %v5041_v13, %v7009_v5  ;;  %v5104_v58 = vpop.f32.mrb[55].mxu1 }
 0x32d   :  { %v5105_v47 = vadd.f32 %v5104_v58, %v5103_v38  ;;  %v7118_v33 = vadd.f32 %v5102_v37, %v2227_v41 }
 0x32e   :  { %v5042_v26 = vpop.f32.mrb[56].mxu0 }
 0x32f   :  { %v5043_v4 = vpop.f32.mrb[57].mxu0  ;;  %v7120_v28 = vadd.f32 %v5105_v47, %v2230_v35 }
 0x330   :  { %v5044_v20 = vadd.f32 %v5043_v4, %v5042_v26  ;;  %v5045_v36 = vpop.f32.mrb[58].mxu0 }
 0x331   :  { %v5106_v52 = vpop.f32.mrb[56].mxu1  ;;  %v5046_v30 = vpop.f32.mrb[59].mxu0 }
 0x332   :  { %v2235_v1 = vadd.f32 %v5044_v20, %v7016_v19  ;;  %v5047_v32 = vadd.f32 %v5046_v30, %v5045_v36  ;;  %v5107_v62 = vpop.f32.mrb[57].mxu1 }
 0x333   :  { %v5108_v0 = vadd.f32 %v5107_v62, %v5106_v52  ;;  %v5109_v59 = vpop.f32.mrb[58].mxu1 }
 0x334   :  { %v2238_v5 = vadd.f32 %v5047_v32, %v7024_v21  ;;  %v5110_v48 = vpop.f32.mrb[59].mxu1 }
 0x335   :  { %v5111_v40 = vadd.f32 %v5110_v48, %v5109_v59  ;;  %v7124_v10 = vadd.f32 %v5108_v0, %v2235_v1 }
 0x336   :  { %v5048_v24 = vpop.f32.mrb[60].mxu0 }
 0x337   :  { %v5049_v8 = vpop.f32.mrb[61].mxu0  ;;  %v7126_v14 = vadd.f32 %v5111_v40, %v2238_v5 }
 0x338   :  { %v5050_v3 = vadd.f32 %v5049_v8, %v5048_v24  ;;  %v5051_v22 = vpop.f32.mrb[62].mxu0 }
 0x339   :  { %v5112_v12 = vpop.f32.mrb[60].mxu1  ;;  %v5052_v17 = vpop.f32.mrb[63].mxu0 }
 0x33a   :  { %v2243_v19 = vadd.f32 %v5050_v3, %v7040_v45  ;;  %v5053_v46 = vadd.f32 %v5052_v17, %v5051_v22  ;;  %v5113_v57 = vpop.f32.mrb[61].mxu1 }
 0x33b   :  { %v5114_v44 = vadd.f32 %v5113_v57, %v5112_v12  ;;  %v5115_v9 = vpop.f32.mrb[62].mxu1 }
 0x33c   :  { %v2246_v21 = vadd.f32 %v5053_v46, %v7048_v49  ;;  %v5116_v54 = vpop.f32.mrb[63].mxu1 }
 0x33d   :  { %v5117_v11 = vadd.f32 %v5116_v54, %v5115_v9  ;;  %v7130_v42 = vadd.f32 %v5114_v44, %v2243_v19 }
 0x33e   :  { %v5054_v18 = vpop.f32.mrb[64].mxu0 }
 0x33f   :  { %v5055_v55 = vpop.f32.mrb[65].mxu0  ;;  %v7132_v51 = vadd.f32 %v5117_v11, %v2246_v21 }
 0x340   :  { %v5056_v63 = vadd.f32 %v5055_v55, %v5054_v18  ;;  %v5057_v53 = vpop.f32.mrb[66].mxu0 }
 0x341   :  { %v5118_v50 = vpop.f32.mrb[64].mxu1  ;;  %v5058_v6 = vpop.f32.mrb[67].mxu0 }
 0x342   :  { %v2251_v45 = vadd.f32 %v5056_v63, %v7079_v60  ;;  %v5059_v43 = vadd.f32 %v5058_v6, %v5057_v53  ;;  %v5119_v2 = vpop.f32.mrb[65].mxu1 }
 0x343   :  { %v5120_v27 = vadd.f32 %v5119_v2, %v5118_v50  ;;  %v5121_v25 = vpop.f32.mrb[66].mxu1 }
 0x344   :  { %v2254_v49 = vadd.f32 %v5059_v43, %v7081_v29  ;;  %v5122_v41 = vpop.f32.mrb[67].mxu1 }
 0x345   :  { %v5123_v13 = vadd.f32 %v5122_v41, %v5121_v25  ;;  %v7136_v61 = vadd.f32 %v5120_v27, %v2251_v45 }
 0x346   :  { %v5060_v37 = vpop.f32.mrb[68].mxu0 }
 0x347   :  { %v5061_v38 = vpop.f32.mrb[69].mxu0  ;;  %v7138_v35 = vadd.f32 %v5123_v13, %v2254_v49 }
 0x348   :  { %v5062_v58 = vadd.f32 %v5061_v38, %v5060_v37  ;;  %v5063_v47 = vpop.f32.mrb[70].mxu0 }
 0x349   :  { %v5124_v26 = vpop.f32.mrb[68].mxu1  ;;  %v5064_v4 = vpop.f32.mrb[71].mxu0 }
 0x34a   :  { %v2259_v60 = vadd.f32 %v5062_v58, %v7091_v34  ;;  %v5065_v20 = vadd.f32 %v5064_v4, %v5063_v47  ;;  %v5125_v36 = vpop.f32.mrb[69].mxu1 }
 0x34b   :  { %v5126_v52 = vadd.f32 %v5125_v36, %v5124_v26  ;;  %v5127_v30 = vpop.f32.mrb[70].mxu1 }
 0x34c   :  { %v2262_v29 = vadd.f32 %v5065_v20, %v7093_v15  ;;  %v5128_v1 = vpop.f32.mrb[71].mxu1  ;;  %v2510_v20 = vld [vmem:[%s7886_s15 + $0x18] sm:$0xff] }
 0x34d   :  { %v5129_v32 = vadd.f32 %v5128_v1, %v5127_v30  ;;  %v7142_v62 = vadd.f32 %v5126_v52, %v2259_v60 }
 0x34e   :  { %v5066_v0 = vpop.f32.mrb[72].mxu0 }
 0x34f   :  { %v5067_v59 = vpop.f32.mrb[73].mxu0  ;;  %v7144_v5 = vadd.f32 %v5129_v32, %v2262_v29 }
 0x350   :  { %v5068_v48 = vadd.f32 %v5067_v59, %v5066_v0  ;;  %v5069_v40 = vpop.f32.mrb[74].mxu0 }
 0x351   :  { %v5130_v24 = vpop.f32.mrb[72].mxu1  ;;  %v5070_v8 = vpop.f32.mrb[75].mxu0 }
 0x352   :  { %v2267_v34 = vadd.f32 %v5068_v48, %v7100_v31  ;;  %v5071_v3 = vadd.f32 %v5070_v8, %v5069_v40  ;;  %v5131_v22 = vpop.f32.mrb[73].mxu1 }
 0x353   :  { %v5132_v12 = vadd.f32 %v5131_v22, %v5130_v24  ;;  %v5133_v17 = vpop.f32.mrb[74].mxu1  ;;  %v5842_v22 = vld [vmem:[#allocation2 + $0x20] sm:$0xff] }
 0x354   :  { %v2270_v15 = vadd.f32 %v5071_v3, %v7102_v56  ;;  %v5134_v19 = vpop.f32.mrb[75].mxu1 }
 0x355   :  { %v5135_v46 = vadd.f32 %v5134_v19, %v5133_v17  ;;  %v7148_v57 = vadd.f32 %v5132_v12, %v2267_v34 }
 0x356   :  { %v5072_v44 = vpop.f32.mrb[76].mxu0 }
 0x357   :  { %v5073_v9 = vpop.f32.mrb[77].mxu0  ;;  %v7150_v21 = vadd.f32 %v5135_v46, %v2270_v15 }
 0x358   :  { %v5074_v54 = vadd.f32 %v5073_v9, %v5072_v44  ;;  %v5075_v11 = vpop.f32.mrb[78].mxu0  ;;  %v5843_v44 = vld [vmem:[#allocation2 + $0x10] sm:$0xff] }
 0x359   :  { %v5136_v18 = vpop.f32.mrb[76].mxu1  ;;  %v5076_v55 = vpop.f32.mrb[79].mxu0 }
 0x35a   :  { %v2275_v31 = vadd.f32 %v5074_v54, %v7106_v39  ;;  %v5077_v63 = vadd.f32 %v5076_v55, %v5075_v11  ;;  %v5137_v53 = vpop.f32.mrb[77].mxu1  ;;  %v2513_v54 = vld [vmem:[%s7886_s15 + $0x30] sm:$0xff] }
 0x35b   :  { %v5138_v50 = vadd.f32 %v5137_v53, %v5136_v18  ;;  %v5139_v6 = vpop.f32.mrb[78].mxu1  ;;  %v5844_v18 = vld [vmem:[#allocation2 + $0x28] sm:$0xff]  ;;  %v5845_v53 = vld [vmem:[#allocation2 + $0x18] sm:$0xff] }
 0x35c   :  { %v2278_v56 = vadd.f32 %v5077_v63, %v7108_v16  ;;  %v5140_v45 = vpop.f32.mrb[79].mxu1  ;;  %v2509_v16 = vld [vmem:[%s7886_s15 + $0x10] sm:$0xff] }
 0x35d   :  { %v5141_v43 = vadd.f32 %v5140_v45, %v5139_v6  ;;  %v7154_v2 = vadd.f32 %v5138_v50, %v2275_v31  ;;  %v7206_v45 = vld [vmem:[#allocation2] sm:$0xff] }
 0x35e   :  { %v5534_v27 = vpop.f32.mrb[80].mxu0 }
 0x35f   :  { %v2421_v25 = vadd.f32 %v5534_v27, %v7118_v33  ;;  %v2412_v49 = vpop.f32.mrb[81].mxu0  ;;  %v7157_v41 = vadd.f32 %v5141_v43, %v2278_v56  ;;  %v2507_v33 = vld [vmem:[%s7886_s15] sm:$0xff] }
 0x360   :  { %v2413_v13 = vadd.f32 %v2412_v49, %v7112_v7  ;;  %v5535_v37 = vpop.f32.mrb[82].mxu0  ;;  %v7171_v7 = vld [vmem:[%s7891_s9] ss:$0 sm:$0xff]  ;;  %v2512_v49 = vld [vmem:[%s7886_s15 + $0x28] sm:$0xff] }
 0x361   :  { %v2477_v39 = vmax.f32 %v2421_v25, 0.0  ;;  %v2424_v38 = vadd.f32 %v5535_v37, %v7120_v28  ;;  %v2415_v58 = vpop.f32.mrb[83].mxu0 }
 0x362   :  { %v2475_v47 = vmax.f32 %v2413_v13, 0.0  ;;  %v2416_v26 = vadd.f32 %v2415_v58, %v7114_v23  ;;  %v2508_v23 = vld [vmem:[%s7886_s15 + $0x8] sm:$0xff] }
 0x363   :  { %v2493_v4 = vmin.f32 %v2477_v39, 6.0  ;;  %v2478_v60 = vmax.f32 %v2424_v38, 0.0 }
 0x364   :  { %v2491_v28 = vmin.f32 %v2475_v47, 6.0  ;;  %v2476_v36 = vmax.f32 %v2416_v26, 0.0 }
 0x365   :  { %v2525_v52 = vmul.f32 %v2509_v16, %v2493_v4  ;;  %v2494_v30 = vmin.f32 %v2478_v60, 6.0 }
 0x366   :  { %v2523_v29 = vmul.f32 %v2507_v33, %v2491_v28  ;;  %v2492_v1 = vmin.f32 %v2476_v36, 6.0  ;;  %v5538_v32 = vpop.f32.mrb[84].mxu0  ;;  %v5847_v28 = vld [vmem:[#allocation2 + $0x40] sm:$0xff] }
 0x367   :  { %v2548_v0 = vmul.f32 %v7171_v7, %v2525_v52  ;;  %v2526_v59 = vmul.f32 %v2510_v20, %v2494_v30  ;;  %v2437_v48 = vadd.f32 %v5538_v32, %v7130_v42  ;;  %v2428_v40 = vpop.f32.mrb[85].mxu0 }
 0x368   :  { %v2546_v24 = vmul.f32 %v7171_v7, %v2523_v29  ;;  %v2524_v8 = vmul.f32 %v2508_v23, %v2492_v1  ;;  %v2429_v34 = vadd.f32 %v2428_v40, %v7124_v10  ;;  %v5539_v3 = vpop.f32.mrb[86].mxu0  ;;  %v2594_v29 = vld [vmem:[#allocation2 + $0x7] sm:$0xff]  ;;  %v5848_v1 = vld [vmem:[#allocation2 + $0x30] sm:$0xff] }
 0x369   :  { %v7183_v12 = vadd.f32 %v5842_v22, %v2548_v0  ;;  %v2549_v17 = vmul.f32 %v7171_v7, %v2526_v59  ;;  %v2481_v15 = vmax.f32 %v2437_v48, 0.0  ;;  %v2440_v19 = vadd.f32 %v5539_v3, %v7132_v51  ;;  %v2431_v46 = vpop.f32.mrb[87].mxu0  ;;  %v2511_v51 = vld [vmem:[%s7886_s15 + $0x20] sm:$0xff]  ;;  %v5849_v40 = vld [vmem:[#allocation2 + $0x48] sm:$0xff] }
 0x36a   :  { %v7187_v9 = vadd.f32 %v5843_v44, %v2546_v24  ;;  %v2547_v42 = vmul.f32 %v7171_v7, %v2524_v8  ;;  %v2479_v10 = vmax.f32 %v2429_v34, 0.0  ;;  %v2432_v11 = vadd.f32 %v2431_v46, %v7126_v14  ;;  %v2514_v14 = vld [vmem:[%s7886_s15 + $0x38] sm:$0xff]  ;;  %v2515_v59 = vld [vmem:[%s7886_s15 + $0x40] sm:$0xff]  ;;  %v2516_v3 = vld [vmem:[%s7886_s15 + $0x48] sm:$0xff] }
 0x36b   :  { %2580 = vst [vmem:[#allocation2 + $0x20] sm:$0xff] %v7183_v12  ;;  %v7195_v55 = vadd.f32 %v5844_v18, %v2549_v17  ;;  %v2497_v31 = vmin.f32 %v2481_v15, 6.0  ;;  %v2482_v63 = vmax.f32 %v2440_v19, 0.0  ;;  %v5777_v17 = vld [vmem:[%s7884_s7 + $0x340] sm:$0xff]   ;;  %v5850_v15 = vld [vmem:[#allocation2 + $0x38] sm:$0xff] }
 0x36c   :  { %2578 = vst [vmem:[#allocation2 + $0x10] sm:$0xff] %v7187_v9  ;;  %v7201_v50 = vadd.f32 %v5845_v53, %v2547_v42  ;;  %v2495_v6 = vmin.f32 %v2479_v10, 6.0  ;;  %v2480_v56 = vmax.f32 %v2432_v11, 0.0  ;;  %v2642_v43 = vpack.c.bf16 %v7187_v9, %v7206_v45  ;;  %v5778_v10 = vld [vmem:[%s7884_s7 + $0x388] sm:$0xff]  }
 0x36d   :  { %2581 = vst [vmem:[#allocation2 + $0x28] sm:$0xff] %v7195_v55  ;;  %v2529_v27 = vmul.f32 %v2513_v54, %v2497_v31  ;;  %v2498_v25 = vmin.f32 %v2482_v63, 6.0 }
 0x36e   :  { %2579 = vst [vmem:[#allocation2 + $0x18] sm:$0xff] %v7201_v50  ;;  %v2527_v13 = vmul.f32 %v2511_v51, %v2495_v6  ;;  %v2496_v37 = vmin.f32 %v2480_v56, 6.0  ;;  %v5542_v39 = vpop.f32.mrb[88].mxu0  ;;  %3571 = vmatprep.mubr.bf16.mxu1 %v2642_v43  ;;  %v7256_v31 = vpack.c.bf16 %v7183_v12, %v7201_v50 }
 0x36f   :  { %v2552_v38 = vmul.f32 %v7171_v7, %v2529_v27  ;;  %v2530_v58 = vmul.f32 %v2514_v14, %v2498_v25  ;;  %v2453_v16 = vadd.f32 %v5542_v39, %v7142_v62  ;;  %v2444_v47 = vpop.f32.mrb[89].mxu0  ;;  %v5785_v25 = vld [vmem:[%s7884_s7 + $0x3c0] sm:$0xff]  }
 0x370   :  { %v2550_v26 = vmul.f32 %v7171_v7, %v2527_v13  ;;  %v2528_v4 = vmul.f32 %v2512_v49, %v2496_v37  ;;  %v2445_v33 = vadd.f32 %v2444_v47, %v7136_v61  ;;  %v5543_v60 = vpop.f32.mrb[90].mxu0  ;;  %v2517_v61 = vld [vmem:[%s7886_s15 + $0x50] sm:$0xff] }
 0x371   :  { %v7219_v20 = vadd.f32 %v5847_v28, %v2552_v38  ;;  %v2553_v36 = vmul.f32 %v7171_v7, %v2530_v58  ;;  %v2485_v52 = vmax.f32 %v2453_v16, 0.0  ;;  %v2456_v30 = vadd.f32 %v5543_v60, %v7144_v5  ;;  %v2447_v23 = vpop.f32.mrb[91].mxu0  ;;  %v2518_v5 = vld [vmem:[%s7886_s15 + $0x58] sm:$0xff]  ;;  %v5779_v38 = vld [vmem:[%s7884_s7 + $0x348] sm:$0xff]   ;;  %v5851_v60 = vld [vmem:[#allocation2 + $0x60] sm:$0xff] }
 0x372   :  { %v7223_v32 = vadd.f32 %v5848_v1, %v2550_v26  ;;  %v2551_v62 = vmul.f32 %v7171_v7, %v2528_v4  ;;  %v2483_v0 = vmax.f32 %v2445_v33, 0.0  ;;  %v2448_v48 = vadd.f32 %v2447_v23, %v7138_v35  ;;  %v5788_v58 = vld [vmem:[%s7884_s7 + $0x408] sm:$0xff]   ;;  %v5780_v33 = vld [vmem:[%s7884_s7 + $0x390] sm:$0xff]  }
 0x373   :  { %2584 = vst [vmem:[#allocation2 + $0x40] sm:$0xff] %v7219_v20  ;;  %v7237_v24 = vadd.f32 %v5849_v40, %v2553_v36  ;;  %v2501_v8 = vmin.f32 %v2485_v52, 6.0  ;;  %v2486_v34 = vmax.f32 %v2456_v30, 0.0  ;;  %v2595_v22 = vld [vmem:[#allocation2 + $0xf] sm:$0xff]  ;;  %v2519_v40 = vld [vmem:[%s7886_s15 + $0x60] sm:$0xff] }
 0x374   :  { %2582 = vst [vmem:[#allocation2 + $0x30] sm:$0xff] %v7223_v32  ;;  %v7246_v35 = vadd.f32 %v5850_v15, %v2551_v62  ;;  %v2499_v19 = vmin.f32 %v2483_v0, 6.0  ;;  %v2484_v46 = vmax.f32 %v2448_v48, 0.0  ;;  %v2610_v44 = vpack.c.bf16 %v2595_v22, %v2594_v29  ;;  %v2658_v42 = vld [vmem:[#allocation2 + $0x9] sm:$0xff] }
 0x375   :  { %v7248_v54 = vld [vmem:[#allocation2 + $0x27] sm:$0xff]  ;;  %2585 = vst [vmem:[#allocation2 + $0x48] sm:$0xff] %v7237_v24  ;;  %v2533_v11 = vmul.f32 %v2517_v61, %v2501_v8  ;;  %v2502_v18 = vmin.f32 %v2486_v34, 6.0  ;;  %v2691_v51 = vld [vmem:[#allocation2 + $0x17] sm:$0xff]  ;;  %v2692_v53 = vld [vmem:[#allocation2 + $0x1f] sm:$0xff] }
 0x376   :  { %v7258_v63 = vld [vmem:[#allocation2 + $0x11] sm:$0xff]  ;;  %2583 = vst [vmem:[#allocation2 + $0x38] sm:$0xff] %v7246_v35  ;;  %v2531_v6 = vmul.f32 %v2515_v59, %v2499_v19  ;;  %v2500_v14 = vmin.f32 %v2484_v46, 6.0  ;;  %v5546_v56 = vpop.f32.mrb[92].mxu0  ;;  %3572 = vmatmul.mubr.bf16.vlgmr.msra.gmra.mrb[80].mxu1 %v2610_v44  ;;  %v2706_v43 = vpack.c.bf16 %v2691_v51, %v2595_v22  ;;  %v5853_v59 = vld [vmem:[#allocation2 + $0x68] sm:$0xff]  ;;  %v7309_v19 = vpack.c.bf16 %v2692_v53, %v2691_v51  ;;  %v7311_v46 = vld [vmem:[#allocation2 + $0x19] sm:$0xff] }
 0x377   :  { %v2674_v27 = vpack.c.bf16 %v7258_v63, %v2658_v42  ;;  %v2556_v49 = vmul.f32 %v7171_v7, %v2533_v11  ;;  %v2534_v13 = vmul.f32 %v2518_v5, %v2502_v18  ;;  %v2469_v37 = vadd.f32 %v5546_v56, %v7154_v2  ;;  %v2460_v39 = vpop.f32.mrb[93].mxu0  ;;  %3579 = vmatprep.mubr.bf16.mxu1 %v7256_v31  ;;  %v2521_v62 = vld [vmem:[%s7886_s15 + $0x70] sm:$0xff]  ;;  %v7313_v44 = vld [vmem:[#allocation2 + $0x21] sm:$0xff]  ;;  %v5782_v42 = vld [vmem:[%s7884_s7 + $0x398] sm:$0xff]  }
 0x378   :  { %5287 = vmatpush3.bf16.msra.mxu1 %v5777_v17  ;;  %v2554_v16 = vmul.f32 %v7171_v7, %v2531_v6  ;;  %v2532_v47 = vmul.f32 %v2516_v3, %v2500_v14  ;;  %v2461_v26 = vadd.f32 %v2460_v39, %v7148_v57  ;;  %v5547_v4 = vpop.f32.mrb[94].mxu0  ;;  %3668 = vmatprep.mubr.bf16.mxu0 %v2706_v43  ;;  %v5852_v57 = vld [vmem:[#allocation2 + $0x50] sm:$0xff]  ;;  %v5854_v3 = vld [vmem:[#allocation2 + $0x58] sm:$0xff]  ;;  %v2520_v18 = vld [vmem:[%s7886_s15 + $0x68] sm:$0xff] }
 0x379   :  { %v2707_v2 = vpack.c.bf16 %v7248_v54, %v2692_v53  ;;  %v7280_v28 = vadd.f32 %v5851_v60, %v2556_v49  ;;  %v2557_v36 = vmul.f32 %v7171_v7, %v2534_v13  ;;  %v2489_v52 = vmax.f32 %v2469_v37, 0.0  ;;  %v2463_v23 = vpop.f32.mrb[95].mxu0  ;;  %3669 = vmatmul.mubr.bf16.vlgmr.msra.gmra.mrb[96].mxu0 %v2674_v27  ;;  %5288 = vmatprep.subr.bf16.mxu1 %v5778_v10  ;;  %v5781_v34 = vld [vmem:[%s7884_s7 + $0x350] sm:$0xff]   ;;  %v5783_v13 = vld [vmem:[%s7884_s7 + $0x358] sm:$0xff]  }
 0x37a   :  { %v2472_v30 = vadd.f32 %v5547_v4, %v7157_v41  ;;  %v7284_v29 = vadd.f32 %v5852_v57, %v2554_v16  ;;  %v2555_v1 = vmul.f32 %v7171_v7, %v2532_v47  ;;  %v2487_v61 = vmax.f32 %v2461_v26, 0.0  ;;  %5351 = vmatpush3.bf16.msra.mxu0 %v5785_v25  ;;  %v5789_v41 = vld [vmem:[%s7884_s7 + $0x3c8] sm:$0xff]   ;;  %v5792_v56 = vld [vmem:[%s7884_s7 + $0x410] sm:$0xff]   ;;  %v5786_v16 = vld [vmem:[%s7884_s7 + $0x3a0] sm:$0xff]  }
 0x37b   :  { %v2464_v0 = vadd.f32 %v2463_v23, %v7150_v21  ;;  %3676 = vmatprep.mubr.bf16.mxu0 %v2707_v2  ;;  %2588 = vst [vmem:[#allocation2 + $0x60] sm:$0xff] %v7280_v28  ;;  %v7295_v5 = vadd.f32 %v5853_v59, %v2557_v36  ;;  %v2505_v48 = vmin.f32 %v2489_v52, 6.0  ;;  %v2522_v21 = vld [vmem:[%s7886_s15 + $0x78] sm:$0xff]  ;;  %5352 = vmatprep.subr.bf16.mxu0 %v5788_v58  ;;  %v2694_v49 = vld [vmem:[#allocation2 + $0x2f] sm:$0xff]  ;;  %v5855_v26 = vld [vmem:[#allocation2 + $0x80] sm:$0xff] }
 0x37c   :  { %v2490_v8 = vmax.f32 %v2472_v30, 0.0  ;;  %5289 = vmatpush3.bf16.msra.mxu1 %v5779_v38  ;;  %2586 = vst [vmem:[#allocation2 + $0x50] sm:$0xff] %v7284_v29  ;;  %v7307_v22 = vadd.f32 %v5854_v3, %v2555_v1  ;;  %v2503_v17 = vmin.f32 %v2487_v61, 6.0  ;;  %v7324_v51 = vpack.c.bf16 %v7223_v32, %v7195_v55  ;;  %v5793_v37 = vld [vmem:[%s7884_s7 + $0x3d0] sm:$0xff]   ;;  %v5794_v47 = vld [vmem:[%s7884_s7 + $0x418] sm:$0xff]   ;;  %v5857_v52 = vld [vmem:[#allocation2 + $0x88] sm:$0xff] }
 0x37d   :  { %v2488_v15 = vmax.f32 %v2464_v0, 0.0  ;;  %5290 = vmatprep.subr.bf16.mxu1 %v5780_v33  ;;  %2589 = vst [vmem:[#allocation2 + $0x68] sm:$0xff] %v7295_v5  ;;  %v2537_v10 = vmul.f32 %v2521_v62, %v2505_v48  ;;  %v7326_v53 = vld [vmem:[#allocation2 + $0x37] sm:$0xff]  ;;  %v7337_v25 = vpack.c.bf16 %v7313_v44, %v7311_v46  ;;  %v5787_v23 = vld [vmem:[%s7884_s7 + $0x360] sm:$0xff]   ;;  %v5790_v61 = vld [vmem:[%s7884_s7 + $0x3a8] sm:$0xff]  }
 0x37e   :  { %v2506_v11 = vmin.f32 %v2490_v8, 6.0  ;;  %2587 = vst [vmem:[#allocation2 + $0x58] sm:$0xff] %v7307_v22  ;;  %v2535_v6 = vmul.f32 %v2519_v40, %v2503_v17  ;;  %3580 = vmatmul.mubr.bf16.gmra.mrb[84].mxu1 %v7309_v19  ;;  %5353 = vmatpush3.bf16.msra.mxu0 %v5789_v41  ;;  %v2708_v58 = vpack.c.bf16 %v7326_v53, %v2694_v49  ;;  %v5856_v33 = vld [vmem:[#allocation2 + $0x70] sm:$0xff]  ;;  %v5858_v57 = vld [vmem:[#allocation2 + $0x78] sm:$0xff]  ;;  %v2697_v59 = vld [vmem:[#allocation2 + $0x47] sm:$0xff] }
 0x37f   :  { %v2504_v14 = vmin.f32 %v2488_v15, 6.0  ;;  %v2560_v43 = vmul.f32 %v7171_v7, %v2537_v10  ;;  %3587 = vmatprep.mubr.bf16.mxu1 %v7324_v51  ;;  %5354 = vmatprep.subr.bf16.mxu0 %v5792_v56  ;;  %v7372_v62 = vld [vmem:[#allocation2 + $0x31] sm:$0xff]  ;;  %v7383_v41 = vpack.c.bf16 %v7219_v20, %v7246_v35  ;;  %v5798_v48 = vld [vmem:[%s7884_s7 + $0x420] sm:$0xff]   ;;  %v7390_v40 = vld [vmem:[#allocation2 + $0x29] sm:$0xff]  ;;  %v7428_v56 = vpack.c.bf16 %v7284_v29, %v7237_v24 }
 0x380   :  { %v2538_v27 = vmul.f32 %v2522_v21, %v2506_v11  ;;  %5291 = vmatpush3.bf16.msra.mxu1 %v5781_v34  ;;  %v2558_v39 = vmul.f32 %v7171_v7, %v2535_v6  ;;  %v5795_v0 = vld [vmem:[%s7884_s7 + $0x3d8] sm:$0xff]   ;;  %v7395_v8 = vpack.c.bf16 %v7372_v62, %v7390_v40  ;;  %v5791_v21 = vld [vmem:[%s7884_s7 + $0x368] sm:$0xff]   ;;  %v5796_v3 = vld [vmem:[%s7884_s7 + $0x3b0] sm:$0xff]  }
 0x381   :  { %v2536_v38 = vmul.f32 %v2520_v18, %v2504_v14  ;;  %5292 = vmatprep.subr.bf16.mxu1 %v5782_v42  ;;  %v7353_v4 = vadd.f32 %v5855_v26, %v2560_v43  ;;  %3677 = vmatmul.mubr.bf16.gmra.mrb[100].mxu0 %v7337_v25  ;;  %v5799_v17 = vld [vmem:[%s7884_s7 + $0x3e0] sm:$0xff]   ;;  %v5800_v15 = vld [vmem:[%s7884_s7 + $0x428] sm:$0xff]   ;;  %v5797_v42 = vld [vmem:[%s7884_s7 + $0x370] sm:$0xff]  }
 0x382   :  { %v2561_v2 = vmul.f32 %v7171_v7, %v2538_v27  ;;  %v7357_v60 = vadd.f32 %v5856_v33, %v2558_v39  ;;  %3684 = vmatprep.mubr.bf16.mxu0 %v2708_v58  ;;  %5355 = vmatpush3.bf16.msra.mxu0 %v5793_v37  ;;  %v5801_v10 = vld [vmem:[%s7884_s7 + $0x3e8] sm:$0xff]   ;;  %v7419_v18 = vld [vmem:[#allocation2 + $0x39] sm:$0xff]  ;;  %v5805_v39 = vld [vmem:[%s7884_s7 + $0x3f0] sm:$0xff]  }
 0x383   :  { %v2559_v36 = vmul.f32 %v7171_v7, %v2536_v38  ;;  %2592 = vst [vmem:[#allocation2 + $0x80] sm:$0xff] %v7353_v4  ;;  %v7370_v7 = vpack.c.bf16 %v2694_v49, %v7248_v54  ;;  %5356 = vmatprep.subr.bf16.mxu0 %v5794_v47  ;;  %v2696_v54 = vld [vmem:[#allocation2 + $0x3f] sm:$0xff]  ;;  %v2698_v49 = vld [vmem:[#allocation2 + $0x4f] sm:$0xff] }
 0x384   :  { %v7361_v30 = vadd.f32 %v5857_v52, %v2561_v2  ;;  %5293 = vmatpush3.bf16.msra.mxu1 %v5783_v13  ;;  %2590 = vst [vmem:[#allocation2 + $0x70] sm:$0xff] %v7357_v60  ;;  %v2709_v34 = vpack.c.bf16 %v2697_v59, %v2696_v54  ;;  %v7417_v11 = vpack.c.bf16 %v2696_v54, %v7326_v53  ;;  %v7421_v6 = vld [vmem:[#allocation2 + $0x41] sm:$0xff]  ;;  %v5802_v14 = vld [vmem:[%s7884_s7 + $0x3b8] sm:$0xff]   ;;  %v5804_v53 = vld [vmem:[%s7884_s7 + $0x430] sm:$0xff]  }
 0x385   :  { %v7367_v1 = vadd.f32 %v5858_v57, %v2559_v36  ;;  %5294 = vmatprep.subr.bf16.mxu1 %v5786_v16  ;;  %v2699_v43 = vld [vmem:[#allocation2 + $0x57] sm:$0xff]  ;;  %v7437_v27 = vpack.c.bf16 %v7421_v6, %v7419_v18  ;;  %v5808_v38 = vld [vmem:[%s7884_s7 + $0x440] sm:$0xff]   ;;  %v7452_v16 = vpack.c.bf16 %v2698_v49, %v2697_v59  ;;  %v7461_v2 = vpack.c.bf16 %v7280_v28, %v7307_v22  ;;  %v7464_v52 = vld [vmem:[#allocation2 + $0x49] sm:$0xff] }
 0x386   :  { %2593 = vst [vmem:[#allocation2 + $0x88] sm:$0xff] %v7361_v30  ;;  %3588 = vmatmul.mubr.bf16.gmra.mrb[88].mxu1 %v7370_v7  ;;  %5357 = vmatpush3.bf16.msra.mxu0 %v5795_v0  ;;  %v5803_v13 = vld [vmem:[%s7884_s7 + $0x378] sm:$0xff]   ;;  %v2710_v37 = vpack.c.bf16 %v2699_v43, %v2698_v49  ;;  %v2701_v36 = vld [vmem:[#allocation2 + $0x67] sm:$0xff]  ;;  %v7480_v59 = vpack.c.bf16 %v7357_v60, %v7295_v5 }
 0x387   :  { %2591 = vst [vmem:[#allocation2 + $0x78] sm:$0xff] %v7367_v1  ;;  %3595 = vmatprep.mubr.bf16.mxu1 %v7383_v41  ;;  %5358 = vmatprep.subr.bf16.mxu0 %v5798_v48  ;;  %v5806_v58 = vld [vmem:[%s7884_s7 + $0x438] sm:$0xff]   ;;  %v7476_v54 = vld [vmem:[#allocation2 + $0x61] sm:$0xff] }
 0x388   :  { %5295 = vmatpush3.bf16.msra.mxu1 %v5787_v23  ;;  %v7454_v47 = vld [vmem:[#allocation2 + $0x51] sm:$0xff]  ;;  %v2700_v33 = vld [vmem:[#allocation2 + $0x5f] sm:$0xff] }
 0x389   :  { %5296 = vmatprep.subr.bf16.mxu1 %v5790_v61  ;;  %3685 = vmatmul.mubr.bf16.gmra.mrb[104].mxu0 %v7395_v8  ;;  %v5807_v26 = vld [vmem:[%s7884_s7 + $0x3f8] sm:$0xff]   ;;  %v7469_v23 = vpack.c.bf16 %v7454_v47, %v7464_v52  ;;  %v2711_v57 = vpack.c.bf16 %v2701_v36, %v2700_v33  ;;  %v7472_v61 = vpack.c.bf16 %v2700_v33, %v2699_v43 }
 0x38a   :  { %3692 = vmatprep.mubr.bf16.mxu0 %v2709_v34  ;;  %5359 = vmatpush3.bf16.msra.mxu0 %v5799_v17  ;;  %v7474_v0 = vld [vmem:[#allocation2 + $0x59] sm:$0xff]  ;;  %v2738_v33 = vpack.c.bf16 %v7201_v50, %v7187_v9  ;;  %v2739_v9 = vpack.c.bf16 %v7195_v55, %v7183_v12  ;;  %v2740_v12 = vpack.c.bf16 %v7246_v35, %v7223_v32  ;;  %v5813_v55 = vld [vmem:[%s7884_s7 + $0x468] sm:$0xff]  }
 0x38b   :  { %5360 = vmatprep.subr.bf16.mxu0 %v5800_v15  ;;  %v2702_v34 = vld [vmem:[#allocation2 + $0x6f] sm:$0xff]  ;;  %v5811_v50 = vld [vmem:[%s7884_s7 + $0x458] sm:$0xff]   ;;  %v2741_v32 = vpack.c.bf16 %v7237_v24, %v7219_v20  ;;  %v2742_v20 = vpack.c.bf16 %v7307_v22, %v7284_v29  ;;  %v2744_v22 = vpack.c.bf16 %v7367_v1, %v7357_v60 }
 0x38c   :  { %5297 = vmatpush3.bf16.msra.mxu1 %v5791_v21  ;;  %v7486_v21 = vpack.c.bf16 %v7476_v54, %v7474_v0  ;;  %v7489_v17 = vpack.c.bf16 %v2702_v34, %v2701_v36  ;;  %v7500_v43 = vld [vmem:[#allocation2 + $0x69] sm:$0xff]  ;;  %v5815_v35 = vld [vmem:[%s7884_s7 + $0x478] sm:$0xff]  }
 0x38d   :  { %5298 = vmatprep.subr.bf16.mxu1 %v5796_v3  ;;  %v5809_v36 = vld [vmem:[%s7884_s7 + $0x448] sm:$0xff]   ;;  %v2775_v24 = vpack.c.bf16 %v7500_v43, %v7476_v54 }
 0x38e   :  { %3596 = vmatmul.mubr.bf16.gmra.mrb[92].mxu1 %v7417_v11  ;;  %5361 = vmatpush3.bf16.msra.mxu0 %v5801_v10  ;;  %v2703_v48 = vld [vmem:[#allocation2 + $0x77] sm:$0xff]  ;;  %v2704_v10 = vld [vmem:[#allocation2 + $0x7f] sm:$0xff]  ;;  %v2769_v29 = vld [vmem:[#allocation2 + $0x89] sm:$0xff] }
 0x38f   :  { %3603 = vmatprep.mubr.bf16.mxu1 %v7428_v56  ;;  %5362 = vmatprep.subr.bf16.mxu0 %v5804_v53  ;;  %v2712_v3 = vpack.c.bf16 %v2703_v48, %v2702_v34  ;;  %v7491_v15 = vld [vmem:[#allocation2 + $0x71] sm:$0xff] }
 0x390   :  { %5299 = vmatpush3.bf16.msra.mxu1 %v5797_v42  ;;  %v7495_v42 = vpack.c.bf16 %v7353_v4, %v7367_v1  ;;  %v7505_v53 = vpack.c.bf16 %v7491_v15, %v7500_v43  ;;  %v5818_v1 = vld [vmem:[%s7892_s10 + $0x10] sm:$0xff]  }
 0x391   :  { %5300 = vmatprep.subr.bf16.mxu1 %v5802_v14  ;;  %3693 = vmatmul.mubr.bf16.gmra.mrb[108].mxu0 %v7437_v27  ;;  %v7497_v14 = vld [vmem:[#allocation2 + $0x87] sm:$0xff] }
 0x392   :  { %3700 = vmatprep.mubr.bf16.mxu0 %v2710_v37  ;;  %5363 = vmatpush3.bf16.msra.mxu0 %v5805_v39  ;;  %v2713_v49 = vpack.c.bf16 %v7497_v14, %v2704_v10  ;;  %v7511_v37 = vld [vmem:[#allocation2 + $0x79] sm:$0xff]  ;;  %v7513_v39 = vld [vmem:[#allocation2 + $0x81] sm:$0xff] }
 0x393   :  { %5364 = vmatprep.subr.bf16.mxu0 %v5806_v58  ;;  %v2770_v58 = vpack.c.bf16 %v7311_v46, %v7258_v63  ;;  %v2771_v63 = vpack.c.bf16 %v7390_v40, %v7313_v44  ;;  %v5810_v46 = vld [vmem:[%s7884_s7 + $0x450] sm:$0xff]   ;;  %v2773_v44 = vpack.c.bf16 %v7464_v52, %v7421_v6  ;;  %v2777_v40 = vpack.c.bf16 %v2769_v29, %v7513_v39  ;;  %v5820_v6 = vld [vmem:[%s7892_s10 + $0x20] sm:$0xff]  }
 0x394   :  { %5301 = vmatpush3.bf16.msra.mxu1 %v5803_v13  ;;  %v7509_v13 = vpack.c.bf16 %v2704_v10, %v2703_v48 }
 0x395   :  { %5548 = vmatprep.subr.bf16.mxu1 %v5808_v38 }
 0x396   :  { %3604 = vmatmul.mubr.bf16.gmra.mrb[96].mxu1 %v7452_v16  ;;  %5365 = vmatpush3.bf16.msra.mxu0 %v5807_v26  ;;  %v7520_v26 = vpack.c.bf16 %v7513_v39, %v7511_v37 }
 0x397   :  { %3611 = vmatprep.mubr.bf16.mxu1 %v7461_v2 }
 0x399   :  { %3701 = vmatmul.mubr.bf16.gmra.mrb[112].mxu0 %v7469_v23 }
 0x39a   :  { %3708 = vmatprep.mubr.bf16.mxu0 %v2711_v57 }
 0x39e   :  { %3612 = vmatmul.mubr.bf16.gmra.mrb[100].mxu1 %v7472_v61 }
 0x39f   :  { %3619 = vmatprep.mubr.bf16.mxu1 %v7480_v59 }
 0x3a1   :  { %3709 = vmatmul.mubr.bf16.gmra.mrb[116].mxu0 %v7486_v21 }
 0x3a2   :  { %3716 = vmatprep.mubr.bf16.mxu0 %v2712_v3 }
 0x3a6   :  { %3620 = vmatmul.mubr.bf16.gmra.mrb[104].mxu1 %v7489_v17 }
 0x3a7   :  { %3627 = vmatprep.mubr.bf16.mxu1 %v7495_v42 }
 0x3a9   :  { %3717 = vmatmul.mubr.bf16.gmra.mrb[120].mxu0 %v7505_v53 }
 0x3aa   :  { %3724 = vmatprep.mubr.bf16.mxu0 %v2713_v49 }
 0x3ae   :  { %3628 = vmatmul.mubr.bf16.gmra.mrb[108].mxu1 %v7509_v13 }
 0x3af   :  { %3765 = vmatprep.mubr.bf16.mxu1 %v2770_v58 }
 0x3b1   :  { %3725 = vmatmul.mubr.bf16.gmra.mrb[124].mxu0 %v7520_v26 }
 0x3b2   :  { %3862 = vmatprep.mubr.bf16.mxu0 %v7256_v31  ;;  %v2772_v31 = vpack.c.bf16 %v7419_v18, %v7372_v62  ;;  %v2743_v62 = vpack.c.bf16 %v7295_v5, %v7280_v28  ;;  %v2841_v28 = vpack.c.bf16 %v7206_v45, %v7361_v30  ;;  %v2745_v5 = vpack.c.bf16 %v7361_v30, %v7353_v4  ;;  %v2865_v4 = vld [vmem:[#allocation2 + $0x91] sm:$0xff]  ;;  %v5817_v30 = vld [vmem:[%s7892_s10 + $0x8] sm:$0xff]  }
 0x3b3   :  { %v2873_v60 = vpack.c.bf16 %v2865_v4, %v2769_v29 }
 0x3b6   :  { %3766 = vmatmul.mubr.bf16.vlgmr.msra.gmra.mrb[112].mxu1 %v2738_v33 }
 0x3b7   :  { %3773 = vmatprep.mubr.bf16.mxu1 %v2771_v63  ;;  %5549 = vmatpush3.bf16.msra.mxu1 %v5808_v38  ;;  %v7619_v38 = vld [vmem:[%s7890_s8 + $0x1] ss:$0 sm:$0xff] }
 0x3b8   :  { %5550 = vmatprep.subr.bf16.mxu1 %v5809_v36 }
 0x3b9   :  { %3863 = vmatmul.mubr.bf16.vlgmr.msra.gmra.mrb[128].mxu0 %v7309_v19  ;;  %v5812_v19 = vld [vmem:[%s7884_s7 + $0x460] sm:$0xff]  }
 0x3ba   :  { %3870 = vmatprep.mubr.bf16.mxu0 %v7324_v51  ;;  %v5814_v51 = vld [vmem:[%s7884_s7 + $0x470] sm:$0xff]  }
 0x3bb   :  { %5551 = vmatpush3.bf16.msra.mxu1 %v5809_v36 }
 0x3bc   :  { %5552 = vmatprep.subr.bf16.mxu1 %v5810_v46 }
 0x3be   :  { %3774 = vmatmul.mubr.bf16.gmra.mrb[116].mxu1 %v2739_v9 }
 0x3bf   :  { %3781 = vmatprep.mubr.bf16.mxu1 %v2772_v31  ;;  %5553 = vmatpush3.bf16.msra.mxu1 %v5810_v46  ;;  %v5822_v46 = vld [vmem:[%s7892_s10 + $0x30] sm:$0xff]  }
 0x3c0   :  { %5554 = vmatprep.subr.bf16.mxu1 %v5811_v50 }
 0x3c1   :  { %3871 = vmatmul.mubr.bf16.gmra.mrb[132].mxu0 %v7370_v7  ;;  %v2774_v7 = vpack.c.bf16 %v7474_v0, %v7454_v47 }
 0x3c2   :  { %3878 = vmatprep.mubr.bf16.mxu0 %v7383_v41  ;;  %v2776_v41 = vpack.c.bf16 %v7511_v37, %v7491_v15 }
 0x3c3   :  { %5555 = vmatpush3.bf16.msra.mxu1 %v5811_v50 }
 0x3c4   :  { %5556 = vmatprep.subr.bf16.mxu1 %v5812_v19 }
 0x3c6   :  { %3782 = vmatmul.mubr.bf16.gmra.mrb[120].mxu1 %v2740_v12 }
 0x3c7   :  { %3789 = vmatprep.mubr.bf16.mxu1 %v2773_v44  ;;  %5557 = vmatpush3.bf16.msra.mxu1 %v5812_v19 }
 0x3c8   :  { %5558 = vmatprep.subr.bf16.mxu1 %v5813_v55 }
 0x3c9   :  { %3879 = vmatmul.mubr.bf16.gmra.mrb[136].mxu0 %v7417_v11  ;;  %v2801_v11 = vld [vmem:[#allocation2 + $0x8f] sm:$0xff] }
 0x3ca   :  { %3886 = vmatprep.mubr.bf16.mxu0 %v7428_v56  ;;  %v2809_v18 = vpack.c.bf16 %v2801_v11, %v7497_v14  ;;  %v5821_v56 = vld [vmem:[%s7892_s10 + $0x28] sm:$0xff]  }
 0x3cb   :  { %5559 = vmatpush3.bf16.msra.mxu1 %v5813_v55 }
 0x3cc   :  { %5560 = vmatprep.subr.bf16.mxu1 %v5814_v51 }
 0x3ce   :  { %3790 = vmatmul.mubr.bf16.gmra.mrb[124].mxu1 %v2741_v32 }
 0x3cf   :  { %3797 = vmatprep.mubr.bf16.mxu1 %v2774_v7  ;;  %5561 = vmatpush3.bf16.msra.mxu1 %v5814_v51  ;;  %v5823_v7 = vld [vmem:[%s7892_s10 + $0x38] sm:$0xff]  }
 0x3d0   :  { %5562 = vmatprep.subr.bf16.mxu1 %v5815_v35 }
 0x3d1   :  { %3887 = vmatmul.mubr.bf16.gmra.mrb[140].mxu0 %v7452_v16 }
 0x3d2   :  { %3894 = vmatprep.mubr.bf16.mxu0 %v7461_v2 }
 0x3d3   :  { %5563 = vmatpush3.bf16.msra.mxu1 %v5815_v35 }
 0x3d4   :  { %5612 = vmatprep.subr.bf16.mxu1 %v7206_v45 }
 0x3d6   :  { %3798 = vmatmul.mubr.bf16.gmra.mrb[128].mxu1 %v2742_v20 }
 0x3d7   :  { %3805 = vmatprep.mubr.bf16.mxu1 %v2775_v24 }
 0x3d9   :  { %3895 = vmatmul.mubr.bf16.gmra.mrb[144].mxu0 %v7472_v61 }
 0x3da   :  { %3902 = vmatprep.mubr.bf16.mxu0 %v7480_v59 }
 0x3de   :  { %3806 = vmatmul.mubr.bf16.gmra.mrb[132].mxu1 %v2743_v62 }
 0x3df   :  { %3813 = vmatprep.mubr.bf16.mxu1 %v2776_v41 }
 0x3e1   :  { %3903 = vmatmul.mubr.bf16.gmra.mrb[148].mxu0 %v7489_v17 }
 0x3e2   :  { %3910 = vmatprep.mubr.bf16.mxu0 %v7495_v42 }
 0x3e6   :  { %3814 = vmatmul.mubr.bf16.gmra.mrb[136].mxu1 %v2744_v22 }
 0x3e7   :  { %3821 = vmatprep.mubr.bf16.mxu1 %v2777_v40 }
 0x3e9   :  { %3911 = vmatmul.mubr.bf16.gmra.mrb[152].mxu0 %v7509_v13 }
 0x3ea   :  { %3918 = vmatprep.mubr.bf16.mxu0 %v2841_v28 }
 0x3ee   :  { %3822 = vmatmul.mubr.bf16.gmra.mrb[140].mxu1 %v2745_v5 }
 0x3ef   :  { %5564 = vmatprep.mubr.bf16.mxu1 %v7337_v25  ;;  %v5816_v25 = vld [vmem:[%s7892_s10] sm:$0xff]  }
 0x3f0   :  { %5580 = vmatprep.subr.bf16.mxu0 %v5816_v25 }
 0x3f1   :  { %3919 = vmatmul.mubr.bf16.gmra.mrb[156].mxu0 %v2809_v18 }
 0x3f2   :  { %5581 = vmatpush3.bf16.msra.mxu0 %v5816_v25 }
 0x3f3   :  { %5582 = vmatprep.subr.bf16.mxu0 %v5817_v30 }
 0x3f6   :  { %5565 = vmatmul.mubr.bf16.vlgmr.msra.gmra.mrb[144].mxu1 %v7395_v8  ;;  %5583 = vmatpush3.bf16.msra.mxu0 %v5817_v30  ;;  %v5819_v8 = vld [vmem:[%s7892_s10 + $0x18] sm:$0xff]  }
 0x3f7   :  { %5568 = vmatprep.mubr.bf16.mxu1 %v7437_v27  ;;  %5584 = vmatprep.subr.bf16.mxu0 %v5818_v1 }
 0x3fa   :  { %5585 = vmatpush3.bf16.msra.mxu0 %v5818_v1 }
 0x3fb   :  { %5586 = vmatprep.subr.bf16.mxu0 %v5819_v8 }
 0x3fe   :  { %5569 = vmatmul.mubr.bf16.gmra.mrb[148].mxu1 %v7469_v23  ;;  %5587 = vmatpush3.bf16.msra.mxu0 %v5819_v8 }
 0x3ff   :  { %5572 = vmatprep.mubr.bf16.mxu1 %v7486_v21  ;;  %5588 = vmatprep.subr.bf16.mxu0 %v5820_v6 }
 0x402   :  { %5589 = vmatpush3.bf16.msra.mxu0 %v5820_v6 }
 0x403   :  { %5590 = vmatprep.subr.bf16.mxu0 %v5821_v56 }
 0x406   :  { %5573 = vmatmul.mubr.bf16.gmra.mrb[152].mxu1 %v7505_v53  ;;  %5591 = vmatpush3.bf16.msra.mxu0 %v5821_v56 }
 0x407   :  { %5576 = vmatprep.mubr.bf16.mxu1 %v7520_v26  ;;  %5592 = vmatprep.subr.bf16.mxu0 %v5822_v46 }
 0x40a   :  { %5593 = vmatpush3.bf16.msra.mxu0 %v5822_v46 }
 0x40b   :  { %5594 = vmatprep.subr.bf16.mxu0 %v5823_v7 }
 0x40e   :  { %5577 = vmatmul.mubr.bf16.gmra.mrb[156].mxu1 %v2873_v60  ;;  %5595 = vmatpush3.bf16.msra.mxu0 %v5823_v7 }
 0x40f   :  { %5632 = vmatprep.subr.bf16.mxu0 %v7206_v45 }
 0x449   :  { %v5174_v27 = vpop.f32.mrb[80].mxu1 }
 0x44a   :  { %v5175_v16 = vpop.f32.mrb[81].mxu1 }
 0x44b   :  { %v5176_v47 = vadd.f32 %v5175_v16, %v5174_v27  ;;  %v5177_v2 = vpop.f32.mrb[82].mxu1 }
 0x44c   :  { %v5238_v52 = vpop.f32.mrb[96].mxu0  ;;  %v5178_v23 = vpop.f32.mrb[83].mxu1 }
 0x44d   :  { %v3574_v57 = vadd.f32 %v5176_v47, %v7619_v38  ;;  %v5179_v61 = vadd.f32 %v5178_v23, %v5177_v2  ;;  %v5239_v0 = vpop.f32.mrb[97].mxu0 }
 0x44e   :  { %v5240_v54 = vadd.f32 %v5239_v0, %v5238_v52  ;;  %v5241_v59 = vpop.f32.mrb[98].mxu0 }
 0x44f   :  { %v3577_v48 = vadd.f32 %v5179_v61, %v7619_v38  ;;  %v5242_v21 = vpop.f32.mrb[99].mxu0 }
 0x450   :  { %v7623_v34 = vadd.f32 %v5240_v54, %v3574_v57  ;;  %v5243_v3 = vadd.f32 %v5242_v21, %v5241_v59 }
 0x451   :  { %v5180_v17 = vpop.f32.mrb[84].mxu1 }
 0x452   :  { %v7625_v15 = vadd.f32 %v5243_v3, %v3577_v48  ;;  %v5181_v42 = vpop.f32.mrb[85].mxu1 }
 0x453   :  { %v5182_v10 = vadd.f32 %v5181_v42, %v5180_v17  ;;  %v5183_v14 = vpop.f32.mrb[86].mxu1 }
 0x454   :  { %v5244_v43 = vpop.f32.mrb[100].mxu0  ;;  %v5184_v53 = vpop.f32.mrb[87].mxu1 }
 0x455   :  { %v3582_v49 = vadd.f32 %v5182_v10, %v7619_v38  ;;  %v5185_v13 = vadd.f32 %v5184_v53, %v5183_v14  ;;  %v5245_v37 = vpop.f32.mrb[101].mxu0 }
 0x456   :  { %v5246_v39 = vadd.f32 %v5245_v37, %v5244_v43  ;;  %v5247_v58 = vpop.f32.mrb[102].mxu0 }
 0x457   :  { %v3585_v26 = vadd.f32 %v5185_v13, %v7619_v38  ;;  %v5248_v33 = vpop.f32.mrb[103].mxu0 }
 0x458   :  { %v7629_v36 = vadd.f32 %v5246_v39, %v3582_v49  ;;  %v5249_v63 = vadd.f32 %v5248_v33, %v5247_v58 }
 0x459   :  { %v5186_v9 = vpop.f32.mrb[88].mxu1 }
 0x45a   :  { %v7634_v50 = vadd.f32 %v5249_v63, %v3585_v26  ;;  %v5187_v31 = vpop.f32.mrb[89].mxu1 }
 0x45b   :  { %v5188_v19 = vadd.f32 %v5187_v31, %v5186_v9  ;;  %v5189_v12 = vpop.f32.mrb[90].mxu1 }
 0x45c   :  { %v5250_v55 = vpop.f32.mrb[104].mxu0  ;;  %v5190_v44 = vpop.f32.mrb[91].mxu1 }
 0x45d   :  { %v3590_v51 = vadd.f32 %v5188_v19, %v7619_v38  ;;  %v5191_v32 = vadd.f32 %v5190_v44, %v5189_v12  ;;  %v5251_v35 = vpop.f32.mrb[105].mxu0 }
 0x45e   :  { %v5252_v20 = vadd.f32 %v5251_v35, %v5250_v55  ;;  %v5253_v24 = vpop.f32.mrb[106].mxu0 }
 0x45f   :  { %v3593_v62 = vadd.f32 %v5191_v32, %v7619_v38  ;;  %v5254_v41 = vpop.f32.mrb[107].mxu0 }
 0x460   :  { %v7641_v29 = vadd.f32 %v5252_v20, %v3590_v51  ;;  %v5255_v22 = vadd.f32 %v5254_v41, %v5253_v24 }
 0x461   :  { %v5192_v40 = vpop.f32.mrb[92].mxu1 }
 0x462   :  { %v7644_v28 = vadd.f32 %v5255_v22, %v3593_v62  ;;  %v5193_v5 = vpop.f32.mrb[93].mxu1 }
 0x463   :  { %v5194_v11 = vadd.f32 %v5193_v5, %v5192_v40  ;;  %v5195_v18 = vpop.f32.mrb[94].mxu1 }
 0x464   :  { %v5256_v4 = vpop.f32.mrb[108].mxu0  ;;  %v5196_v60 = vpop.f32.mrb[95].mxu1 }
 0x465   :  { %v3598_v25 = vadd.f32 %v5194_v11, %v7619_v38  ;;  %v5197_v30 = vadd.f32 %v5196_v60, %v5195_v18  ;;  %v5257_v1 = vpop.f32.mrb[109].mxu0 }
 0x466   :  { %v5258_v8 = vadd.f32 %v5257_v1, %v5256_v4  ;;  %v5259_v6 = vpop.f32.mrb[110].mxu0 }
 0x467   :  { %v3601_v56 = vadd.f32 %v5197_v30, %v7619_v38  ;;  %v5260_v27 = vpop.f32.mrb[111].mxu0 }
 0x468   :  { %v7648_v16 = vadd.f32 %v5258_v8, %v3598_v25  ;;  %v5261_v47 = vadd.f32 %v5260_v27, %v5259_v6 }
 0x469   :  { %v5198_v45 = vpop.f32.mrb[96].mxu1 }
 0x46a   :  { %v7650_v2 = vadd.f32 %v5261_v47, %v3601_v56  ;;  %v5199_v52 = vpop.f32.mrb[97].mxu1 }
 0x46b   :  { %v5200_v23 = vadd.f32 %v5199_v52, %v5198_v45  ;;  %v5201_v57 = vpop.f32.mrb[98].mxu1 }
 0x46c   :  { %v5262_v61 = vpop.f32.mrb[112].mxu0  ;;  %v5202_v0 = vpop.f32.mrb[99].mxu1 }
 0x46d   :  { %v3606_v54 = vadd.f32 %v5200_v23, %v7619_v38  ;;  %v5203_v59 = vadd.f32 %v5202_v0, %v5201_v57  ;;  %v5263_v48 = vpop.f32.mrb[113].mxu0 }
 0x46e   :  { %v5264_v21 = vadd.f32 %v5263_v48, %v5262_v61  ;;  %v5265_v3 = vpop.f32.mrb[114].mxu0 }
 0x46f   :  { %v3609_v17 = vadd.f32 %v5203_v59, %v7619_v38  ;;  %v5266_v42 = vpop.f32.mrb[115].mxu0 }
 0x470   :  { %v7654_v10 = vadd.f32 %v5264_v21, %v3606_v54  ;;  %v5267_v14 = vadd.f32 %v5266_v42, %v5265_v3 }
 0x471   :  { %v5204_v43 = vpop.f32.mrb[100].mxu1 }
 0x472   :  { %v7656_v53 = vadd.f32 %v5267_v14, %v3609_v17  ;;  %v5205_v49 = vpop.f32.mrb[101].mxu1 }
 0x473   :  { %v5206_v13 = vadd.f32 %v5205_v49, %v5204_v43  ;;  %v5207_v37 = vpop.f32.mrb[102].mxu1 }
 0x474   :  { %v5268_v39 = vpop.f32.mrb[116].mxu0  ;;  %v5208_v58 = vpop.f32.mrb[103].mxu1 }
 0x475   :  { %v3614_v26 = vadd.f32 %v5206_v13, %v7619_v38  ;;  %v5209_v33 = vadd.f32 %v5208_v58, %v5207_v37  ;;  %v5269_v63 = vpop.f32.mrb[117].mxu0 }
 0x476   :  { %v5270_v46 = vadd.f32 %v5269_v63, %v5268_v39  ;;  %v5271_v9 = vpop.f32.mrb[118].mxu0 }
 0x477   :  { %v3617_v31 = vadd.f32 %v5209_v33, %v7619_v38  ;;  %v5272_v19 = vpop.f32.mrb[119].mxu0 }
 0x478   :  { %v7660_v12 = vadd.f32 %v5270_v46, %v3614_v26  ;;  %v5273_v55 = vadd.f32 %v5272_v19, %v5271_v9 }
 0x479   :  { %v5210_v44 = vpop.f32.mrb[104].mxu1 }
 0x47a   :  { %v7662_v51 = vadd.f32 %v5273_v55, %v3617_v31  ;;  %v5211_v32 = vpop.f32.mrb[105].mxu1 }
 0x47b   :  { %v5212_v35 = vadd.f32 %v5211_v32, %v5210_v44  ;;  %v5213_v7 = vpop.f32.mrb[106].mxu1 }
 0x47c   :  { %v5274_v20 = vpop.f32.mrb[120].mxu0  ;;  %v5214_v24 = vpop.f32.mrb[107].mxu1 }
 0x47d   :  { %v3622_v62 = vadd.f32 %v5212_v35, %v7619_v38  ;;  %v5215_v41 = vadd.f32 %v5214_v24, %v5213_v7  ;;  %v5275_v22 = vpop.f32.mrb[121].mxu0 }
 0x47e   :  { %v5276_v40 = vadd.f32 %v5275_v22, %v5274_v20  ;;  %v5277_v5 = vpop.f32.mrb[122].mxu0 }
 0x47f   :  { %v3625_v11 = vadd.f32 %v5215_v41, %v7619_v38  ;;  %v5278_v18 = vpop.f32.mrb[123].mxu0 }
 0x480   :  { %v7666_v4 = vadd.f32 %v5276_v40, %v3622_v62  ;;  %v5279_v60 = vadd.f32 %v5278_v18, %v5277_v5 }
 0x481   :  { %v5216_v25 = vpop.f32.mrb[108].mxu1 }
 0x482   :  { %v7668_v30 = vadd.f32 %v5279_v60, %v3625_v11  ;;  %v5217_v1 = vpop.f32.mrb[109].mxu1 }
 0x483   :  { %v5218_v8 = vadd.f32 %v5217_v1, %v5216_v25  ;;  %v5219_v6 = vpop.f32.mrb[110].mxu1 }
 0x484   :  { %v5280_v56 = vpop.f32.mrb[124].mxu0  ;;  %v5220_v27 = vpop.f32.mrb[111].mxu1 }
 0x485   :  { %v3630_v47 = vadd.f32 %v5218_v8, %v7619_v38  ;;  %v5221_v45 = vadd.f32 %v5220_v27, %v5219_v6  ;;  %v5281_v52 = vpop.f32.mrb[125].mxu0 }
 0x486   :  { %v5282_v23 = vadd.f32 %v5281_v52, %v5280_v56  ;;  %v5283_v57 = vpop.f32.mrb[126].mxu0 }
 0x487   :  { %v3633_v61 = vadd.f32 %v5221_v45, %v7619_v38  ;;  %v5284_v0 = vpop.f32.mrb[127].mxu0 }
 0x488   :  { %v7672_v54 = vadd.f32 %v5282_v23, %v3630_v47  ;;  %v5285_v59 = vadd.f32 %v5284_v0, %v5283_v57 }
 0x489   :  { %v5302_v48 = vpop.f32.mrb[112].mxu1 }
 0x48a   :  { %v7674_v21 = vadd.f32 %v5285_v59, %v3633_v61  ;;  %v5303_v3 = vpop.f32.mrb[113].mxu1 }
 0x48b   :  { %v5304_v17 = vadd.f32 %v5303_v3, %v5302_v48  ;;  %v5305_v42 = vpop.f32.mrb[114].mxu1 }
 0x48c   :  { %v5366_v14 = vpop.f32.mrb[128].mxu0  ;;  %v5306_v43 = vpop.f32.mrb[115].mxu1 }
 0x48d   :  { %v3768_v49 = vadd.f32 %v5304_v17, %v7623_v34  ;;  %v5307_v13 = vadd.f32 %v5306_v43, %v5305_v42  ;;  %v5367_v37 = vpop.f32.mrb[129].mxu0 }
 0x48e   :  { %v5368_v39 = vadd.f32 %v5367_v37, %v5366_v14  ;;  %v5369_v58 = vpop.f32.mrb[130].mxu0 }
 0x48f   :  { %v3771_v38 = vadd.f32 %v5307_v13, %v7625_v15  ;;  %v5370_v26 = vpop.f32.mrb[131].mxu0 }
 0x490   :  { %v5371_v33 = vadd.f32 %v5370_v26, %v5369_v58  ;;  %v7678_v63 = vadd.f32 %v5368_v39, %v3768_v49 }
 0x491   :  { %v5308_v46 = vpop.f32.mrb[116].mxu1 }
 0x492   :  { %v5309_v9 = vpop.f32.mrb[117].mxu1  ;;  %v7680_v31 = vadd.f32 %v5371_v33, %v3771_v38 }
 0x493   :  { %v5310_v19 = vadd.f32 %v5309_v9, %v5308_v46  ;;  %v5311_v55 = vpop.f32.mrb[118].mxu1 }
 0x494   :  { %v5372_v44 = vpop.f32.mrb[132].mxu0  ;;  %v5312_v32 = vpop.f32.mrb[119].mxu1 }
 0x495   :  { %v3776_v34 = vadd.f32 %v5310_v19, %v7629_v36  ;;  %v5313_v35 = vadd.f32 %v5312_v32, %v5311_v55  ;;  %v5373_v7 = vpop.f32.mrb[133].mxu0 }
 0x496   :  { %v5374_v20 = vadd.f32 %v5373_v7, %v5372_v44  ;;  %v5375_v24 = vpop.f32.mrb[134].mxu0 }
 0x497   :  { %v3779_v15 = vadd.f32 %v5313_v35, %v7634_v50  ;;  %v5376_v62 = vpop.f32.mrb[135].mxu0 }
 0x498   :  { %v5377_v41 = vadd.f32 %v5376_v62, %v5375_v24  ;;  %v7684_v22 = vadd.f32 %v5374_v20, %v3776_v34 }
 0x499   :  { %v5314_v40 = vpop.f32.mrb[120].mxu1 }
 0x49a   :  { %v5315_v5 = vpop.f32.mrb[121].mxu1  ;;  %v7686_v11 = vadd.f32 %v5377_v41, %v3779_v15 }
 0x49b   :  { %v5316_v18 = vadd.f32 %v5315_v5, %v5314_v40  ;;  %v5317_v60 = vpop.f32.mrb[122].mxu1 }
 0x49c   :  { %v5378_v25 = vpop.f32.mrb[136].mxu0  ;;  %v5318_v1 = vpop.f32.mrb[123].mxu1 }
 0x49d   :  { %v3784_v36 = vadd.f32 %v5316_v18, %v7641_v29  ;;  %v5319_v8 = vadd.f32 %v5318_v1, %v5317_v60  ;;  %v5379_v6 = vpop.f32.mrb[137].mxu0 }
 0x49e   :  { %v5380_v56 = vadd.f32 %v5379_v6, %v5378_v25  ;;  %v5381_v27 = vpop.f32.mrb[138].mxu0 }
 0x49f   :  { %v3787_v50 = vadd.f32 %v5319_v8, %v7644_v28  ;;  %v5382_v47 = vpop.f32.mrb[139].mxu0 }
 0x4a0   :  { %v5383_v45 = vadd.f32 %v5382_v47, %v5381_v27  ;;  %v7690_v52 = vadd.f32 %v5380_v56, %v3784_v36 }
 0x4a1   :  { %v5320_v23 = vpop.f32.mrb[124].mxu1 }
 0x4a2   :  { %v5321_v57 = vpop.f32.mrb[125].mxu1  ;;  %v7692_v61 = vadd.f32 %v5383_v45, %v3787_v50 }
 0x4a3   :  { %v5322_v0 = vadd.f32 %v5321_v57, %v5320_v23  ;;  %v5323_v59 = vpop.f32.mrb[126].mxu1 }
 0x4a4   :  { %v5384_v48 = vpop.f32.mrb[140].mxu0  ;;  %v5324_v3 = vpop.f32.mrb[127].mxu1 }
 0x4a5   :  { %v3792_v29 = vadd.f32 %v5322_v0, %v7648_v16  ;;  %v5325_v17 = vadd.f32 %v5324_v3, %v5323_v59  ;;  %v5385_v42 = vpop.f32.mrb[141].mxu0 }
 0x4a6   :  { %v5386_v14 = vadd.f32 %v5385_v42, %v5384_v48  ;;  %v5387_v43 = vpop.f32.mrb[142].mxu0 }
 0x4a7   :  { %v3795_v28 = vadd.f32 %v5325_v17, %v7650_v2  ;;  %v5388_v49 = vpop.f32.mrb[143].mxu0 }
 0x4a8   :  { %v5389_v13 = vadd.f32 %v5388_v49, %v5387_v43  ;;  %v7696_v37 = vadd.f32 %v5386_v14, %v3792_v29 }
 0x4a9   :  { %v5326_v39 = vpop.f32.mrb[128].mxu1 }
 0x4aa   :  { %v5327_v58 = vpop.f32.mrb[129].mxu1  ;;  %v7698_v38 = vadd.f32 %v5389_v13, %v3795_v28 }
 0x4ab   :  { %v5328_v26 = vadd.f32 %v5327_v58, %v5326_v39  ;;  %v5329_v33 = vpop.f32.mrb[130].mxu1 }
 0x4ac   :  { %v5390_v46 = vpop.f32.mrb[144].mxu0  ;;  %v5330_v9 = vpop.f32.mrb[131].mxu1 }
 0x4ad   :  { %v3800_v16 = vadd.f32 %v5328_v26, %v7654_v10  ;;  %v5331_v19 = vadd.f32 %v5330_v9, %v5329_v33  ;;  %v5391_v55 = vpop.f32.mrb[145].mxu0 }
 0x4ae   :  { %v5392_v44 = vadd.f32 %v5391_v55, %v5390_v46  ;;  %v5393_v32 = vpop.f32.mrb[146].mxu0 }
 0x4af   :  { %v3803_v2 = vadd.f32 %v5331_v19, %v7656_v53  ;;  %v5394_v34 = vpop.f32.mrb[147].mxu0 }
 0x4b0   :  { %v5395_v35 = vadd.f32 %v5394_v34, %v5393_v32  ;;  %v7702_v7 = vadd.f32 %v5392_v44, %v3800_v16 }
 0x4b1   :  { %v5332_v20 = vpop.f32.mrb[132].mxu1 }
 0x4b2   :  { %v5333_v24 = vpop.f32.mrb[133].mxu1  ;;  %v7704_v15 = vadd.f32 %v5395_v35, %v3803_v2 }
 0x4b3   :  { %v5334_v62 = vadd.f32 %v5333_v24, %v5332_v20  ;;  %v5335_v41 = vpop.f32.mrb[134].mxu1 }
 0x4b4   :  { %v5396_v40 = vpop.f32.mrb[148].mxu0  ;;  %v5336_v5 = vpop.f32.mrb[135].mxu1 }
 0x4b5   :  { %v3808_v10 = vadd.f32 %v5334_v62, %v7660_v12  ;;  %v5337_v18 = vadd.f32 %v5336_v5, %v5335_v41  ;;  %v5397_v60 = vpop.f32.mrb[149].mxu0 }
 0x4b6   :  { %v5398_v25 = vadd.f32 %v5397_v60, %v5396_v40  ;;  %v5399_v1 = vpop.f32.mrb[150].mxu0 }
 0x4b7   :  { %v3811_v53 = vadd.f32 %v5337_v18, %v7662_v51  ;;  %v5400_v36 = vpop.f32.mrb[151].mxu0  ;;  %v4059_v18 = vld [vmem:[%s7886_s15 + $0x18] sm:$0xff] }
 0x4b8   :  { %v5401_v8 = vadd.f32 %v5400_v36, %v5399_v1  ;;  %v7708_v6 = vadd.f32 %v5398_v25, %v3808_v10 }
 0x4b9   :  { %v5338_v56 = vpop.f32.mrb[136].mxu1 }
 0x4ba   :  { %v5339_v27 = vpop.f32.mrb[137].mxu1  ;;  %v7710_v50 = vadd.f32 %v5401_v8, %v3811_v53 }
 0x4bb   :  { %v5340_v47 = vadd.f32 %v5339_v27, %v5338_v56  ;;  %v5341_v45 = vpop.f32.mrb[138].mxu1 }
 0x4bc   :  { %v5402_v23 = vpop.f32.mrb[152].mxu0  ;;  %v5342_v57 = vpop.f32.mrb[139].mxu1 }
 0x4bd   :  { %v3816_v12 = vadd.f32 %v5340_v47, %v7666_v4  ;;  %v5343_v0 = vadd.f32 %v5342_v57, %v5341_v45  ;;  %v5403_v59 = vpop.f32.mrb[153].mxu0 }
 0x4be   :  { %v5404_v48 = vadd.f32 %v5403_v59, %v5402_v23  ;;  %v5405_v3 = vpop.f32.mrb[154].mxu0 }
 0x4bf   :  { %v3819_v51 = vadd.f32 %v5343_v0, %v7668_v30  ;;  %v5406_v29 = vpop.f32.mrb[155].mxu0 }
 0x4c0   :  { %v5407_v17 = vadd.f32 %v5406_v29, %v5405_v3  ;;  %v7714_v42 = vadd.f32 %v5404_v48, %v3816_v12 }
 0x4c1   :  { %v5344_v14 = vpop.f32.mrb[140].mxu1 }
 0x4c2   :  { %v5345_v43 = vpop.f32.mrb[141].mxu1  ;;  %v7716_v28 = vadd.f32 %v5407_v17, %v3819_v51  ;;  %v4062_v17 = vld [vmem:[%s7886_s15 + $0x30] sm:$0xff] }
 0x4c3   :  { %v5346_v49 = vadd.f32 %v5345_v43, %v5344_v14  ;;  %v5347_v13 = vpop.f32.mrb[142].mxu1  ;;  %v5859_v43 = vld [vmem:[#allocation2 + $0x20] sm:$0xff] }
 0x4c4   :  { %v5408_v39 = vpop.f32.mrb[156].mxu0  ;;  %v5348_v58 = vpop.f32.mrb[143].mxu1 }
 0x4c5   :  { %v3824_v4 = vadd.f32 %v5346_v49, %v7672_v54  ;;  %v5349_v26 = vadd.f32 %v5348_v58, %v5347_v13  ;;  %v5409_v33 = vpop.f32.mrb[157].mxu0  ;;  %v5860_v13 = vld [vmem:[#allocation2 + $0x28] sm:$0xff]  ;;  %v4060_v58 = vld [vmem:[%s7886_s15 + $0x20] sm:$0xff] }
 0x4c6   :  { %v5410_v46 = vadd.f32 %v5409_v33, %v5408_v39  ;;  %v5411_v9 = vpop.f32.mrb[158].mxu0 }
 0x4c7   :  { %v3827_v30 = vadd.f32 %v5349_v26, %v7674_v21  ;;  %v5412_v16 = vpop.f32.mrb[159].mxu0  ;;  %v4058_v21 = vld [vmem:[%s7886_s15 + $0x10] sm:$0xff]  ;;  %v4063_v26 = vld [vmem:[%s7886_s15 + $0x38] sm:$0xff] }
 0x4c8   :  { %v5413_v19 = vadd.f32 %v5412_v16, %v5411_v9  ;;  %v7720_v55 = vadd.f32 %v5410_v46, %v3824_v4  ;;  %v5861_v46 = vld [vmem:[#allocation2 + $0x10] sm:$0xff] }
 0x4c9   :  { %v5566_v44 = vpop.f32.mrb[144].mxu1 }
 0x4ca   :  { %v3970_v32 = vadd.f32 %v5566_v44, %v7684_v22  ;;  %v3961_v2 = vpop.f32.mrb[145].mxu1  ;;  %v7723_v34 = vadd.f32 %v5413_v19, %v3827_v30  ;;  %v4056_v22 = vld [vmem:[%s7886_s15] sm:$0xff]  ;;  %v5862_v30 = vld [vmem:[#allocation2 + $0x18] sm:$0xff] }
 0x4cb   :  { %v3962_v35 = vadd.f32 %v3961_v2, %v7678_v63  ;;  %v5567_v20 = vpop.f32.mrb[146].mxu1  ;;  %v7737_v63 = vld [vmem:[%s7891_s9 + $0x1] ss:$0 sm:$0xff] }
 0x4cc   :  { %v4026_v54 = vmax.f32 %v3970_v32, 0.0  ;;  %v3973_v24 = vadd.f32 %v5567_v20, %v7686_v11  ;;  %v3964_v62 = vpop.f32.mrb[147].mxu1  ;;  %v4061_v32 = vld [vmem:[%s7886_s15 + $0x28] sm:$0xff] }
 0x4cd   :  { %v4024_v41 = vmax.f32 %v3962_v35, 0.0  ;;  %v3965_v40 = vadd.f32 %v3964_v62, %v7680_v31  ;;  %v4057_v31 = vld [vmem:[%s7886_s15 + $0x8] sm:$0xff] }
 0x4ce   :  { %v4042_v5 = vmin.f32 %v4026_v54, 6.0  ;;  %v4027_v10 = vmax.f32 %v3973_v24, 0.0 }
 0x4cf   :  { %v4040_v11 = vmin.f32 %v4024_v41, 6.0  ;;  %v4025_v60 = vmax.f32 %v3965_v40, 0.0 }
 0x4d0   :  { %v4074_v25 = vmul.f32 %v4058_v21, %v4042_v5  ;;  %v4043_v1 = vmin.f32 %v4027_v10, 6.0 }
 0x4d1   :  { %v4072_v53 = vmul.f32 %v4056_v22, %v4040_v11  ;;  %v4041_v36 = vmin.f32 %v4025_v60, 6.0  ;;  %v5570_v8 = vpop.f32.mrb[148].mxu1 }
 0x4d2   :  { %v4098_v56 = vmul.f32 %v7737_v63, %v4074_v25  ;;  %v4075_v27 = vmul.f32 %v4059_v18, %v4043_v1  ;;  %v3986_v47 = vadd.f32 %v5570_v8, %v7696_v37  ;;  %v3977_v45 = vpop.f32.mrb[149].mxu1 }
 0x4d3   :  { %v4096_v23 = vmul.f32 %v7737_v63, %v4072_v53  ;;  %v4073_v57 = vmul.f32 %v4057_v31, %v4041_v36  ;;  %v3978_v12 = vadd.f32 %v3977_v45, %v7690_v52  ;;  %v5571_v0 = vpop.f32.mrb[150].mxu1 }
 0x4d4   :  { %v4099_v59 = vmul.f32 %v7737_v63, %v4075_v27  ;;  %v4030_v48 = vmax.f32 %v3986_v47, 0.0  ;;  %v3989_v3 = vadd.f32 %v5571_v0, %v7698_v38  ;;  %v3980_v51 = vpop.f32.mrb[151].mxu1  ;;  %v4114_v49 = vadd.f32 %v5859_v43, %v4098_v56  ;;  %v5863_v56 = vld [vmem:[#allocation2 + $0x40] sm:$0xff] }
 0x4d5   :  { %v4097_v29 = vmul.f32 %v7737_v63, %v4073_v57  ;;  %v4028_v37 = vmax.f32 %v3978_v12, 0.0  ;;  %v3981_v14 = vadd.f32 %v3980_v51, %v7692_v61  ;;  %v4112_v9 = vadd.f32 %v5861_v46, %v4096_v23  ;;  %v4067_v23 = vld [vmem:[%s7886_s15 + $0x58] sm:$0xff]  ;;  %v5865_v12 = vld [vmem:[#allocation2 + $0x30] sm:$0xff]  ;;  %v4065_v51 = vld [vmem:[%s7886_s15 + $0x48] sm:$0xff] }
 0x4d6   :  { %v4115_v52 = vadd.f32 %v5860_v13, %v4099_v59  ;;  %v4046_v39 = vmin.f32 %v4030_v48, 6.0  ;;  %v4031_v38 = vmax.f32 %v3989_v3, 0.0  ;;  %v5866_v59 = vld [vmem:[#allocation2 + $0x38] sm:$0xff] }
 0x4d7   :  { %v4044_v4 = vmin.f32 %v4028_v37, 6.0  ;;  %v4029_v33 = vmax.f32 %v3981_v14, 0.0  ;;  %v4113_v61 = vadd.f32 %v5862_v30, %v4097_v29 }
 0x4d8   :  { %v4129_v16 = vpack.c.bf16 %v4115_v52, %v4114_v49  ;;  %v4078_v19 = vmul.f32 %v4062_v17, %v4046_v39  ;;  %v4047_v44 = vmin.f32 %v4031_v38, 6.0 }
 0x4d9   :  { %v4076_v2 = vmul.f32 %v4060_v58, %v4044_v4  ;;  %v4045_v35 = vmin.f32 %v4029_v33, 6.0  ;;  %v5574_v20 = vpop.f32.mrb[152].mxu1  ;;  %v4128_v54 = vpack.c.bf16 %v4113_v61, %v4112_v9 }
 0x4da   :  { %v4102_v24 = vmul.f32 %v7737_v63, %v4078_v19  ;;  %v4079_v62 = vmul.f32 %v4063_v26, %v4047_v44  ;;  %v4002_v21 = vadd.f32 %v5574_v20, %v7708_v6  ;;  %v3993_v41 = vpop.f32.mrb[153].mxu1  ;;  %v4066_v6 = vld [vmem:[%s7886_s15 + $0x50] sm:$0xff] }
 0x4db   :  { %v4100_v40 = vmul.f32 %v7737_v63, %v4076_v2  ;;  %v4077_v5 = vmul.f32 %v4061_v32, %v4045_v35  ;;  %v3994_v22 = vadd.f32 %v3993_v41, %v7702_v7  ;;  %v5575_v10 = vpop.f32.mrb[154].mxu1  ;;  %5596 = vmatprep.mubr.bf16.mxu0 %v4128_v54  ;;  %v4064_v7 = vld [vmem:[%s7886_s15 + $0x40] sm:$0xff] }
 0x4dc   :  { %v4103_v11 = vmul.f32 %v7737_v63, %v4079_v62  ;;  %v4034_v18 = vmax.f32 %v4002_v21, 0.0  ;;  %v4005_v60 = vadd.f32 %v5575_v10, %v7710_v50  ;;  %v3996_v25 = vpop.f32.mrb[155].mxu1  ;;  %5597 = vmatmul.mubr.bf16.vlgmr.msra.gmra.mrb[160].mxu0 %v4129_v16  ;;  %v4118_v27 = vadd.f32 %v5863_v56, %v4102_v24  ;;  %v5864_v50 = vld [vmem:[#allocation2 + $0x48] sm:$0xff]  ;;  %v5867_v2 = vld [vmem:[#allocation2 + $0x60] sm:$0xff]  ;;  %v4071_v24 = vld [vmem:[%s7886_s15 + $0x78] sm:$0xff] }
 0x4dd   :  { %v4101_v1 = vmul.f32 %v7737_v63, %v4077_v5  ;;  %v4032_v31 = vmax.f32 %v3994_v22, 0.0  ;;  %v3997_v53 = vadd.f32 %v3996_v25, %v7704_v15  ;;  %v4116_v0 = vadd.f32 %v5865_v12, %v4100_v40  ;;  %v5869_v21 = vld [vmem:[#allocation2 + $0x50] sm:$0xff]  ;;  %v5870_v40 = vld [vmem:[#allocation2 + $0x58] sm:$0xff]  ;;  %v4069_v10 = vld [vmem:[%s7886_s15 + $0x68] sm:$0xff] }
 0x4de   :  { %v4050_v36 = vmin.f32 %v4034_v18, 6.0  ;;  %v4035_v8 = vmax.f32 %v4005_v60, 0.0  ;;  %v4119_v47 = vadd.f32 %v5864_v50, %v4103_v11 }
 0x4df   :  { %v4048_v45 = vmin.f32 %v4032_v31, 6.0  ;;  %v4033_v57 = vmax.f32 %v3997_v53, 0.0  ;;  %v4117_v15 = vadd.f32 %v5866_v59, %v4101_v1  ;;  %v7809_v59 = vld [vmem:[#allocation2] sm:$0xff] }
 0x4e0   :  { %v4082_v48 = vmul.f32 %v4066_v6, %v4050_v36  ;;  %v4051_v3 = vmin.f32 %v4035_v8, 6.0  ;;  %v4131_v29 = vpack.c.bf16 %v4119_v47, %v4118_v27  ;;  %v5871_v8 = vld [vmem:[#allocation2 + $0x80] sm:$0xff]  ;;  %v5872_v27 = vld [vmem:[#allocation2 + $0x88] sm:$0xff]  ;;  %v5873_v47 = vld [vmem:[#allocation2 + $0x70] sm:$0xff]  ;;  %5628 = vmatprep.mubr.msk.bf16.mxu1 %vm5877_vm1, %v7809_v59 }
 0x4e1   :  { %v4080_v17 = vmul.f32 %v4064_v7, %v4048_v45  ;;  %v4049_v37 = vmin.f32 %v4033_v57, 6.0  ;;  %v5578_v14 = vpop.f32.mrb[156].mxu1  ;;  %v4130_v43 = vpack.c.bf16 %v4117_v15, %v4116_v0  ;;  %v5825_v15 = vld [vmem:[%s7893_s13 + $0x8] sm:$0xff]  }
 0x4e2   :  { %v4106_v49 = vmul.f32 %v7737_v63, %v4082_v48  ;;  %v4083_v13 = vmul.f32 %v4067_v23, %v4051_v3  ;;  %v4018_v52 = vadd.f32 %v5578_v14, %v7720_v55  ;;  %v4009_v39 = vpop.f32.mrb[157].mxu1  ;;  %v4070_v55 = vld [vmem:[%s7886_s15 + $0x70] sm:$0xff]  ;;  %v5874_v23 = vld [vmem:[#allocation2 + $0x78] sm:$0xff] }
 0x4e3   :  { %v4104_v58 = vmul.f32 %v7737_v63, %v4080_v17  ;;  %v4081_v38 = vmul.f32 %v4065_v51, %v4049_v37  ;;  %v4010_v4 = vadd.f32 %v4009_v39, %v7714_v42  ;;  %v5579_v26 = vpop.f32.mrb[158].mxu1  ;;  %5600 = vmatprep.mubr.bf16.mxu0 %v4130_v43  ;;  %v4068_v42 = vld [vmem:[%s7886_s15 + $0x60] sm:$0xff]  ;;  %v5826_v48 = vld [vmem:[%s7893_s13 + $0x10] sm:$0xff]   ;;  %v5827_v3 = vld [vmem:[%s7893_s13 + $0x18] sm:$0xff]  }
 0x4e4   :  { %v4107_v33 = vmul.f32 %v7737_v63, %v4083_v13  ;;  %v4038_v46 = vmax.f32 %v4018_v52, 0.0  ;;  %v4021_v9 = vadd.f32 %v5579_v26, %v7723_v34  ;;  %v4012_v30 = vpop.f32.mrb[159].mxu1  ;;  %5601 = vmatmul.mubr.bf16.gmra.mrb[164].mxu0 %v4131_v29  ;;  %v4122_v35 = vadd.f32 %v5867_v2, %v4106_v49  ;;  %v5868_v34 = vld [vmem:[#allocation2 + $0x68] sm:$0xff]  ;;  %v5828_v51 = vld [vmem:[%s7893_s13 + $0x20] sm:$0xff]   ;;  %v5830_v17 = vld [vmem:[%s7893_s13 + $0x30] sm:$0xff]  }
 0x4e5   :  { %v4105_v61 = vmul.f32 %v7737_v63, %v4081_v38  ;;  %v4036_v16 = vmax.f32 %v4010_v4, 0.0  ;;  %v4013_v19 = vadd.f32 %v4012_v30, %v7716_v28  ;;  %v4120_v41 = vadd.f32 %v5869_v21, %v4104_v58  ;;  %v5829_v29 = vld [vmem:[%s7893_s13 + $0x28] sm:$0xff]   ;;  %v7844_v37 = vld [vmem:[%s7894_s11] ss:$0 sm:$0xff] }
 0x4e6   :  { %v4054_v44 = vmin.f32 %v4038_v46, 6.0  ;;  %v4039_v32 = vmax.f32 %v4021_v9, 0.0  ;;  %v4123_v20 = vadd.f32 %v5868_v34, %v4107_v33 }
 0x4e7   :  { %v4052_v54 = vmin.f32 %v4036_v16, 6.0  ;;  %v4037_v62 = vmax.f32 %v4013_v19, 0.0  ;;  %v4121_v28 = vadd.f32 %v5870_v40, %v4105_v61 }
 0x4e8   :  { %v4086_v5 = vmul.f32 %v4070_v55, %v4054_v44  ;;  %v4055_v22 = vmin.f32 %v4039_v32, 6.0  ;;  %v4133_v11 = vpack.c.bf16 %v4123_v20, %v4122_v35 }
 0x4e9   :  { %v4084_v18 = vmul.f32 %v4068_v42, %v4052_v54  ;;  %v4053_v60 = vmin.f32 %v4037_v62, 6.0  ;;  %v4132_v25 = vpack.c.bf16 %v4121_v28, %v4120_v41 }
 0x4ea   :  { %v4110_v1 = vmul.f32 %v7737_v63, %v4086_v5  ;;  %v4087_v6 = vmul.f32 %v4071_v24, %v4055_v22 }
 0x4eb   :  { %v4108_v31 = vmul.f32 %v7737_v63, %v4084_v18  ;;  %v4085_v53 = vmul.f32 %v4069_v10, %v4053_v60  ;;  %5604 = vmatprep.mubr.bf16.mxu0 %v4132_v25 }
 0x4ec   :  { %v4111_v36 = vmul.f32 %v7737_v63, %v4087_v6  ;;  %5605 = vmatmul.mubr.bf16.gmra.mrb[168].mxu0 %v4133_v11  ;;  %v4126_v56 = vadd.f32 %v5871_v8, %v4110_v1 }
 0x4ed   :  { %v4109_v7 = vmul.f32 %v7737_v63, %v4085_v53  ;;  %v4124_v45 = vadd.f32 %v5873_v47, %v4108_v31  ;;  %v5824_v63 = vld [vmem:[%s7893_s13] sm:$0xff]  }
 0x4ee   :  { %v4127_v50 = vadd.f32 %v5872_v27, %v4111_v36  ;;  %5633 = vmatpush3.bf16.msra.mxu0 %v5824_v63 }
 0x4ef   :  { %v4125_v57 = vadd.f32 %v5874_v23, %v4109_v7  ;;  %5634 = vmatprep.subr.bf16.mxu0 %v7809_v59 }
 0x4f0   :  { %v4135_v12 = vpack.c.bf16 %v4127_v50, %v4126_v56 }
 0x4f1   :  { %v4134_v0 = vpack.c.bf16 %v4125_v57, %v4124_v45 }
 0x4f2   :  { %5635 = vmatpush3.bf16.msra.mxu0 %v5825_v15 }
 0x4f3   :  { %5608 = vmatprep.mubr.bf16.mxu0 %v4134_v0  ;;  %5636 = vmatprep.subr.bf16.mxu0 %v7809_v59 }
 0x4f4   :  { %5609 = vmatmul.mubr.bf16.gmra.mrb[172].mxu0 %v4135_v12 }
 0x4f5   :  { %5648 = vmatprep.mubr.msk.bf16.mxu0 %vm5877_vm1, %v7809_v59 }
 0x4f6   :  { %5637 = vmatpush3.bf16.msra.mxu0 %v5826_v48 }
 0x4f7   :  { %5638 = vmatprep.subr.bf16.mxu0 %v7809_v59 }
 0x4fa   :  { %5639 = vmatpush3.bf16.msra.mxu0 %v5827_v3 }
 0x4fb   :  { %5640 = vmatprep.subr.bf16.mxu0 %v7809_v59 }
 0x4fe   :  { %5641 = vmatpush3.bf16.msra.mxu0 %v5828_v51 }
 0x4ff   :  { %5642 = vmatprep.subr.bf16.mxu0 %v7809_v59 }
 0x502   :  { %5643 = vmatpush3.bf16.msra.mxu0 %v5829_v29 }
 0x503   :  { %5644 = vmatprep.subr.bf16.mxu0 %v7809_v59 }
 0x506   :  { %5645 = vmatpush3.bf16.msra.mxu0 %v5830_v17 }
 0x507   :  { %5646 = vmatprep.subr.bf16.mxu0 %v7809_v59 }
 0x5af   :  { %v5598_v14 = vpop.f32.mrb[160].mxu0 }
 0x5b0   :  { %v4250_v43 = vadd.f32 %v5598_v14, %v7844_v37  ;;  %v4241_v49 = vpop.f32.mrb[161].mxu0 }
 0x5b1   :  { %v4242_v13 = vadd.f32 %v7844_v37, %v4241_v49  ;;  %v5599_v52 = vpop.f32.mrb[162].mxu0 }
 0x5b2   :  { %v4306_v39 = vmax.f32 %v4250_v43, 0.0  ;;  %v4253_v58 = vadd.f32 %v5599_v52, %v7844_v37  ;;  %v4244_v38 = vpop.f32.mrb[163].mxu0 }
 0x5b3   :  { %v4304_v4 = vmax.f32 %v4242_v13, 0.0  ;;  %v4245_v26 = vadd.f32 %v7844_v37, %v4244_v38 }
 0x5b4   :  { %v4307_v33 = vmax.f32 %v4253_v58, 0.0  ;;  %v4322_v9 = vmin.f32 %v4306_v39, 6.0 }
 0x5b5   :  { %v4305_v46 = vmax.f32 %v4245_v26, 0.0  ;;  %v4320_v61 = vmin.f32 %v4304_v4, 6.0 }
 0x5b6   :  { %v4323_v30 = vmin.f32 %v4307_v33, 6.0  ;;  %v5831_v33 = vld [vmem:[%s7893_s13 + $0x38] sm:$0xff]  }
 0x5b7   :  { %v4321_v55 = vmin.f32 %v4305_v46, 6.0  ;;  %v5602_v16 = vpop.f32.mrb[164].mxu0  ;;  %5647 = vmatpush3.bf16.msra.mxu0 %v5831_v33 }
 0x5b8   :  { %v4338_v19 = vpack.c.bf16 %v4323_v30, %v4322_v9  ;;  %v4266_v44 = vadd.f32 %v5602_v16, %v7844_v37  ;;  %v4257_v42 = vpop.f32.mrb[165].mxu0 }
 0x5b9   :  { %v4337_v32 = vpack.c.bf16 %v4321_v55, %v4320_v61  ;;  %v4258_v2 = vadd.f32 %v7844_v37, %v4257_v42  ;;  %v5603_v35 = vpop.f32.mrb[166].mxu0 }
 0x5ba   :  { %v4310_v34 = vmax.f32 %v4266_v44, 0.0  ;;  %v4269_v20 = vadd.f32 %v5603_v35, %v7844_v37  ;;  %v4260_v54 = vpop.f32.mrb[167].mxu0 }
 0x5bb   :  { %v4308_v24 = vmax.f32 %v4258_v2, 0.0  ;;  %v4261_v62 = vadd.f32 %v7844_v37, %v4260_v54  ;;  %5613 = vmatpush3.bf16.msra.mxu1 %v4337_v32 }
 0x5bc   :  { %v4311_v21 = vmax.f32 %v4269_v20, 0.0  ;;  %5614 = vmatprep.subr.bf16.mxu1 %v7809_v59  ;;  %v4326_v40 = vmin.f32 %v4310_v34, 6.0 }
 0x5bd   :  { %v4309_v41 = vmax.f32 %v4261_v62, 0.0  ;;  %v4324_v5 = vmin.f32 %v4308_v24, 6.0 }
 0x5be   :  { %v4327_v28 = vmin.f32 %v4311_v21, 6.0 }
 0x5bf   :  { %v4325_v22 = vmin.f32 %v4309_v41, 6.0  ;;  %v5606_v10 = vpop.f32.mrb[168].mxu0  ;;  %5615 = vmatpush3.bf16.msra.mxu1 %v4338_v19 }
 0x5c0   :  { %v4340_v11 = vpack.c.bf16 %v4327_v28, %v4326_v40  ;;  %v4282_v18 = vadd.f32 %v5606_v10, %v7844_v37  ;;  %v4273_v60 = vpop.f32.mrb[169].mxu0  ;;  %5616 = vmatprep.subr.bf16.mxu1 %v7809_v59 }
 0x5c1   :  { %v4339_v25 = vpack.c.bf16 %v4325_v22, %v4324_v5  ;;  %v4274_v1 = vadd.f32 %v7844_v37, %v4273_v60  ;;  %v5607_v6 = vpop.f32.mrb[170].mxu0 }
 0x5c2   :  { %v4314_v31 = vmax.f32 %v4282_v18, 0.0  ;;  %v4285_v53 = vadd.f32 %v5607_v6, %v7844_v37  ;;  %v4276_v36 = vpop.f32.mrb[171].mxu0 }
 0x5c3   :  { %v4312_v7 = vmax.f32 %v4274_v1, 0.0  ;;  %v4277_v8 = vadd.f32 %v7844_v37, %v4276_v36  ;;  %5617 = vmatpush3.bf16.msra.mxu1 %v4339_v25 }
 0x5c4   :  { %v4315_v56 = vmax.f32 %v4285_v53, 0.0  ;;  %5618 = vmatprep.subr.bf16.mxu1 %v7809_v59  ;;  %v4330_v50 = vmin.f32 %v4314_v31, 6.0 }
 0x5c5   :  { %v4313_v27 = vmax.f32 %v4277_v8, 0.0  ;;  %v4328_v45 = vmin.f32 %v4312_v7, 6.0 }
 0x5c6   :  { %v4331_v47 = vmin.f32 %v4315_v56, 6.0 }
 0x5c7   :  { %v4329_v23 = vmin.f32 %v4313_v27, 6.0  ;;  %v5610_v57 = vpop.f32.mrb[172].mxu0  ;;  %5619 = vmatpush3.bf16.msra.mxu1 %v4340_v11 }
 0x5c8   :  { %v4342_v12 = vpack.c.bf16 %v4331_v47, %v4330_v50  ;;  %v4298_v0 = vadd.f32 %v5610_v57, %v7844_v37  ;;  %v4289_v63 = vpop.f32.mrb[173].mxu0  ;;  %5620 = vmatprep.subr.bf16.mxu1 %v7809_v59 }
 0x5c9   :  { %v4341_v15 = vpack.c.bf16 %v4329_v23, %v4328_v45  ;;  %v4290_v48 = vadd.f32 %v7844_v37, %v4289_v63  ;;  %v5611_v3 = vpop.f32.mrb[174].mxu0 }
 0x5ca   :  { %v4318_v51 = vmax.f32 %v4298_v0, 0.0  ;;  %v4301_v29 = vadd.f32 %v5611_v3, %v7844_v37  ;;  %v4292_v17 = vpop.f32.mrb[175].mxu0 }
 0x5cb   :  { %v4316_v14 = vmax.f32 %v4290_v48, 0.0  ;;  %v4293_v43 = vadd.f32 %v7844_v37, %v4292_v17  ;;  %5621 = vmatpush3.bf16.msra.mxu1 %v4341_v15  ;;  %v4336_v37 = vld [vmem:[%s7895_s12] sm:$0xf] }
 0x5cc   :  { %v4319_v49 = vmax.f32 %v4301_v29, 0.0  ;;  %5622 = vmatprep.subr.bf16.mxu1 %v7809_v59  ;;  %v4334_v52 = vmin.f32 %v4318_v51, 6.0 }
 0x5cd   :  { %v4317_v13 = vmax.f32 %v4293_v43, 0.0  ;;  %v4332_v58 = vmin.f32 %v4316_v14, 6.0 }
 0x5ce   :  { %v4335_v39 = vmin.f32 %v4319_v49, 6.0 }
 0x5cf   :  { %v4333_v38 = vmin.f32 %v4317_v13, 6.0  ;;  %5623 = vmatpush3.bf16.msra.mxu1 %v4342_v12 }
 0x5d0   :  { %v4344_v4 = vpack.c.bf16 %v4335_v39, %v4334_v52  ;;  %5624 = vmatprep.subr.bf16.mxu1 %v7809_v59 }
 0x5d1   :  { %v4343_v26 = vpack.c.bf16 %v4333_v38, %v4332_v58 }
 0x5d3   :  { %5625 = vmatpush3.bf16.msra.mxu1 %v4343_v26 }
 0x5d4   :  { %5626 = vmatprep.subr.bf16.mxu1 %v7809_v59  ;;  %v4851_v59 = vld [vmem:[%s7896_s14] ss:$0 sm:$0xff] }
 0x5d7   :  { %5627 = vmatpush3.bf16.msra.mxu1 %v4344_v4 }
 0x5da   :  { %5629 = vmatmul.mubr.bf16.vlgmr.msra.gmra.mrb[160].mxu1 %v4336_v37 }
 0x6ad   :  { %v4379_v46 = vpop.f32.mrb[160].mxu1 }
 0x6ae   :  { %v4385_v9 = vpack.c.bf16 %v4379_v46, %v4379_v46  ;;  %v5630_v30 = vpop.f32.mrb[161].mxu1 }
 0x6af   :  { %v4382_v61 = vpop.f32.mrb[162].mxu1 }
 0x6b0   :  { %v5631_v55 = vpop.f32.mrb[163].mxu1  ;;  %5649 = vmatmul.mubr.bf16.vlgmr.msra.gmra.mrb[176].mxu0 %v4385_v9 }
 0x783   :  { %v4491_v16 = vpop.f32.mrb[176].mxu0 }
 0x784   :  { %v4492_v19 = vadd.f32 %v4851_v59, %v4491_v16  ;;  %v5650_v44 = vpop.f32.mrb[177].mxu0 }
 0x785   :  { %v4494_v42 = vpop.f32.mrb[178].mxu0 }
 0x786   :  { %4497 = vst [vmem:[%s7897_s16] sm:$0xff] %v4492_v19  ;;  %v5651_v32 = vpop.f32.mrb[179].mxu0 }

</bundles_post_ra>
